<compile_context>
chip_gen: v6e
topology: v6e:2x2x1
jax: 0.10.0
libtpu: 0.0.40
codegen_flags: <defaults>
</compile_context>

<pallas_src>
import functools

import jax
import jax.numpy as jnp
from jax.experimental import pallas as pl
from jax.experimental.pallas import tpu as pltpu

K = 7
PAD = (K - 1) // 2


def _round_up(v, m):
    return (v + m - 1) // m * m


# ---------------------------------------------------------------------------
# Shared in-kernel helpers
# ---------------------------------------------------------------------------
def _stream_pool(x_ref, max_sc, sum_sc, *, sub, c_base, c_total, needs_mask):
    """Fold the channels of x_ref[0] (block channel extent x_ref.shape[1]) into
    the running max/sum scratch, `sub` lane-dense rows at a time.

    `c_base` is the first *global* channel of this block; when `needs_mask`,
    channels >= c_total (the cdiv-tiling overhang) are ignored."""
    c_blk = x_ref.shape[1]
    hw = x_ref.shape[2]
    n_full = c_blk // sub
    rem = c_blk - n_full * sub

    row_iota = (jax.lax.broadcasted_iota(jnp.int32, (sub, hw), 0)
                if needs_mask else None)

    def fold(c0, rows):
        chunk = x_ref[0, pl.ds(c0, rows), :].astype(jnp.float32)
        if needs_mask:
            gidx = c_base + c0 + row_iota[0:rows, :]
            valid = gidx < c_total
            mx = jnp.where(valid, chunk, -jnp.inf)
            sm = jnp.where(valid, chunk, 0.0)
        else:
            mx = sm = chunk
        max_sc[0:rows, :] = jnp.maximum(max_sc[0:rows, :], mx)
        sum_sc[0:rows, :] = sum_sc[0:rows, :] + sm

    if n_full:
        @pl.loop(0, n_full)
        def _(i):
            fold(pl.multiple_of(i * sub, sub), sub)
    if rem:
        fold(n_full * sub, rem)


def _conv_gate_epilogue(max_sc, sum_sc, pad_sc, w_ref, bnb_ref, *, c_total, h, w):
    """Collapse the running scratch to the two pooled maps, run the 7x7 conv
    (BN scale already folded into the taps), add the BN bias and apply the
    sigmoid.  Leaves the flattened f32 gate in max_sc[0, :]."""
    # Pooled maps, staged lane-dense in row 0 of each scratch.
    max_sc[0:1, :] = jnp.max(max_sc[...], axis=0, keepdims=True)
    sum_sc[0:1, :] = jnp.sum(sum_sc[...], axis=0, keepdims=True) * (1.0 / c_total)

    # Zero-padded conv input built row by row with static offsets only
    # (avoids an in-kernel (hw,) -> (h, w) reshape/relayout).
    pad_sc[...] = jnp.zeros(pad_sc.shape, jnp.float32)
    for r in range(h):
        pad_sc[0, PAD + r:PAD + r + 1, PAD:PAD + w] = max_sc[0:1, r * w:(r + 1) * w]
        pad_sc[1, PAD + r:PAD + r + 1, PAD:PAD + w] = sum_sc[0:1, r * w:(r + 1) * w]

    # 7x7 conv, fully unrolled: static sublane/lane offsets fold into loads.
    # NOTE: `acc` lives in vregs; fine for attention-gate sized maps. For very
    # large H*W it should move to VMEM scratch / be H-tiled.
    acc = jnp.zeros((h, w), jnp.float32)
    for ci in range(2):
        for kh in range(K):
            rows = pad_sc[ci, kh:kh + h, :]                 # (h, w + 2*PAD)
            for kw in range(K):
                tap = w_ref[ci * K * K + kh * K + kw]       # SMEM scalar (BN-folded)
                acc = acc + tap * rows[:, kw:kw + w]

    z = acc + bnb_ref[0]                                    # folded BN bias
    ez = jnp.exp(-jnp.clip(z, -30.0, 30.0))                 # EUP exp, finite range
    gate = pl.reciprocal(1.0 + ez)                          # exact 1/x (1e-5 tol)

    # Flatten the gate back to lane-dense (1, hw); max_sc row 0 is free now.
    for r in range(h):
        max_sc[0:1, r * w:(r + 1) * w] = gate[r:r + 1, :]


# ---------------------------------------------------------------------------
# Kernel A: fully fused per-n path (pool + conv/BN/sigmoid + multiply).
# grid = (N,); x block (1, C, H*W) stays resident in VMEM and is read twice
# from VMEM but only once from HBM.
# ---------------------------------------------------------------------------
def _fused_kernel(w_ref, bnb_ref, x_ref, o_ref, max_sc, sum_sc, pad_sc,
                  *, h, w, sub):
    c = x_ref.shape[1]
    hw = h * w

    # Scratch persists across grid steps -> reset every batch element.
    max_sc[...] = jnp.full(max_sc.shape, -jnp.inf, jnp.float32)
    sum_sc[...] = jnp.zeros(sum_sc.shape, jnp.float32)

    _stream_pool(x_ref, max_sc, sum_sc, sub=sub, c_base=0, c_total=c,
                 needs_mask=False)
    _conv_gate_epilogue(max_sc, sum_sc, pad_sc, w_ref, bnb_ref,
                        c_total=c, h=h, w=w)

    # out = x * gate, streamed in native dtype; broadcast hoisted out of loop.
    gate_b = jnp.broadcast_to(max_sc[0:1, :], (sub, hw)).astype(o_ref.dtype)
    n_full = c // sub
    rem = c - n_full * sub
    if n_full:
        @pl.loop(0, n_full)
        def _(i):
            c0 = pl.multiple_of(i * sub, sub)
            o_ref[0, pl.ds(c0, sub), :] = x_ref[0, pl.ds(c0, sub), :] * gate_b
    if rem:
        c0 = n_full * sub
        o_ref[0, c0:c0 + rem, :] = x_ref[0, c0:c0 + rem, :] * gate_b[0:rem, :]


# ---------------------------------------------------------------------------
# Kernel B1 (fallback): channel pool with the conv/BN/sigmoid fused into the
# last-C-tile epilogue; gate written lane-dense in x.dtype.
# grid = (N, cdiv(C, c_tile)); C axis is a reduction ("arbitrary").
# ---------------------------------------------------------------------------
def _pool_gate_kernel(w_ref, bnb_ref, x_ref, g_ref, max_sc, sum_sc, pad_sc,
                      *, c_total, c_tile, h, w, sub, needs_mask):
    ct = pl.program_id(1)

    @pl.when(ct == 0)
    def _():
        max_sc[...] = jnp.full(max_sc.shape, -jnp.inf, jnp.float32)
        sum_sc[...] = jnp.zeros(sum_sc.shape, jnp.float32)

    _stream_pool(x_ref, max_sc, sum_sc, sub=sub, c_base=ct * c_tile,
                 c_total=c_total, needs_mask=needs_mask)

    @pl.when(ct == pl.num_programs(1) - 1)
    def _():
        _conv_gate_epilogue(max_sc, sum_sc, pad_sc, w_ref, bnb_ref,
                            c_total=c_total, h=h, w=w)
        g_ref[0, 0:1, :] = max_sc[0:1, :].astype(g_ref.dtype)


# ---------------------------------------------------------------------------
# Kernel B2 (fallback): out = x * gate on lane-dense (c_tile, H*W) blocks,
# both grid axes "parallel".
# ---------------------------------------------------------------------------
def _scale_kernel(g_ref, x_ref, o_ref):
    o_ref[0] = x_ref[0] * g_ref[0]        # (c_tile, hw) * (1, hw), native dtype


# ---------------------------------------------------------------------------
# Host-side helpers
# ---------------------------------------------------------------------------
def _vmem_budget_bytes():
    """Half of physical VMEM (generation dependent: 128 MiB v5e/v6e, 64 MiB per
    TensorCore on v7x); conservative fallback if the query fails."""
    cap = 64 << 20
    try:
        info = pltpu.get_tpu_info()
        cap = int(getattr(info, "vmem_capacity_bytes", cap)) or cap
    except Exception:
        pass
    return cap // 2


def _pick_c_tile(c, hw, itemsize, c_align, target_bytes=1 << 20):
    """Channel tile for the multi-pass path: sublane-aligned, ~target_bytes per
    x block.  cdiv-tiled: no divisibility requirement (the pool kernel masks
    the overhanging channels of the last tile)."""
    if c * hw * itemsize <= target_bytes:
        return c
    ct = (target_bytes // (hw * itemsize)) // c_align * c_align
    ct = max(c_align, ct)
    return min(ct, c)


def spatial_gate(x, conv_w, bn_gamma, bn_beta, bn_mean, bn_var, eps=1e-5,
                 *, force_multi_pass=False, c_tile=None):
    """x: (N, C, H, W); conv_w: (1, 2, 7, 7); bn_*: (1,). Returns (N, C, H, W)."""
    n, c, h, w = x.shape
    hw = h * w
    itemsize = x.dtype.itemsize

    x_flat = x.reshape(n, c, hw)                       # lane-dense layout, free

    # Eval-mode BN folded: scale into the conv taps, bias kept separately.
    bn_scale = (bn_gamma / jnp.sqrt(bn_var + eps)).astype(jnp.float32)
    bn_bias = (bn_beta.astype(jnp.float32) - bn_mean.astype(jnp.float32) * bn_scale)
    w_flat = (conv_w.astype(jnp.float32) * bn_scale[0]).reshape(-1)   # (2*K*K,)
    bnb = bn_bias.reshape(1)                                          # (1,)

    sub = max(8, 32 // itemsize)                       # 8 f32 / 16 bf16 / 32 int8

    pool_scratch = [pltpu.VMEM((sub, hw), jnp.float32),               # running max
                    pltpu.VMEM((sub, hw), jnp.float32),               # running sum
                    pltpu.VMEM((2, h + 2 * PAD, w + 2 * PAD), jnp.float32)]
    smem_specs = [pl.BlockSpec(memory_space=pltpu.MemorySpace.SMEM),  # conv taps
                  pl.BlockSpec(memory_space=pltpu.MemorySpace.SMEM)]  # bn bias

    scratch_bytes = (2 * sub * _round_up(hw, 128) * 4
                     + 2 * _round_up(h + 2 * PAD, 8) * _round_up(w + 2 * PAD, 128) * 4)
    fused_bytes = 4 * c * hw * itemsize + scratch_bytes + (1 << 20)   # dbl-buffered
    budget = _vmem_budget_bytes()

    # ---- Fully fused single-pass path ---------------------------------------
    if not force_multi_pass and fused_bytes <= budget:
        out_flat = pl.pallas_call(
            functools.partial(_fused_kernel, h=h, w=w, sub=sub),
            out_shape=jax.ShapeDtypeStruct((n, c, hw), x.dtype),
            grid_spec=pltpu.PrefetchScalarGridSpec(
                num_scalar_prefetch=0,
                grid=(n,),
                in_specs=smem_specs + [
                    pl.BlockSpec((1, c, hw), lambda i: (i, 0, 0)),
                ],
                out_specs=pl.BlockSpec((1, c, hw), lambda i: (i, 0, 0)),
                scratch_shapes=pool_scratch,
            ),
            compiler_params=pltpu.CompilerParams(
                dimension_semantics=("parallel",),
                vmem_limit_bytes=int(budget)),
        )(w_flat, bnb, x_flat)
        return out_flat.reshape(n, c, h, w)

    # ---- Multi-pass fallback (large C*HW) ------------------------------------
    if c_tile is None:
        c_tile = _pick_c_tile(c, hw, itemsize, sub)
    n_ct = pl.cdiv(c, c_tile)
    needs_mask = (c % c_tile) != 0

    gate = pl.pallas_call(
        functools.partial(_pool_gate_kernel, c_total=c, c_tile=c_tile,
                          h=h, w=w, sub=sub, needs_mask=needs_mask),
        out_shape=jax.ShapeDtypeStruct((n, 1, hw), x.dtype),
        grid_spec=pltpu.PrefetchScalarGridSpec(
            num_scalar_prefetch=0,
            grid=(n, n_ct),
            in_specs=smem_specs + [
                pl.BlockSpec((1, c_tile, hw), lambda i, j: (i, j, 0)),
            ],
            out_specs=pl.BlockSpec((1, 1, hw), lambda i, j: (i, 0, 0)),
            scratch_shapes=pool_scratch,
        ),
        compiler_params=pltpu.CompilerParams(
            dimension_semantics=("parallel", "arbitrary")),
    )(w_flat, bnb, x_flat)

    out_flat = pl.pallas_call(
        _scale_kernel,
        out_shape=jax.ShapeDtypeStruct((n, c, hw), x.dtype),
        grid_spec=pltpu.PrefetchScalarGridSpec(
            num_scalar_prefetch=0,
            grid=(n, n_ct),
            in_specs=[
                pl.BlockSpec((1, 1, hw), lambda i, j: (i, 0, 0)),       # gate
                pl.BlockSpec((1, c_tile, hw), lambda i, j: (i, j, 0)),  # x
            ],
            out_specs=pl.BlockSpec((1, c_tile, hw), lambda i, j: (i, j, 0)),
        ),
        compiler_params=pltpu.CompilerParams(
            dimension_semantics=("parallel", "parallel")),
    )(gate, x_flat)

    return out_flat.reshape(n, c, h, w)


def spatial_gate_ref(x, conv_w, bn_gamma, bn_beta, bn_mean, bn_var, eps=1e-5):
    """Plain-JAX reference mirroring the PyTorch forward (eval-mode BN)."""
    ch_max = jnp.max(x, axis=1)
    ch_mean = jnp.mean(x, axis=1)
    pooled = jnp.stack([ch_max, ch_mean], axis=1)                     # (N, 2, H, W)
    out = jax.lax.conv_general_dilated(
        pooled, conv_w, window_strides=(1, 1),
        padding=((PAD, PAD), (PAD, PAD)),
        dimension_numbers=("NCHW", "OIHW", "NCHW"),
        precision=jax.lax.Precision.HIGHEST)
    scale_bn = (bn_gamma / jnp.sqrt(bn_var + eps)).reshape(1, -1, 1, 1)
    bias_bn = (bn_beta - bn_mean * bn_gamma / jnp.sqrt(bn_var + eps)).reshape(1, -1, 1, 1)
    out = out * scale_bn + bias_bn
    return x * jax.nn.sigmoid(out)


if __name__ == "__main__":
    key = jax.random.PRNGKey(0)
    k_x, k_w, k_x2 = jax.random.split(key, 3)

    # Shapes consistent with the module: N=2, C=4, 16x16 spatial maps.
    N, C, H, W = 2, 4, 16, 16
    x = jax.random.normal(k_x, (N, C, H, W), jnp.float32)
    conv_w = jax.random.normal(k_w, (1, 2, K, K), jnp.float32) * 0.1
    bn_gamma = jnp.full((1,), 1.3, jnp.float32)
    bn_beta = jnp.full((1,), -0.05, jnp.float32)
    bn_mean = jnp.full((1,), 0.02, jnp.float32)
    bn_var = jnp.full((1,), 0.9, jnp.float32)
    args = (conv_w, bn_gamma, bn_beta, bn_mean, bn_var)

    # 1) Default fully-fused single-pass path.
    out = jax.block_until_ready(spatial_gate(x, *args))
    ref = spatial_gate_ref(x, *args)
    assert out.shape == (N, C, H, W)
    assert jnp.allclose(out, ref, atol=1e-5, rtol=1e-5), "fused path mismatch"

    # 2) Multi-pass fallback path (pool+conv fused epilogue, separate scale
    #    pass), including the cdiv channel tiling with tail masking.
    x2 = jax.random.normal(k_x2, (1, 20, H, W), jnp.float32)
    ref2 = spatial_gate_ref(x2, *args)
    out2a = jax.block_until_ready(spatial_gate(x2, *args, force_multi_pass=True))
    assert jnp.allclose(out2a, ref2, atol=1e-5, rtol=1e-5), "multi-pass mismatch"
    out2b = jax.block_until_ready(
        spatial_gate(x2, *args, force_multi_pass=True, c_tile=8))
    assert jnp.allclose(out2b, ref2, atol=1e-5, rtol=1e-5), "masked-tail mismatch"

    print("KERNEL_OK")
</pallas_src>

<mosaic_0001>
module attributes {stable_mosaic.version = 11 : i64} {
  func.func @_fused_kernel(%arg0: i32, %arg1: memref<98xf32, #tpu.memory_space<smem>>, %arg2: memref<1xf32, #tpu.memory_space<smem>>, %arg3: memref<1x4x256xf32, #tpu.memory_space<vmem>>, %arg4: memref<1x4x256xf32, #tpu.memory_space<vmem>>, %arg5: memref<8x256xf32, #tpu.memory_space<vmem>>, %arg6: memref<8x256xf32, #tpu.memory_space<vmem>>, %arg7: memref<2x22x22xf32, #tpu.memory_space<vmem>>) attributes {dimension_semantics = [#tpu.dimension_semantics<parallel>], iteration_bounds = array<i64: 2>, scalar_prefetch = 0 : i64, scratch_operands = 3 : i64, tpu.core_type = #tpu.core_type<tc>, window_params = [{transform_indices = @transform_0, window_bounds = array<i64: 98>}, {transform_indices = @transform_1, window_bounds = array<i64: 1>}, {transform_indices = @transform_2, window_bounds = array<i64: 1, 4, 256>}, {transform_indices = @transform_3, window_bounds = array<i64: 1, 4, 256>}]} {
    %cst = arith.constant 0xFF800000 : f32
    %0 = vector.broadcast %cst : f32 to vector<8x256xf32>
    %c0 = arith.constant 0 : index
    %c0_0 = arith.constant 0 : index
    %1 = vector.load %arg5[%c0, %c0_0] : memref<8x256xf32, #tpu.memory_space<vmem>>, vector<8x256xf32>
    tpu.vector_store %arg5[%c0, %c0_0], %0 {strides = array<i32>} : memref<8x256xf32, #tpu.memory_space<vmem>>, vector<8x256xf32>,
    %cst_1 = arith.constant 0.000000e+00 : f32
    %2 = vector.broadcast %cst_1 : f32 to vector<8x256xf32>
    %c0_2 = arith.constant 0 : index
    %c0_3 = arith.constant 0 : index
    %3 = vector.load %arg6[%c0_2, %c0_3] : memref<8x256xf32, #tpu.memory_space<vmem>>, vector<8x256xf32>
    tpu.vector_store %arg6[%c0_2, %c0_3], %2 {strides = array<i32>} : memref<8x256xf32, #tpu.memory_space<vmem>>, vector<8x256xf32>,
    %c0_4 = arith.constant 0 : index
    %c0_5 = arith.constant 0 : index
    %c0_6 = arith.constant 0 : index
    %4 = vector.load %arg3[%c0_4, %c0_5, %c0_6] : memref<1x4x256xf32, #tpu.memory_space<vmem>>, vector<1x4x256xf32>
    %5 = vector.shape_cast %4 : vector<1x4x256xf32> to vector<4x256xf32>
    %c0_7 = arith.constant 0 : index
    %c0_8 = arith.constant 0 : index
    %6 = vector.load %arg5[%c0_7, %c0_8] : memref<8x256xf32, #tpu.memory_space<vmem>>, vector<4x256xf32>
    %7 = arith.maximumf %6, %5 : vector<4x256xf32>
    %c0_9 = arith.constant 0 : index
    %c0_10 = arith.constant 0 : index
    %8 = vector.load %arg5[%c0_9, %c0_10] : memref<8x256xf32, #tpu.memory_space<vmem>>, vector<4x256xf32>
    tpu.vector_store %arg5[%c0_9, %c0_10], %7 {strides = array<i32>} : memref<8x256xf32, #tpu.memory_space<vmem>>, vector<4x256xf32>,
    %c0_11 = arith.constant 0 : index
    %c0_12 = arith.constant 0 : index
    %9 = vector.load %arg6[%c0_11, %c0_12] : memref<8x256xf32, #tpu.memory_space<vmem>>, vector<4x256xf32>
    %10 = arith.addf %9, %5 : vector<4x256xf32>
    %c0_13 = arith.constant 0 : index
    %c0_14 = arith.constant 0 : index
    %11 = vector.load %arg6[%c0_13, %c0_14] : memref<8x256xf32, #tpu.memory_space<vmem>>, vector<4x256xf32>
    tpu.vector_store %arg6[%c0_13, %c0_14], %10 {strides = array<i32>} : memref<8x256xf32, #tpu.memory_space<vmem>>, vector<4x256xf32>,
    %c0_15 = arith.constant 0 : index
    %c0_16 = arith.constant 0 : index
    %12 = vector.load %arg5[%c0_15, %c0_16] : memref<8x256xf32, #tpu.memory_space<vmem>>, vector<8x256xf32>
    %cst_17 = arith.constant dense<0xFF800000> : vector<256xf32>
    %13 = vector.multi_reduction <maximumf>, %12, %cst_17 [0] : vector<8x256xf32> to vector<256xf32>
    %14 = vector.shape_cast %13 : vector<256xf32> to vector<1x256xf32>
    %c0_18 = arith.constant 0 : index
    %c0_19 = arith.constant 0 : index
    %15 = vector.load %arg5[%c0_18, %c0_19] : memref<8x256xf32, #tpu.memory_space<vmem>>, vector<1x256xf32>
    tpu.vector_store %arg5[%c0_18, %c0_19], %14 {strides = array<i32>} : memref<8x256xf32, #tpu.memory_space<vmem>>, vector<1x256xf32>,
    %c0_20 = arith.constant 0 : index
    %c0_21 = arith.constant 0 : index
    %16 = vector.load %arg6[%c0_20, %c0_21] : memref<8x256xf32, #tpu.memory_space<vmem>>, vector<8x256xf32>
    %cst_22 = arith.constant dense<0.000000e+00> : vector<256xf32>
    %17 = vector.multi_reduction <add>, %16, %cst_22 [0] : vector<8x256xf32> to vector<256xf32>
    %18 = vector.shape_cast %17 : vector<256xf32> to vector<1x256xf32>
    %cst_23 = arith.constant 2.500000e-01 : f32
    %19 = vector.broadcast %cst_23 : f32 to vector<1x256xf32>
    %20 = arith.mulf %18, %19 : vector<1x256xf32>
    %c0_24 = arith.constant 0 : index
    %c0_25 = arith.constant 0 : index
    %21 = vector.load %arg6[%c0_24, %c0_25] : memref<8x256xf32, #tpu.memory_space<vmem>>, vector<1x256xf32>
    tpu.vector_store %arg6[%c0_24, %c0_25], %20 {strides = array<i32>} : memref<8x256xf32, #tpu.memory_space<vmem>>, vector<1x256xf32>,
    %cst_26 = arith.constant 0.000000e+00 : f32
    %22 = vector.broadcast %cst_26 : f32 to vector<2x22x22xf32>
    %c0_27 = arith.constant 0 : index
    %c0_28 = arith.constant 0 : index
    %c0_29 = arith.constant 0 : index
    %23 = vector.load %arg7[%c0_27, %c0_28, %c0_29] : memref<2x22x22xf32, #tpu.memory_space<vmem>>, vector<2x22x22xf32>
    tpu.vector_store %arg7[%c0_27, %c0_28, %c0_29], %22 {strides = array<i32>} : memref<2x22x22xf32, #tpu.memory_space<vmem>>, vector<2x22x22xf32>,
    %c0_30 = arith.constant 0 : index
    %c0_31 = arith.constant 0 : index
    %24 = vector.load %arg5[%c0_30, %c0_31] : memref<8x256xf32, #tpu.memory_space<vmem>>, vector<1x16xf32>
    %c0_32 = arith.constant 0 : index
    %c3 = arith.constant 3 : index
    %c3_33 = arith.constant 3 : index
    %25 = vector.load %arg7[%c0_32, %c3, %c3_33] : memref<2x22x22xf32, #tpu.memory_space<vmem>>, vector<1x1x16xf32>
    %26 = vector.shape_cast %25 : vector<1x1x16xf32> to vector<1x16xf32>
    %27 = vector.shape_cast %24 : vector<1x16xf32> to vector<1x1x16xf32>
    tpu.vector_store %arg7[%c0_32, %c3, %c3_33], %27 {strides = array<i32>} : memref<2x22x22xf32, #tpu.memory_space<vmem>>, vector<1x1x16xf32>,
    %c0_34 = arith.constant 0 : index
    %c0_35 = arith.constant 0 : index
    %28 = vector.load %arg6[%c0_34, %c0_35] : memref<8x256xf32, #tpu.memory_space<vmem>>, vector<1x16xf32>
    %c1 = arith.constant 1 : index
    %c3_36 = arith.constant 3 : index
    %c3_37 = arith.constant 3 : index
    %29 = vector.load %arg7[%c1, %c3_36, %c3_37] : memref<2x22x22xf32, #tpu.memory_space<vmem>>, vector<1x1x16xf32>
    %30 = vector.shape_cast %29 : vector<1x1x16xf32> to vector<1x16xf32>
    %31 = vector.shape_cast %28 : vector<1x16xf32> to vector<1x1x16xf32>
    tpu.vector_store %arg7[%c1, %c3_36, %c3_37], %31 {strides = array<i32>} : memref<2x22x22xf32, #tpu.memory_space<vmem>>, vector<1x1x16xf32>,
    %c0_38 = arith.constant 0 : index
    %c16 = arith.constant 16 : index
    %32 = vector.load %arg5[%c0_38, %c16] : memref<8x256xf32, #tpu.memory_space<vmem>>, vector<1x16xf32>
    %c0_39 = arith.constant 0 : index
    %c4 = arith.constant 4 : index
    %c3_40 = arith.constant 3 : index
    %33 = vector.load %arg7[%c0_39, %c4, %c3_40] : memref<2x22x22xf32, #tpu.memory_space<vmem>>, vector<1x1x16xf32>
    %34 = vector.shape_cast %33 : vector<1x1x16xf32> to vector<1x16xf32>
    %35 = vector.shape_cast %32 : vector<1x16xf32> to vector<1x1x16xf32>
    tpu.vector_store %arg7[%c0_39, %c4, %c3_40], %35 {strides = array<i32>} : memref<2x22x22xf32, #tpu.memory_space<vmem>>, vector<1x1x16xf32>,
    %c0_41 = arith.constant 0 : index
    %c16_42 = arith.constant 16 : index
    %36 = vector.load %arg6[%c0_41, %c16_42] : memref<8x256xf32, #tpu.memory_space<vmem>>, vector<1x16xf32>
    %c1_43 = arith.constant 1 : index
    %c4_44 = arith.constant 4 : index
    %c3_45 = arith.constant 3 : index
    %37 = vector.load %arg7[%c1_43, %c4_44, %c3_45] : memref<2x22x22xf32, #tpu.memory_space<vmem>>, vector<1x1x16xf32>
    %38 = vector.shape_cast %37 : vector<1x1x16xf32> to vector<1x16xf32>
    %39 = vector.shape_cast %36 : vector<1x16xf32> to vector<1x1x16xf32>
    tpu.vector_store %arg7[%c1_43, %c4_44, %c3_45], %39 {strides = array<i32>} : memref<2x22x22xf32, #tpu.memory_space<vmem>>, vector<1x1x16xf32>,
    %c0_46 = arith.constant 0 : index
    %c32 = arith.constant 32 : index
    %40 = vector.load %arg5[%c0_46, %c32] : memref<8x256xf32, #tpu.memory_space<vmem>>, vector<1x16xf32>
    %c0_47 = arith.constant 0 : index
    %c5 = arith.constant 5 : index
    %c3_48 = arith.constant 3 : index
    %41 = vector.load %arg7[%c0_47, %c5, %c3_48] : memref<2x22x22xf32, #tpu.memory_space<vmem>>, vector<1x1x16xf32>
    %42 = vector.shape_cast %41 : vector<1x1x16xf32> to vector<1x16xf32>
    %43 = vector.shape_cast %40 : vector<1x16xf32> to vector<1x1x16xf32>
    tpu.vector_store %arg7[%c0_47, %c5, %c3_48], %43 {strides = array<i32>} : memref<2x22x22xf32, #tpu.memory_space<vmem>>, vector<1x1x16xf32>,
    %c0_49 = arith.constant 0 : index
    %c32_50 = arith.constant 32 : index
    %44 = vector.load %arg6[%c0_49, %c32_50] : memref<8x256xf32, #tpu.memory_space<vmem>>, vector<1x16xf32>
    %c1_51 = arith.constant 1 : index
    %c5_52 = arith.constant 5 : index
    %c3_53 = arith.constant 3 : index
    %45 = vector.load %arg7[%c1_51, %c5_52, %c3_53] : memref<2x22x22xf32, #tpu.memory_space<vmem>>, vector<1x1x16xf32>
    %46 = vector.shape_cast %45 : vector<1x1x16xf32> to vector<1x16xf32>
    %47 = vector.shape_cast %44 : vector<1x16xf32> to vector<1x1x16xf32>
    tpu.vector_store %arg7[%c1_51, %c5_52, %c3_53], %47 {strides = array<i32>} : memref<2x22x22xf32, #tpu.memory_space<vmem>>, vector<1x1x16xf32>,
    %c0_54 = arith.constant 0 : index
    %c48 = arith.constant 48 : index
    %48 = vector.load %arg5[%c0_54, %c48] : memref<8x256xf32, #tpu.memory_space<vmem>>, vector<1x16xf32>
    %c0_55 = arith.constant 0 : index
    %c6 = arith.constant 6 : index
    %c3_56 = arith.constant 3 : index
    %49 = vector.load %arg7[%c0_55, %c6, %c3_56] : memref<2x22x22xf32, #tpu.memory_space<vmem>>, vector<1x1x16xf32>
    %50 = vector.shape_cast %49 : vector<1x1x16xf32> to vector<1x16xf32>
    %51 = vector.shape_cast %48 : vector<1x16xf32> to vector<1x1x16xf32>
    tpu.vector_store %arg7[%c0_55, %c6, %c3_56], %51 {strides = array<i32>} : memref<2x22x22xf32, #tpu.memory_space<vmem>>, vector<1x1x16xf32>,
    %c0_57 = arith.constant 0 : index
    %c48_58 = arith.constant 48 : index
    %52 = vector.load %arg6[%c0_57, %c48_58] : memref<8x256xf32, #tpu.memory_space<vmem>>, vector<1x16xf32>
    %c1_59 = arith.constant 1 : index
    %c6_60 = arith.constant 6 : index
    %c3_61 = arith.constant 3 : index
    %53 = vector.load %arg7[%c1_59, %c6_60, %c3_61] : memref<2x22x22xf32, #tpu.memory_space<vmem>>, vector<1x1x16xf32>
    %54 = vector.shape_cast %53 : vector<1x1x16xf32> to vector<1x16xf32>
    %55 = vector.shape_cast %52 : vector<1x16xf32> to vector<1x1x16xf32>
    tpu.vector_store %arg7[%c1_59, %c6_60, %c3_61], %55 {strides = array<i32>} : memref<2x22x22xf32, #tpu.memory_space<vmem>>, vector<1x1x16xf32>,
    %c0_62 = arith.constant 0 : index
    %c64 = arith.constant 64 : index
    %56 = vector.load %arg5[%c0_62, %c64] : memref<8x256xf32, #tpu.memory_space<vmem>>, vector<1x16xf32>
    %c0_63 = arith.constant 0 : index
    %c7 = arith.constant 7 : index
    %c3_64 = arith.constant 3 : index
    %57 = vector.load %arg7[%c0_63, %c7, %c3_64] : memref<2x22x22xf32, #tpu.memory_space<vmem>>, vector<1x1x16xf32>
    %58 = vector.shape_cast %57 : vector<1x1x16xf32> to vector<1x16xf32>
    %59 = vector.shape_cast %56 : vector<1x16xf32> to vector<1x1x16xf32>
    tpu.vector_store %arg7[%c0_63, %c7, %c3_64], %59 {strides = array<i32>} : memref<2x22x22xf32, #tpu.memory_space<vmem>>, vector<1x1x16xf32>,
    %c0_65 = arith.constant 0 : index
    %c64_66 = arith.constant 64 : index
    %60 = vector.load %arg6[%c0_65, %c64_66] : memref<8x256xf32, #tpu.memory_space<vmem>>, vector<1x16xf32>
    %c1_67 = arith.constant 1 : index
    %c7_68 = arith.constant 7 : index
    %c3_69 = arith.constant 3 : index
    %61 = vector.load %arg7[%c1_67, %c7_68, %c3_69] : memref<2x22x22xf32, #tpu.memory_space<vmem>>, vector<1x1x16xf32>
    %62 = vector.shape_cast %61 : vector<1x1x16xf32> to vector<1x16xf32>
    %63 = vector.shape_cast %60 : vector<1x16xf32> to vector<1x1x16xf32>
    tpu.vector_store %arg7[%c1_67, %c7_68, %c3_69], %63 {strides = array<i32>} : memref<2x22x22xf32, #tpu.memory_space<vmem>>, vector<1x1x16xf32>,
    %c0_70 = arith.constant 0 : index
    %c80 = arith.constant 80 : index
    %64 = vector.load %arg5[%c0_70, %c80] : memref<8x256xf32, #tpu.memory_space<vmem>>, vector<1x16xf32>
    %c0_71 = arith.constant 0 : index
    %c8 = arith.constant 8 : index
    %c3_72 = arith.constant 3 : index
    %65 = vector.load %arg7[%c0_71, %c8, %c3_72] : memref<2x22x22xf32, #tpu.memory_space<vmem>>, vector<1x1x16xf32>
    %66 = vector.shape_cast %65 : vector<1x1x16xf32> to vector<1x16xf32>
    %67 = vector.shape_cast %64 : vector<1x16xf32> to vector<1x1x16xf32>
    tpu.vector_store %arg7[%c0_71, %c8, %c3_72], %67 {strides = array<i32>} : memref<2x22x22xf32, #tpu.memory_space<vmem>>, vector<1x1x16xf32>,
    %c0_73 = arith.constant 0 : index
    %c80_74 = arith.constant 80 : index
    %68 = vector.load %arg6[%c0_73, %c80_74] : memref<8x256xf32, #tpu.memory_space<vmem>>, vector<1x16xf32>
    %c1_75 = arith.constant 1 : index
    %c8_76 = arith.constant 8 : index
    %c3_77 = arith.constant 3 : index
    %69 = vector.load %arg7[%c1_75, %c8_76, %c3_77] : memref<2x22x22xf32, #tpu.memory_space<vmem>>, vector<1x1x16xf32>
    %70 = vector.shape_cast %69 : vector<1x1x16xf32> to vector<1x16xf32>
    %71 = vector.shape_cast %68 : vector<1x16xf32> to vector<1x1x16xf32>
    tpu.vector_store %arg7[%c1_75, %c8_76, %c3_77], %71 {strides = array<i32>} : memref<2x22x22xf32, #tpu.memory_space<vmem>>, vector<1x1x16xf32>,
    %c0_78 = arith.constant 0 : index
    %c96 = arith.constant 96 : index
    %72 = vector.load %arg5[%c0_78, %c96] : memref<8x256xf32, #tpu.memory_space<vmem>>, vector<1x16xf32>
    %c0_79 = arith.constant 0 : index
    %c9 = arith.constant 9 : index
    %c3_80 = arith.constant 3 : index
    %73 = vector.load %arg7[%c0_79, %c9, %c3_80] : memref<2x22x22xf32, #tpu.memory_space<vmem>>, vector<1x1x16xf32>
    %74 = vector.shape_cast %73 : vector<1x1x16xf32> to vector<1x16xf32>
    %75 = vector.shape_cast %72 : vector<1x16xf32> to vector<1x1x16xf32>
    tpu.vector_store %arg7[%c0_79, %c9, %c3_80], %75 {strides = array<i32>} : memref<2x22x22xf32, #tpu.memory_space<vmem>>, vector<1x1x16xf32>,
    %c0_81 = arith.constant 0 : index
    %c96_82 = arith.constant 96 : index
    %76 = vector.load %arg6[%c0_81, %c96_82] : memref<8x256xf32, #tpu.memory_space<vmem>>, vector<1x16xf32>
    %c1_83 = arith.constant 1 : index
    %c9_84 = arith.constant 9 : index
    %c3_85 = arith.constant 3 : index
    %77 = vector.load %arg7[%c1_83, %c9_84, %c3_85] : memref<2x22x22xf32, #tpu.memory_space<vmem>>, vector<1x1x16xf32>
    %78 = vector.shape_cast %77 : vector<1x1x16xf32> to vector<1x16xf32>
    %79 = vector.shape_cast %76 : vector<1x16xf32> to vector<1x1x16xf32>
    tpu.vector_store %arg7[%c1_83, %c9_84, %c3_85], %79 {strides = array<i32>} : memref<2x22x22xf32, #tpu.memory_space<vmem>>, vector<1x1x16xf32>,
    %c0_86 = arith.constant 0 : index
    %c112 = arith.constant 112 : index
    %80 = vector.load %arg5[%c0_86, %c112] : memref<8x256xf32, #tpu.memory_space<vmem>>, vector<1x16xf32>
    %c0_87 = arith.constant 0 : index
    %c10 = arith.constant 10 : index
    %c3_88 = arith.constant 3 : index
    %81 = vector.load %arg7[%c0_87, %c10, %c3_88] : memref<2x22x22xf32, #tpu.memory_space<vmem>>, vector<1x1x16xf32>
    %82 = vector.shape_cast %81 : vector<1x1x16xf32> to vector<1x16xf32>
    %83 = vector.shape_cast %80 : vector<1x16xf32> to vector<1x1x16xf32>
    tpu.vector_store %arg7[%c0_87, %c10, %c3_88], %83 {strides = array<i32>} : memref<2x22x22xf32, #tpu.memory_space<vmem>>, vector<1x1x16xf32>,
    %c0_89 = arith.constant 0 : index
    %c112_90 = arith.constant 112 : index
    %84 = vector.load %arg6[%c0_89, %c112_90] : memref<8x256xf32, #tpu.memory_space<vmem>>, vector<1x16xf32>
    %c1_91 = arith.constant 1 : index
    %c10_92 = arith.constant 10 : index
    %c3_93 = arith.constant 3 : index
    %85 = vector.load %arg7[%c1_91, %c10_92, %c3_93] : memref<2x22x22xf32, #tpu.memory_space<vmem>>, vector<1x1x16xf32>
    %86 = vector.shape_cast %85 : vector<1x1x16xf32> to vector<1x16xf32>
    %87 = vector.shape_cast %84 : vector<1x16xf32> to vector<1x1x16xf32>
    tpu.vector_store %arg7[%c1_91, %c10_92, %c3_93], %87 {strides = array<i32>} : memref<2x22x22xf32, #tpu.memory_space<vmem>>, vector<1x1x16xf32>,
    %c0_94 = arith.constant 0 : index
    %c128 = arith.constant 128 : index
    %88 = vector.load %arg5[%c0_94, %c128] : memref<8x256xf32, #tpu.memory_space<vmem>>, vector<1x16xf32>
    %c0_95 = arith.constant 0 : index
    %c11 = arith.constant 11 : index
    %c3_96 = arith.constant 3 : index
    %89 = vector.load %arg7[%c0_95, %c11, %c3_96] : memref<2x22x22xf32, #tpu.memory_space<vmem>>, vector<1x1x16xf32>
    %90 = vector.shape_cast %89 : vector<1x1x16xf32> to vector<1x16xf32>
    %91 = vector.shape_cast %88 : vector<1x16xf32> to vector<1x1x16xf32>
    tpu.vector_store %arg7[%c0_95, %c11, %c3_96], %91 {strides = array<i32>} : memref<2x22x22xf32, #tpu.memory_space<vmem>>, vector<1x1x16xf32>,
    %c0_97 = arith.constant 0 : index
    %c128_98 = arith.constant 128 : index
    %92 = vector.load %arg6[%c0_97, %c128_98] : memref<8x256xf32, #tpu.memory_space<vmem>>, vector<1x16xf32>
    %c1_99 = arith.constant 1 : index
    %c11_100 = arith.constant 11 : index
    %c3_101 = arith.constant 3 : index
    %93 = vector.load %arg7[%c1_99, %c11_100, %c3_101] : memref<2x22x22xf32, #tpu.memory_space<vmem>>, vector<1x1x16xf32>
    %94 = vector.shape_cast %93 : vector<1x1x16xf32> to vector<1x16xf32>
    %95 = vector.shape_cast %92 : vector<1x16xf32> to vector<1x1x16xf32>
    tpu.vector_store %arg7[%c1_99, %c11_100, %c3_101], %95 {strides = array<i32>} : memref<2x22x22xf32, #tpu.memory_space<vmem>>, vector<1x1x16xf32>,
    %c0_102 = arith.constant 0 : index
    %c144 = arith.constant 144 : index
    %96 = vector.load %arg5[%c0_102, %c144] : memref<8x256xf32, #tpu.memory_space<vmem>>, vector<1x16xf32>
    %c0_103 = arith.constant 0 : index
    %c12 = arith.constant 12 : index
    %c3_104 = arith.constant 3 : index
    %97 = vector.load %arg7[%c0_103, %c12, %c3_104] : memref<2x22x22xf32, #tpu.memory_space<vmem>>, vector<1x1x16xf32>
    %98 = vector.shape_cast %97 : vector<1x1x16xf32> to vector<1x16xf32>
    %99 = vector.shape_cast %96 : vector<1x16xf32> to vector<1x1x16xf32>
    tpu.vector_store %arg7[%c0_103, %c12, %c3_104], %99 {strides = array<i32>} : memref<2x22x22xf32, #tpu.memory_space<vmem>>, vector<1x1x16xf32>,
    %c0_105 = arith.constant 0 : index
    %c144_106 = arith.constant 144 : index
    %100 = vector.load %arg6[%c0_105, %c144_106] : memref<8x256xf32, #tpu.memory_space<vmem>>, vector<1x16xf32>
    %c1_107 = arith.constant 1 : index
    %c12_108 = arith.constant 12 : index
    %c3_109 = arith.constant 3 : index
    %101 = vector.load %arg7[%c1_107, %c12_108, %c3_109] : memref<2x22x22xf32, #tpu.memory_space<vmem>>, vector<1x1x16xf32>
    %102 = vector.shape_cast %101 : vector<1x1x16xf32> to vector<1x16xf32>
    %103 = vector.shape_cast %100 : vector<1x16xf32> to vector<1x1x16xf32>
    tpu.vector_store %arg7[%c1_107, %c12_108, %c3_109], %103 {strides = array<i32>} : memref<2x22x22xf32, #tpu.memory_space<vmem>>, vector<1x1x16xf32>,
    %c0_110 = arith.constant 0 : index
    %c160 = arith.constant 160 : index
    %104 = vector.load %arg5[%c0_110, %c160] : memref<8x256xf32, #tpu.memory_space<vmem>>, vector<1x16xf32>
    %c0_111 = arith.constant 0 : index
    %c13 = arith.constant 13 : index
    %c3_112 = arith.constant 3 : index
    %105 = vector.load %arg7[%c0_111, %c13, %c3_112] : memref<2x22x22xf32, #tpu.memory_space<vmem>>, vector<1x1x16xf32>
    %106 = vector.shape_cast %105 : vector<1x1x16xf32> to vector<1x16xf32>
    %107 = vector.shape_cast %104 : vector<1x16xf32> to vector<1x1x16xf32>
    tpu.vector_store %arg7[%c0_111, %c13, %c3_112], %107 {strides = array<i32>} : memref<2x22x22xf32, #tpu.memory_space<vmem>>, vector<1x1x16xf32>,
    %c0_113 = arith.constant 0 : index
    %c160_114 = arith.constant 160 : index
    %108 = vector.load %arg6[%c0_113, %c160_114] : memref<8x256xf32, #tpu.memory_space<vmem>>, vector<1x16xf32>
    %c1_115 = arith.constant 1 : index
    %c13_116 = arith.constant 13 : index
    %c3_117 = arith.constant 3 : index
    %109 = vector.load %arg7[%c1_115, %c13_116, %c3_117] : memref<2x22x22xf32, #tpu.memory_space<vmem>>, vector<1x1x16xf32>
    %110 = vector.shape_cast %109 : vector<1x1x16xf32> to vector<1x16xf32>
    %111 = vector.shape_cast %108 : vector<1x16xf32> to vector<1x1x16xf32>
    tpu.vector_store %arg7[%c1_115, %c13_116, %c3_117], %111 {strides = array<i32>} : memref<2x22x22xf32, #tpu.memory_space<vmem>>, vector<1x1x16xf32>,
    %c0_118 = arith.constant 0 : index
    %c176 = arith.constant 176 : index
    %112 = vector.load %arg5[%c0_118, %c176] : memref<8x256xf32, #tpu.memory_space<vmem>>, vector<1x16xf32>
    %c0_119 = arith.constant 0 : index
    %c14 = arith.constant 14 : index
    %c3_120 = arith.constant 3 : index
    %113 = vector.load %arg7[%c0_119, %c14, %c3_120] : memref<2x22x22xf32, #tpu.memory_space<vmem>>, vector<1x1x16xf32>
    %114 = vector.shape_cast %113 : vector<1x1x16xf32> to vector<1x16xf32>
    %115 = vector.shape_cast %112 : vector<1x16xf32> to vector<1x1x16xf32>
    tpu.vector_store %arg7[%c0_119, %c14, %c3_120], %115 {strides = array<i32>} : memref<2x22x22xf32, #tpu.memory_space<vmem>>, vector<1x1x16xf32>,
    %c0_121 = arith.constant 0 : index
    %c176_122 = arith.constant 176 : index
    %116 = vector.load %arg6[%c0_121, %c176_122] : memref<8x256xf32, #tpu.memory_space<vmem>>, vector<1x16xf32>
    %c1_123 = arith.constant 1 : index
    %c14_124 = arith.constant 14 : index
    %c3_125 = arith.constant 3 : index
    %117 = vector.load %arg7[%c1_123, %c14_124, %c3_125] : memref<2x22x22xf32, #tpu.memory_space<vmem>>, vector<1x1x16xf32>
    %118 = vector.shape_cast %117 : vector<1x1x16xf32> to vector<1x16xf32>
    %119 = vector.shape_cast %116 : vector<1x16xf32> to vector<1x1x16xf32>
    tpu.vector_store %arg7[%c1_123, %c14_124, %c3_125], %119 {strides = array<i32>} : memref<2x22x22xf32, #tpu.memory_space<vmem>>, vector<1x1x16xf32>,
    %c0_126 = arith.constant 0 : index
    %c192 = arith.constant 192 : index
    %120 = vector.load %arg5[%c0_126, %c192] : memref<8x256xf32, #tpu.memory_space<vmem>>, vector<1x16xf32>
    %c0_127 = arith.constant 0 : index
    %c15 = arith.constant 15 : index
    %c3_128 = arith.constant 3 : index
    %121 = vector.load %arg7[%c0_127, %c15, %c3_128] : memref<2x22x22xf32, #tpu.memory_space<vmem>>, vector<1x1x16xf32>
    %122 = vector.shape_cast %121 : vector<1x1x16xf32> to vector<1x16xf32>
    %123 = vector.shape_cast %120 : vector<1x16xf32> to vector<1x1x16xf32>
    tpu.vector_store %arg7[%c0_127, %c15, %c3_128], %123 {strides = array<i32>} : memref<2x22x22xf32, #tpu.memory_space<vmem>>, vector<1x1x16xf32>,
    %c0_129 = arith.constant 0 : index
    %c192_130 = arith.constant 192 : index
    %124 = vector.load %arg6[%c0_129, %c192_130] : memref<8x256xf32, #tpu.memory_space<vmem>>, vector<1x16xf32>
    %c1_131 = arith.constant 1 : index
    %c15_132 = arith.constant 15 : index
    %c3_133 = arith.constant 3 : index
    %125 = vector.load %arg7[%c1_131, %c15_132, %c3_133] : memref<2x22x22xf32, #tpu.memory_space<vmem>>, vector<1x1x16xf32>
    %126 = vector.shape_cast %125 : vector<1x1x16xf32> to vector<1x16xf32>
    %127 = vector.shape_cast %124 : vector<1x16xf32> to vector<1x1x16xf32>
    tpu.vector_store %arg7[%c1_131, %c15_132, %c3_133], %127 {strides = array<i32>} : memref<2x22x22xf32, #tpu.memory_space<vmem>>, vector<1x1x16xf32>,
    %c0_134 = arith.constant 0 : index
    %c208 = arith.constant 208 : index
    %128 = vector.load %arg5[%c0_134, %c208] : memref<8x256xf32, #tpu.memory_space<vmem>>, vector<1x16xf32>
    %c0_135 = arith.constant 0 : index
    %c16_136 = arith.constant 16 : index
    %c3_137 = arith.constant 3 : index
    %129 = vector.load %arg7[%c0_135, %c16_136, %c3_137] : memref<2x22x22xf32, #tpu.memory_space<vmem>>, vector<1x1x16xf32>
    %130 = vector.shape_cast %129 : vector<1x1x16xf32> to vector<1x16xf32>
    %131 = vector.shape_cast %128 : vector<1x16xf32> to vector<1x1x16xf32>
    tpu.vector_store %arg7[%c0_135, %c16_136, %c3_137], %131 {strides = array<i32>} : memref<2x22x22xf32, #tpu.memory_space<vmem>>, vector<1x1x16xf32>,
    %c0_138 = arith.constant 0 : index
    %c208_139 = arith.constant 208 : index
    %132 = vector.load %arg6[%c0_138, %c208_139] : memref<8x256xf32, #tpu.memory_space<vmem>>, vector<1x16xf32>
    %c1_140 = arith.constant 1 : index
    %c16_141 = arith.constant 16 : index
    %c3_142 = arith.constant 3 : index
    %133 = vector.load %arg7[%c1_140, %c16_141, %c3_142] : memref<2x22x22xf32, #tpu.memory_space<vmem>>, vector<1x1x16xf32>
    %134 = vector.shape_cast %133 : vector<1x1x16xf32> to vector<1x16xf32>
    %135 = vector.shape_cast %132 : vector<1x16xf32> to vector<1x1x16xf32>
    tpu.vector_store %arg7[%c1_140, %c16_141, %c3_142], %135 {strides = array<i32>} : memref<2x22x22xf32, #tpu.memory_space<vmem>>, vector<1x1x16xf32>,
    %c0_143 = arith.constant 0 : index
    %c224 = arith.constant 224 : index
    %136 = vector.load %arg5[%c0_143, %c224] : memref<8x256xf32, #tpu.memory_space<vmem>>, vector<1x16xf32>
    %c0_144 = arith.constant 0 : index
    %c17 = arith.constant 17 : index
    %c3_145 = arith.constant 3 : index
    %137 = vector.load %arg7[%c0_144, %c17, %c3_145] : memref<2x22x22xf32, #tpu.memory_space<vmem>>, vector<1x1x16xf32>
    %138 = vector.shape_cast %137 : vector<1x1x16xf32> to vector<1x16xf32>
    %139 = vector.shape_cast %136 : vector<1x16xf32> to vector<1x1x16xf32>
    tpu.vector_store %arg7[%c0_144, %c17, %c3_145], %139 {strides = array<i32>} : memref<2x22x22xf32, #tpu.memory_space<vmem>>, vector<1x1x16xf32>,
    %c0_146 = arith.constant 0 : index
    %c224_147 = arith.constant 224 : index
    %140 = vector.load %arg6[%c0_146, %c224_147] : memref<8x256xf32, #tpu.memory_space<vmem>>, vector<1x16xf32>
    %c1_148 = arith.constant 1 : index
    %c17_149 = arith.constant 17 : index
    %c3_150 = arith.constant 3 : index
    %141 = vector.load %arg7[%c1_148, %c17_149, %c3_150] : memref<2x22x22xf32, #tpu.memory_space<vmem>>, vector<1x1x16xf32>
    %142 = vector.shape_cast %141 : vector<1x1x16xf32> to vector<1x16xf32>
    %143 = vector.shape_cast %140 : vector<1x16xf32> to vector<1x1x16xf32>
    tpu.vector_store %arg7[%c1_148, %c17_149, %c3_150], %143 {strides = array<i32>} : memref<2x22x22xf32, #tpu.memory_space<vmem>>, vector<1x1x16xf32>,
    %c0_151 = arith.constant 0 : index
    %c240 = arith.constant 240 : index
    %144 = vector.load %arg5[%c0_151, %c240] : memref<8x256xf32, #tpu.memory_space<vmem>>, vector<1x16xf32>
    %c0_152 = arith.constant 0 : index
    %c18 = arith.constant 18 : index
    %c3_153 = arith.constant 3 : index
    %145 = vector.load %arg7[%c0_152, %c18, %c3_153] : memref<2x22x22xf32, #tpu.memory_space<vmem>>, vector<1x1x16xf32>
    %146 = vector.shape_cast %145 : vector<1x1x16xf32> to vector<1x16xf32>
    %147 = vector.shape_cast %144 : vector<1x16xf32> to vector<1x1x16xf32>
    tpu.vector_store %arg7[%c0_152, %c18, %c3_153], %147 {strides = array<i32>} : memref<2x22x22xf32, #tpu.memory_space<vmem>>, vector<1x1x16xf32>,
    %c0_154 = arith.constant 0 : index
    %c240_155 = arith.constant 240 : index
    %148 = vector.load %arg6[%c0_154, %c240_155] : memref<8x256xf32, #tpu.memory_space<vmem>>, vector<1x16xf32>
    %c1_156 = arith.constant 1 : index
    %c18_157 = arith.constant 18 : index
    %c3_158 = arith.constant 3 : index
    %149 = vector.load %arg7[%c1_156, %c18_157, %c3_158] : memref<2x22x22xf32, #tpu.memory_space<vmem>>, vector<1x1x16xf32>
    %150 = vector.shape_cast %149 : vector<1x1x16xf32> to vector<1x16xf32>
    %151 = vector.shape_cast %148 : vector<1x16xf32> to vector<1x1x16xf32>
    tpu.vector_store %arg7[%c1_156, %c18_157, %c3_158], %151 {strides = array<i32>} : memref<2x22x22xf32, #tpu.memory_space<vmem>>, vector<1x1x16xf32>,
    %cst_159 = arith.constant 0.000000e+00 : f32
    %152 = vector.broadcast %cst_159 : f32 to vector<16x16xf32>
    %c0_160 = arith.constant 0 : index
    %c0_161 = arith.constant 0 : index
    %c0_162 = arith.constant 0 : index
    %153 = vector.load %arg7[%c0_160, %c0_161, %c0_162] : memref<2x22x22xf32, #tpu.memory_space<vmem>>, vector<1x16x22xf32>
    %154 = vector.shape_cast %153 : vector<1x16x22xf32> to vector<16x22xf32>
    %c0_163 = arith.constant 0 : index
    %155 = memref.load %arg1[%c0_163] : memref<98xf32, #tpu.memory_space<smem>>
    %156 = vector.extract_strided_slice %154 {offsets = [0, 0], sizes = [16, 16], strides = [1, 1]} : vector<16x22xf32> to vector<16x16xf32>
    %157 = vector.broadcast %155 : f32 to vector<16x16xf32>
    %158 = arith.mulf %157, %156 : vector<16x16xf32>
    %159 = arith.addf %152, %158 : vector<16x16xf32>
    %c1_164 = arith.constant 1 : index
    %160 = memref.load %arg1[%c1_164] : memref<98xf32, #tpu.memory_space<smem>>
    %161 = vector.extract_strided_slice %154 {offsets = [0, 1], sizes = [16, 16], strides = [1, 1]} : vector<16x22xf32> to vector<16x16xf32>
    %162 = vector.broadcast %160 : f32 to vector<16x16xf32>
    %163 = arith.mulf %162, %161 : vector<16x16xf32>
    %164 = arith.addf %159, %163 : vector<16x16xf32>
    %c2 = arith.constant 2 : index
    %165 = memref.load %arg1[%c2] : memref<98xf32, #tpu.memory_space<smem>>
    %166 = vector.extract_strided_slice %154 {offsets = [0, 2], sizes = [16, 16], strides = [1, 1]} : vector<16x22xf32> to vector<16x16xf32>
    %167 = vector.broadcast %165 : f32 to vector<16x16xf32>
    %168 = arith.mulf %167, %166 : vector<16x16xf32>
    %169 = arith.addf %164, %168 : vector<16x16xf32>
    %c3_165 = arith.constant 3 : index
    %170 = memref.load %arg1[%c3_165] : memref<98xf32, #tpu.memory_space<smem>>
    %171 = vector.extract_strided_slice %154 {offsets = [0, 3], sizes = [16, 16], strides = [1, 1]} : vector<16x22xf32> to vector<16x16xf32>
    %172 = vector.broadcast %170 : f32 to vector<16x16xf32>
    %173 = arith.mulf %172, %171 : vector<16x16xf32>
    %174 = arith.addf %169, %173 : vector<16x16xf32>
    %c4_166 = arith.constant 4 : index
    %175 = memref.load %arg1[%c4_166] : memref<98xf32, #tpu.memory_space<smem>>
    %176 = vector.extract_strided_slice %154 {offsets = [0, 4], sizes = [16, 16], strides = [1, 1]} : vector<16x22xf32> to vector<16x16xf32>
    %177 = vector.broadcast %175 : f32 to vector<16x16xf32>
    %178 = arith.mulf %177, %176 : vector<16x16xf32>
    %179 = arith.addf %174, %178 : vector<16x16xf32>
    %c5_167 = arith.constant 5 : index
    %180 = memref.load %arg1[%c5_167] : memref<98xf32, #tpu.memory_space<smem>>
    %181 = vector.extract_strided_slice %154 {offsets = [0, 5], sizes = [16, 16], strides = [1, 1]} : vector<16x22xf32> to vector<16x16xf32>
    %182 = vector.broadcast %180 : f32 to vector<16x16xf32>
    %183 = arith.mulf %182, %181 : vector<16x16xf32>
    %184 = arith.addf %179, %183 : vector<16x16xf32>
    %c6_168 = arith.constant 6 : index
    %185 = memref.load %arg1[%c6_168] : memref<98xf32, #tpu.memory_space<smem>>
    %186 = vector.extract_strided_slice %154 {offsets = [0, 6], sizes = [16, 16], strides = [1, 1]} : vector<16x22xf32> to vector<16x16xf32>
    %187 = vector.broadcast %185 : f32 to vector<16x16xf32>
    %188 = arith.mulf %187, %186 : vector<16x16xf32>
    %189 = arith.addf %184, %188 : vector<16x16xf32>
    %c0_169 = arith.constant 0 : index
    %c1_170 = arith.constant 1 : index
    %c0_171 = arith.constant 0 : index
    %190 = vector.load %arg7[%c0_169, %c1_170, %c0_171] : memref<2x22x22xf32, #tpu.memory_space<vmem>>, vector<1x16x22xf32>
    %191 = vector.shape_cast %190 : vector<1x16x22xf32> to vector<16x22xf32>
    %c7_172 = arith.constant 7 : index
    %192 = memref.load %arg1[%c7_172] : memref<98xf32, #tpu.memory_space<smem>>
    %193 = vector.extract_strided_slice %191 {offsets = [0, 0], sizes = [16, 16], strides = [1, 1]} : vector<16x22xf32> to vector<16x16xf32>
    %194 = vector.broadcast %192 : f32 to vector<16x16xf32>
    %195 = arith.mulf %194, %193 : vector<16x16xf32>
    %196 = arith.addf %189, %195 : vector<16x16xf32>
    %c8_173 = arith.constant 8 : index
    %197 = memref.load %arg1[%c8_173] : memref<98xf32, #tpu.memory_space<smem>>
    %198 = vector.extract_strided_slice %191 {offsets = [0, 1], sizes = [16, 16], strides = [1, 1]} : vector<16x22xf32> to vector<16x16xf32>
    %199 = vector.broadcast %197 : f32 to vector<16x16xf32>
    %200 = arith.mulf %199, %198 : vector<16x16xf32>
    %201 = arith.addf %196, %200 : vector<16x16xf32>
    %c9_174 = arith.constant 9 : index
    %202 = memref.load %arg1[%c9_174] : memref<98xf32, #tpu.memory_space<smem>>
    %203 = vector.extract_strided_slice %191 {offsets = [0, 2], sizes = [16, 16], strides = [1, 1]} : vector<16x22xf32> to vector<16x16xf32>
    %204 = vector.broadcast %202 : f32 to vector<16x16xf32>
    %205 = arith.mulf %204, %203 : vector<16x16xf32>
    %206 = arith.addf %201, %205 : vector<16x16xf32>
    %c10_175 = arith.constant 10 : index
    %207 = memref.load %arg1[%c10_175] : memref<98xf32, #tpu.memory_space<smem>>
    %208 = vector.extract_strided_slice %191 {offsets = [0, 3], sizes = [16, 16], strides = [1, 1]} : vector<16x22xf32> to vector<16x16xf32>
    %209 = vector.broadcast %207 : f32 to vector<16x16xf32>
    %210 = arith.mulf %209, %208 : vector<16x16xf32>
    %211 = arith.addf %206, %210 : vector<16x16xf32>
    %c11_176 = arith.constant 11 : index
    %212 = memref.load %arg1[%c11_176] : memref<98xf32, #tpu.memory_space<smem>>
    %213 = vector.extract_strided_slice %191 {offsets = [0, 4], sizes = [16, 16], strides = [1, 1]} : vector<16x22xf32> to vector<16x16xf32>
    %214 = vector.broadcast %212 : f32 to vector<16x16xf32>
    %215 = arith.mulf %214, %213 : vector<16x16xf32>
    %216 = arith.addf %211, %215 : vector<16x16xf32>
    %c12_177 = arith.constant 12 : index
    %217 = memref.load %arg1[%c12_177] : memref<98xf32, #tpu.memory_space<smem>>
    %218 = vector.extract_strided_slice %191 {offsets = [0, 5], sizes = [16, 16], strides = [1, 1]} : vector<16x22xf32> to vector<16x16xf32>
    %219 = vector.broadcast %217 : f32 to vector<16x16xf32>
    %220 = arith.mulf %219, %218 : vector<16x16xf32>
    %221 = arith.addf %216, %220 : vector<16x16xf32>
    %c13_178 = arith.constant 13 : index
    %222 = memref.load %arg1[%c13_178] : memref<98xf32, #tpu.memory_space<smem>>
    %223 = vector.extract_strided_slice %191 {offsets = [0, 6], sizes = [16, 16], strides = [1, 1]} : vector<16x22xf32> to vector<16x16xf32>
    %224 = vector.broadcast %222 : f32 to vector<16x16xf32>
    %225 = arith.mulf %224, %223 : vector<16x16xf32>
    %226 = arith.addf %221, %225 : vector<16x16xf32>
    %c0_179 = arith.constant 0 : index
    %c2_180 = arith.constant 2 : index
    %c0_181 = arith.constant 0 : index
    %227 = vector.load %arg7[%c0_179, %c2_180, %c0_181] : memref<2x22x22xf32, #tpu.memory_space<vmem>>, vector<1x16x22xf32>
    %228 = vector.shape_cast %227 : vector<1x16x22xf32> to vector<16x22xf32>
    %c14_182 = arith.constant 14 : index
    %229 = memref.load %arg1[%c14_182] : memref<98xf32, #tpu.memory_space<smem>>
    %230 = vector.extract_strided_slice %228 {offsets = [0, 0], sizes = [16, 16], strides = [1, 1]} : vector<16x22xf32> to vector<16x16xf32>
    %231 = vector.broadcast %229 : f32 to vector<16x16xf32>
    %232 = arith.mulf %231, %230 : vector<16x16xf32>
    %233 = arith.addf %226, %232 : vector<16x16xf32>
    %c15_183 = arith.constant 15 : index
    %234 = memref.load %arg1[%c15_183] : memref<98xf32, #tpu.memory_space<smem>>
    %235 = vector.extract_strided_slice %228 {offsets = [0, 1], sizes = [16, 16], strides = [1, 1]} : vector<16x22xf32> to vector<16x16xf32>
    %236 = vector.broadcast %234 : f32 to vector<16x16xf32>
    %237 = arith.mulf %236, %235 : vector<16x16xf32>
    %238 = arith.addf %233, %237 : vector<16x16xf32>
    %c16_184 = arith.constant 16 : index
    %239 = memref.load %arg1[%c16_184] : memref<98xf32, #tpu.memory_space<smem>>
    %240 = vector.extract_strided_slice %228 {offsets = [0, 2], sizes = [16, 16], strides = [1, 1]} : vector<16x22xf32> to vector<16x16xf32>
    %241 = vector.broadcast %239 : f32 to vector<16x16xf32>
    %242 = arith.mulf %241, %240 : vector<16x16xf32>
    %243 = arith.addf %238, %242 : vector<16x16xf32>
    %c17_185 = arith.constant 17 : index
    %244 = memref.load %arg1[%c17_185] : memref<98xf32, #tpu.memory_space<smem>>
    %245 = vector.extract_strided_slice %228 {offsets = [0, 3], sizes = [16, 16], strides = [1, 1]} : vector<16x22xf32> to vector<16x16xf32>
    %246 = vector.broadcast %244 : f32 to vector<16x16xf32>
    %247 = arith.mulf %246, %245 : vector<16x16xf32>
    %248 = arith.addf %243, %247 : vector<16x16xf32>
    %c18_186 = arith.constant 18 : index
    %249 = memref.load %arg1[%c18_186] : memref<98xf32, #tpu.memory_space<smem>>
    %250 = vector.extract_strided_slice %228 {offsets = [0, 4], sizes = [16, 16], strides = [1, 1]} : vector<16x22xf32> to vector<16x16xf32>
    %251 = vector.broadcast %249 : f32 to vector<16x16xf32>
    %252 = arith.mulf %251, %250 : vector<16x16xf32>
    %253 = arith.addf %248, %252 : vector<16x16xf32>
    %c19 = arith.constant 19 : index
    %254 = memref.load %arg1[%c19] : memref<98xf32, #tpu.memory_space<smem>>
    %255 = vector.extract_strided_slice %228 {offsets = [0, 5], sizes = [16, 16], strides = [1, 1]} : vector<16x22xf32> to vector<16x16xf32>
    %256 = vector.broadcast %254 : f32 to vector<16x16xf32>
    %257 = arith.mulf %256, %255 : vector<16x16xf32>
    %258 = arith.addf %253, %257 : vector<16x16xf32>
    %c20 = arith.constant 20 : index
    %259 = memref.load %arg1[%c20] : memref<98xf32, #tpu.memory_space<smem>>
    %260 = vector.extract_strided_slice %228 {offsets = [0, 6], sizes = [16, 16], strides = [1, 1]} : vector<16x22xf32> to vector<16x16xf32>
    %261 = vector.broadcast %259 : f32 to vector<16x16xf32>
    %262 = arith.mulf %261, %260 : vector<16x16xf32>
    %263 = arith.addf %258, %262 : vector<16x16xf32>
    %c0_187 = arith.constant 0 : index
    %c3_188 = arith.constant 3 : index
    %c0_189 = arith.constant 0 : index
    %264 = vector.load %arg7[%c0_187, %c3_188, %c0_189] : memref<2x22x22xf32, #tpu.memory_space<vmem>>, vector<1x16x22xf32>
    %265 = vector.shape_cast %264 : vector<1x16x22xf32> to vector<16x22xf32>
    %c21 = arith.constant 21 : index
    %266 = memref.load %arg1[%c21] : memref<98xf32, #tpu.memory_space<smem>>
    %267 = vector.extract_strided_slice %265 {offsets = [0, 0], sizes = [16, 16], strides = [1, 1]} : vector<16x22xf32> to vector<16x16xf32>
    %268 = vector.broadcast %266 : f32 to vector<16x16xf32>
    %269 = arith.mulf %268, %267 : vector<16x16xf32>
    %270 = arith.addf %263, %269 : vector<16x16xf32>
    %c22 = arith.constant 22 : index
    %271 = memref.load %arg1[%c22] : memref<98xf32, #tpu.memory_space<smem>>
    %272 = vector.extract_strided_slice %265 {offsets = [0, 1], sizes = [16, 16], strides = [1, 1]} : vector<16x22xf32> to vector<16x16xf32>
    %273 = vector.broadcast %271 : f32 to vector<16x16xf32>
    %274 = arith.mulf %273, %272 : vector<16x16xf32>
    %275 = arith.addf %270, %274 : vector<16x16xf32>
    %c23 = arith.constant 23 : index
    %276 = memref.load %arg1[%c23] : memref<98xf32, #tpu.memory_space<smem>>
    %277 = vector.extract_strided_slice %265 {offsets = [0, 2], sizes = [16, 16], strides = [1, 1]} : vector<16x22xf32> to vector<16x16xf32>
    %278 = vector.broadcast %276 : f32 to vector<16x16xf32>
    %279 = arith.mulf %278, %277 : vector<16x16xf32>
    %280 = arith.addf %275, %279 : vector<16x16xf32>
    %c24 = arith.constant 24 : index
    %281 = memref.load %arg1[%c24] : memref<98xf32, #tpu.memory_space<smem>>
    %282 = vector.extract_strided_slice %265 {offsets = [0, 3], sizes = [16, 16], strides = [1, 1]} : vector<16x22xf32> to vector<16x16xf32>
    %283 = vector.broadcast %281 : f32 to vector<16x16xf32>
    %284 = arith.mulf %283, %282 : vector<16x16xf32>
    %285 = arith.addf %280, %284 : vector<16x16xf32>
    %c25 = arith.constant 25 : index
    %286 = memref.load %arg1[%c25] : memref<98xf32, #tpu.memory_space<smem>>
    %287 = vector.extract_strided_slice %265 {offsets = [0, 4], sizes = [16, 16], strides = [1, 1]} : vector<16x22xf32> to vector<16x16xf32>
    %288 = vector.broadcast %286 : f32 to vector<16x16xf32>
    %289 = arith.mulf %288, %287 : vector<16x16xf32>
    %290 = arith.addf %285, %289 : vector<16x16xf32>
    %c26 = arith.constant 26 : index
    %291 = memref.load %arg1[%c26] : memref<98xf32, #tpu.memory_space<smem>>
    %292 = vector.extract_strided_slice %265 {offsets = [0, 5], sizes = [16, 16], strides = [1, 1]} : vector<16x22xf32> to vector<16x16xf32>
    %293 = vector.broadcast %291 : f32 to vector<16x16xf32>
    %294 = arith.mulf %293, %292 : vector<16x16xf32>
    %295 = arith.addf %290, %294 : vector<16x16xf32>
    %c27 = arith.constant 27 : index
    %296 = memref.load %arg1[%c27] : memref<98xf32, #tpu.memory_space<smem>>
    %297 = vector.extract_strided_slice %265 {offsets = [0, 6], sizes = [16, 16], strides = [1, 1]} : vector<16x22xf32> to vector<16x16xf32>
    %298 = vector.broadcast %296 : f32 to vector<16x16xf32>
    %299 = arith.mulf %298, %297 : vector<16x16xf32>
    %300 = arith.addf %295, %299 : vector<16x16xf32>
    %c0_190 = arith.constant 0 : index
    %c4_191 = arith.constant 4 : index
    %c0_192 = arith.constant 0 : index
    %301 = vector.load %arg7[%c0_190, %c4_191, %c0_192] : memref<2x22x22xf32, #tpu.memory_space<vmem>>, vector<1x16x22xf32>
    %302 = vector.shape_cast %301 : vector<1x16x22xf32> to vector<16x22xf32>
    %c28 = arith.constant 28 : index
    %303 = memref.load %arg1[%c28] : memref<98xf32, #tpu.memory_space<smem>>
    %304 = vector.extract_strided_slice %302 {offsets = [0, 0], sizes = [16, 16], strides = [1, 1]} : vector<16x22xf32> to vector<16x16xf32>
    %305 = vector.broadcast %303 : f32 to vector<16x16xf32>
    %306 = arith.mulf %305, %304 : vector<16x16xf32>
    %307 = arith.addf %300, %306 : vector<16x16xf32>
    %c29 = arith.constant 29 : index
    %308 = memref.load %arg1[%c29] : memref<98xf32, #tpu.memory_space<smem>>
    %309 = vector.extract_strided_slice %302 {offsets = [0, 1], sizes = [16, 16], strides = [1, 1]} : vector<16x22xf32> to vector<16x16xf32>
    %310 = vector.broadcast %308 : f32 to vector<16x16xf32>
    %311 = arith.mulf %310, %309 : vector<16x16xf32>
    %312 = arith.addf %307, %311 : vector<16x16xf32>
    %c30 = arith.constant 30 : index
    %313 = memref.load %arg1[%c30] : memref<98xf32, #tpu.memory_space<smem>>
    %314 = vector.extract_strided_slice %302 {offsets = [0, 2], sizes = [16, 16], strides = [1, 1]} : vector<16x22xf32> to vector<16x16xf32>
    %315 = vector.broadcast %313 : f32 to vector<16x16xf32>
    %316 = arith.mulf %315, %314 : vector<16x16xf32>
    %317 = arith.addf %312, %316 : vector<16x16xf32>
    %c31 = arith.constant 31 : index
    %318 = memref.load %arg1[%c31] : memref<98xf32, #tpu.memory_space<smem>>
    %319 = vector.extract_strided_slice %302 {offsets = [0, 3], sizes = [16, 16], strides = [1, 1]} : vector<16x22xf32> to vector<16x16xf32>
    %320 = vector.broadcast %318 : f32 to vector<16x16xf32>
    %321 = arith.mulf %320, %319 : vector<16x16xf32>
    %322 = arith.addf %317, %321 : vector<16x16xf32>
    %c32_193 = arith.constant 32 : index
    %323 = memref.load %arg1[%c32_193] : memref<98xf32, #tpu.memory_space<smem>>
    %324 = vector.extract_strided_slice %302 {offsets = [0, 4], sizes = [16, 16], strides = [1, 1]} : vector<16x22xf32> to vector<16x16xf32>
    %325 = vector.broadcast %323 : f32 to vector<16x16xf32>
    %326 = arith.mulf %325, %324 : vector<16x16xf32>
    %327 = arith.addf %322, %326 : vector<16x16xf32>
    %c33 = arith.constant 33 : index
    %328 = memref.load %arg1[%c33] : memref<98xf32, #tpu.memory_space<smem>>
    %329 = vector.extract_strided_slice %302 {offsets = [0, 5], sizes = [16, 16], strides = [1, 1]} : vector<16x22xf32> to vector<16x16xf32>
    %330 = vector.broadcast %328 : f32 to vector<16x16xf32>
    %331 = arith.mulf %330, %329 : vector<16x16xf32>
    %332 = arith.addf %327, %331 : vector<16x16xf32>
    %c34 = arith.constant 34 : index
    %333 = memref.load %arg1[%c34] : memref<98xf32, #tpu.memory_space<smem>>
    %334 = vector.extract_strided_slice %302 {offsets = [0, 6], sizes = [16, 16], strides = [1, 1]} : vector<16x22xf32> to vector<16x16xf32>
    %335 = vector.broadcast %333 : f32 to vector<16x16xf32>
    %336 = arith.mulf %335, %334 : vector<16x16xf32>
    %337 = arith.addf %332, %336 : vector<16x16xf32>
    %c0_194 = arith.constant 0 : index
    %c5_195 = arith.constant 5 : index
    %c0_196 = arith.constant 0 : index
    %338 = vector.load %arg7[%c0_194, %c5_195, %c0_196] : memref<2x22x22xf32, #tpu.memory_space<vmem>>, vector<1x16x22xf32>
    %339 = vector.shape_cast %338 : vector<1x16x22xf32> to vector<16x22xf32>
    %c35 = arith.constant 35 : index
    %340 = memref.load %arg1[%c35] : memref<98xf32, #tpu.memory_space<smem>>
    %341 = vector.extract_strided_slice %339 {offsets = [0, 0], sizes = [16, 16], strides = [1, 1]} : vector<16x22xf32> to vector<16x16xf32>
    %342 = vector.broadcast %340 : f32 to vector<16x16xf32>
    %343 = arith.mulf %342, %341 : vector<16x16xf32>
    %344 = arith.addf %337, %343 : vector<16x16xf32>
    %c36 = arith.constant 36 : index
    %345 = memref.load %arg1[%c36] : memref<98xf32, #tpu.memory_space<smem>>
    %346 = vector.extract_strided_slice %339 {offsets = [0, 1], sizes = [16, 16], strides = [1, 1]} : vector<16x22xf32> to vector<16x16xf32>
    %347 = vector.broadcast %345 : f32 to vector<16x16xf32>
    %348 = arith.mulf %347, %346 : vector<16x16xf32>
    %349 = arith.addf %344, %348 : vector<16x16xf32>
    %c37 = arith.constant 37 : index
    %350 = memref.load %arg1[%c37] : memref<98xf32, #tpu.memory_space<smem>>
    %351 = vector.extract_strided_slice %339 {offsets = [0, 2], sizes = [16, 16], strides = [1, 1]} : vector<16x22xf32> to vector<16x16xf32>
    %352 = vector.broadcast %350 : f32 to vector<16x16xf32>
    %353 = arith.mulf %352, %351 : vector<16x16xf32>
    %354 = arith.addf %349, %353 : vector<16x16xf32>
    %c38 = arith.constant 38 : index
    %355 = memref.load %arg1[%c38] : memref<98xf32, #tpu.memory_space<smem>>
    %356 = vector.extract_strided_slice %339 {offsets = [0, 3], sizes = [16, 16], strides = [1, 1]} : vector<16x22xf32> to vector<16x16xf32>
    %357 = vector.broadcast %355 : f32 to vector<16x16xf32>
    %358 = arith.mulf %357, %356 : vector<16x16xf32>
    %359 = arith.addf %354, %358 : vector<16x16xf32>
    %c39 = arith.constant 39 : index
    %360 = memref.load %arg1[%c39] : memref<98xf32, #tpu.memory_space<smem>>
    %361 = vector.extract_strided_slice %339 {offsets = [0, 4], sizes = [16, 16], strides = [1, 1]} : vector<16x22xf32> to vector<16x16xf32>
    %362 = vector.broadcast %360 : f32 to vector<16x16xf32>
    %363 = arith.mulf %362, %361 : vector<16x16xf32>
    %364 = arith.addf %359, %363 : vector<16x16xf32>
    %c40 = arith.constant 40 : index
    %365 = memref.load %arg1[%c40] : memref<98xf32, #tpu.memory_space<smem>>
    %366 = vector.extract_strided_slice %339 {offsets = [0, 5], sizes = [16, 16], strides = [1, 1]} : vector<16x22xf32> to vector<16x16xf32>
    %367 = vector.broadcast %365 : f32 to vector<16x16xf32>
    %368 = arith.mulf %367, %366 : vector<16x16xf32>
    %369 = arith.addf %364, %368 : vector<16x16xf32>
    %c41 = arith.constant 41 : index
    %370 = memref.load %arg1[%c41] : memref<98xf32, #tpu.memory_space<smem>>
    %371 = vector.extract_strided_slice %339 {offsets = [0, 6], sizes = [16, 16], strides = [1, 1]} : vector<16x22xf32> to vector<16x16xf32>
    %372 = vector.broadcast %370 : f32 to vector<16x16xf32>
    %373 = arith.mulf %372, %371 : vector<16x16xf32>
    %374 = arith.addf %369, %373 : vector<16x16xf32>
    %c0_197 = arith.constant 0 : index
    %c6_198 = arith.constant 6 : index
    %c0_199 = arith.constant 0 : index
    %375 = vector.load %arg7[%c0_197, %c6_198, %c0_199] : memref<2x22x22xf32, #tpu.memory_space<vmem>>, vector<1x16x22xf32>
    %376 = vector.shape_cast %375 : vector<1x16x22xf32> to vector<16x22xf32>
    %c42 = arith.constant 42 : index
    %377 = memref.load %arg1[%c42] : memref<98xf32, #tpu.memory_space<smem>>
    %378 = vector.extract_strided_slice %376 {offsets = [0, 0], sizes = [16, 16], strides = [1, 1]} : vector<16x22xf32> to vector<16x16xf32>
    %379 = vector.broadcast %377 : f32 to vector<16x16xf32>
    %380 = arith.mulf %379, %378 : vector<16x16xf32>
    %381 = arith.addf %374, %380 : vector<16x16xf32>
    %c43 = arith.constant 43 : index
    %382 = memref.load %arg1[%c43] : memref<98xf32, #tpu.memory_space<smem>>
    %383 = vector.extract_strided_slice %376 {offsets = [0, 1], sizes = [16, 16], strides = [1, 1]} : vector<16x22xf32> to vector<16x16xf32>
    %384 = vector.broadcast %382 : f32 to vector<16x16xf32>
    %385 = arith.mulf %384, %383 : vector<16x16xf32>
    %386 = arith.addf %381, %385 : vector<16x16xf32>
    %c44 = arith.constant 44 : index
    %387 = memref.load %arg1[%c44] : memref<98xf32, #tpu.memory_space<smem>>
    %388 = vector.extract_strided_slice %376 {offsets = [0, 2], sizes = [16, 16], strides = [1, 1]} : vector<16x22xf32> to vector<16x16xf32>
    %389 = vector.broadcast %387 : f32 to vector<16x16xf32>
    %390 = arith.mulf %389, %388 : vector<16x16xf32>
    %391 = arith.addf %386, %390 : vector<16x16xf32>
    %c45 = arith.constant 45 : index
    %392 = memref.load %arg1[%c45] : memref<98xf32, #tpu.memory_space<smem>>
    %393 = vector.extract_strided_slice %376 {offsets = [0, 3], sizes = [16, 16], strides = [1, 1]} : vector<16x22xf32> to vector<16x16xf32>
    %394 = vector.broadcast %392 : f32 to vector<16x16xf32>
    %395 = arith.mulf %394, %393 : vector<16x16xf32>
    %396 = arith.addf %391, %395 : vector<16x16xf32>
    %c46 = arith.constant 46 : index
    %397 = memref.load %arg1[%c46] : memref<98xf32, #tpu.memory_space<smem>>
    %398 = vector.extract_strided_slice %376 {offsets = [0, 4], sizes = [16, 16], strides = [1, 1]} : vector<16x22xf32> to vector<16x16xf32>
    %399 = vector.broadcast %397 : f32 to vector<16x16xf32>
    %400 = arith.mulf %399, %398 : vector<16x16xf32>
    %401 = arith.addf %396, %400 : vector<16x16xf32>
    %c47 = arith.constant 47 : index
    %402 = memref.load %arg1[%c47] : memref<98xf32, #tpu.memory_space<smem>>
    %403 = vector.extract_strided_slice %376 {offsets = [0, 5], sizes = [16, 16], strides = [1, 1]} : vector<16x22xf32> to vector<16x16xf32>
    %404 = vector.broadcast %402 : f32 to vector<16x16xf32>
    %405 = arith.mulf %404, %403 : vector<16x16xf32>
    %406 = arith.addf %401, %405 : vector<16x16xf32>
    %c48_200 = arith.constant 48 : index
    %407 = memref.load %arg1[%c48_200] : memref<98xf32, #tpu.memory_space<smem>>
    %408 = vector.extract_strided_slice %376 {offsets = [0, 6], sizes = [16, 16], strides = [1, 1]} : vector<16x22xf32> to vector<16x16xf32>
    %409 = vector.broadcast %407 : f32 to vector<16x16xf32>
    %410 = arith.mulf %409, %408 : vector<16x16xf32>
    %411 = arith.addf %406, %410 : vector<16x16xf32>
    %c1_201 = arith.constant 1 : index
    %c0_202 = arith.constant 0 : index
    %c0_203 = arith.constant 0 : index
    %412 = vector.load %arg7[%c1_201, %c0_202, %c0_203] : memref<2x22x22xf32, #tpu.memory_space<vmem>>, vector<1x16x22xf32>
    %413 = vector.shape_cast %412 : vector<1x16x22xf32> to vector<16x22xf32>
    %c49 = arith.constant 49 : index
    %414 = memref.load %arg1[%c49] : memref<98xf32, #tpu.memory_space<smem>>
    %415 = vector.extract_strided_slice %413 {offsets = [0, 0], sizes = [16, 16], strides = [1, 1]} : vector<16x22xf32> to vector<16x16xf32>
    %416 = vector.broadcast %414 : f32 to vector<16x16xf32>
    %417 = arith.mulf %416, %415 : vector<16x16xf32>
    %418 = arith.addf %411, %417 : vector<16x16xf32>
    %c50 = arith.constant 50 : index
    %419 = memref.load %arg1[%c50] : memref<98xf32, #tpu.memory_space<smem>>
    %420 = vector.extract_strided_slice %413 {offsets = [0, 1], sizes = [16, 16], strides = [1, 1]} : vector<16x22xf32> to vector<16x16xf32>
    %421 = vector.broadcast %419 : f32 to vector<16x16xf32>
    %422 = arith.mulf %421, %420 : vector<16x16xf32>
    %423 = arith.addf %418, %422 : vector<16x16xf32>
    %c51 = arith.constant 51 : index
    %424 = memref.load %arg1[%c51] : memref<98xf32, #tpu.memory_space<smem>>
    %425 = vector.extract_strided_slice %413 {offsets = [0, 2], sizes = [16, 16], strides = [1, 1]} : vector<16x22xf32> to vector<16x16xf32>
    %426 = vector.broadcast %424 : f32 to vector<16x16xf32>
    %427 = arith.mulf %426, %425 : vector<16x16xf32>
    %428 = arith.addf %423, %427 : vector<16x16xf32>
    %c52 = arith.constant 52 : index
    %429 = memref.load %arg1[%c52] : memref<98xf32, #tpu.memory_space<smem>>
    %430 = vector.extract_strided_slice %413 {offsets = [0, 3], sizes = [16, 16], strides = [1, 1]} : vector<16x22xf32> to vector<16x16xf32>
    %431 = vector.broadcast %429 : f32 to vector<16x16xf32>
    %432 = arith.mulf %431, %430 : vector<16x16xf32>
    %433 = arith.addf %428, %432 : vector<16x16xf32>
    %c53 = arith.constant 53 : index
    %434 = memref.load %arg1[%c53] : memref<98xf32, #tpu.memory_space<smem>>
    %435 = vector.extract_strided_slice %413 {offsets = [0, 4], sizes = [16, 16], strides = [1, 1]} : vector<16x22xf32> to vector<16x16xf32>
    %436 = vector.broadcast %434 : f32 to vector<16x16xf32>
    %437 = arith.mulf %436, %435 : vector<16x16xf32>
    %438 = arith.addf %433, %437 : vector<16x16xf32>
    %c54 = arith.constant 54 : index
    %439 = memref.load %arg1[%c54] : memref<98xf32, #tpu.memory_space<smem>>
    %440 = vector.extract_strided_slice %413 {offsets = [0, 5], sizes = [16, 16], strides = [1, 1]} : vector<16x22xf32> to vector<16x16xf32>
    %441 = vector.broadcast %439 : f32 to vector<16x16xf32>
    %442 = arith.mulf %441, %440 : vector<16x16xf32>
    %443 = arith.addf %438, %442 : vector<16x16xf32>
    %c55 = arith.constant 55 : index
    %444 = memref.load %arg1[%c55] : memref<98xf32, #tpu.memory_space<smem>>
    %445 = vector.extract_strided_slice %413 {offsets = [0, 6], sizes = [16, 16], strides = [1, 1]} : vector<16x22xf32> to vector<16x16xf32>
    %446 = vector.broadcast %444 : f32 to vector<16x16xf32>
    %447 = arith.mulf %446, %445 : vector<16x16xf32>
    %448 = arith.addf %443, %447 : vector<16x16xf32>
    %c1_204 = arith.constant 1 : index
    %c1_205 = arith.constant 1 : index
    %c0_206 = arith.constant 0 : index
    %449 = vector.load %arg7[%c1_204, %c1_205, %c0_206] : memref<2x22x22xf32, #tpu.memory_space<vmem>>, vector<1x16x22xf32>
    %450 = vector.shape_cast %449 : vector<1x16x22xf32> to vector<16x22xf32>
    %c56 = arith.constant 56 : index
    %451 = memref.load %arg1[%c56] : memref<98xf32, #tpu.memory_space<smem>>
    %452 = vector.extract_strided_slice %450 {offsets = [0, 0], sizes = [16, 16], strides = [1, 1]} : vector<16x22xf32> to vector<16x16xf32>
    %453 = vector.broadcast %451 : f32 to vector<16x16xf32>
    %454 = arith.mulf %453, %452 : vector<16x16xf32>
    %455 = arith.addf %448, %454 : vector<16x16xf32>
    %c57 = arith.constant 57 : index
    %456 = memref.load %arg1[%c57] : memref<98xf32, #tpu.memory_space<smem>>
    %457 = vector.extract_strided_slice %450 {offsets = [0, 1], sizes = [16, 16], strides = [1, 1]} : vector<16x22xf32> to vector<16x16xf32>
    %458 = vector.broadcast %456 : f32 to vector<16x16xf32>
    %459 = arith.mulf %458, %457 : vector<16x16xf32>
    %460 = arith.addf %455, %459 : vector<16x16xf32>
    %c58 = arith.constant 58 : index
    %461 = memref.load %arg1[%c58] : memref<98xf32, #tpu.memory_space<smem>>
    %462 = vector.extract_strided_slice %450 {offsets = [0, 2], sizes = [16, 16], strides = [1, 1]} : vector<16x22xf32> to vector<16x16xf32>
    %463 = vector.broadcast %461 : f32 to vector<16x16xf32>
    %464 = arith.mulf %463, %462 : vector<16x16xf32>
    %465 = arith.addf %460, %464 : vector<16x16xf32>
    %c59 = arith.constant 59 : index
    %466 = memref.load %arg1[%c59] : memref<98xf32, #tpu.memory_space<smem>>
    %467 = vector.extract_strided_slice %450 {offsets = [0, 3], sizes = [16, 16], strides = [1, 1]} : vector<16x22xf32> to vector<16x16xf32>
    %468 = vector.broadcast %466 : f32 to vector<16x16xf32>
    %469 = arith.mulf %468, %467 : vector<16x16xf32>
    %470 = arith.addf %465, %469 : vector<16x16xf32>
    %c60 = arith.constant 60 : index
    %471 = memref.load %arg1[%c60] : memref<98xf32, #tpu.memory_space<smem>>
    %472 = vector.extract_strided_slice %450 {offsets = [0, 4], sizes = [16, 16], strides = [1, 1]} : vector<16x22xf32> to vector<16x16xf32>
    %473 = vector.broadcast %471 : f32 to vector<16x16xf32>
    %474 = arith.mulf %473, %472 : vector<16x16xf32>
    %475 = arith.addf %470, %474 : vector<16x16xf32>
    %c61 = arith.constant 61 : index
    %476 = memref.load %arg1[%c61] : memref<98xf32, #tpu.memory_space<smem>>
    %477 = vector.extract_strided_slice %450 {offsets = [0, 5], sizes = [16, 16], strides = [1, 1]} : vector<16x22xf32> to vector<16x16xf32>
    %478 = vector.broadcast %476 : f32 to vector<16x16xf32>
    %479 = arith.mulf %478, %477 : vector<16x16xf32>
    %480 = arith.addf %475, %479 : vector<16x16xf32>
    %c62 = arith.constant 62 : index
    %481 = memref.load %arg1[%c62] : memref<98xf32, #tpu.memory_space<smem>>
    %482 = vector.extract_strided_slice %450 {offsets = [0, 6], sizes = [16, 16], strides = [1, 1]} : vector<16x22xf32> to vector<16x16xf32>
    %483 = vector.broadcast %481 : f32 to vector<16x16xf32>
    %484 = arith.mulf %483, %482 : vector<16x16xf32>
    %485 = arith.addf %480, %484 : vector<16x16xf32>
    %c1_207 = arith.constant 1 : index
    %c2_208 = arith.constant 2 : index
    %c0_209 = arith.constant 0 : index
    %486 = vector.load %arg7[%c1_207, %c2_208, %c0_209] : memref<2x22x22xf32, #tpu.memory_space<vmem>>, vector<1x16x22xf32>
    %487 = vector.shape_cast %486 : vector<1x16x22xf32> to vector<16x22xf32>
    %c63 = arith.constant 63 : index
    %488 = memref.load %arg1[%c63] : memref<98xf32, #tpu.memory_space<smem>>
    %489 = vector.extract_strided_slice %487 {offsets = [0, 0], sizes = [16, 16], strides = [1, 1]} : vector<16x22xf32> to vector<16x16xf32>
    %490 = vector.broadcast %488 : f32 to vector<16x16xf32>
    %491 = arith.mulf %490, %489 : vector<16x16xf32>
    %492 = arith.addf %485, %491 : vector<16x16xf32>
    %c64_210 = arith.constant 64 : index
    %493 = memref.load %arg1[%c64_210] : memref<98xf32, #tpu.memory_space<smem>>
    %494 = vector.extract_strided_slice %487 {offsets = [0, 1], sizes = [16, 16], strides = [1, 1]} : vector<16x22xf32> to vector<16x16xf32>
    %495 = vector.broadcast %493 : f32 to vector<16x16xf32>
    %496 = arith.mulf %495, %494 : vector<16x16xf32>
    %497 = arith.addf %492, %496 : vector<16x16xf32>
    %c65 = arith.constant 65 : index
    %498 = memref.load %arg1[%c65] : memref<98xf32, #tpu.memory_space<smem>>
    %499 = vector.extract_strided_slice %487 {offsets = [0, 2], sizes = [16, 16], strides = [1, 1]} : vector<16x22xf32> to vector<16x16xf32>
    %500 = vector.broadcast %498 : f32 to vector<16x16xf32>
    %501 = arith.mulf %500, %499 : vector<16x16xf32>
    %502 = arith.addf %497, %501 : vector<16x16xf32>
    %c66 = arith.constant 66 : index
    %503 = memref.load %arg1[%c66] : memref<98xf32, #tpu.memory_space<smem>>
    %504 = vector.extract_strided_slice %487 {offsets = [0, 3], sizes = [16, 16], strides = [1, 1]} : vector<16x22xf32> to vector<16x16xf32>
    %505 = vector.broadcast %503 : f32 to vector<16x16xf32>
    %506 = arith.mulf %505, %504 : vector<16x16xf32>
    %507 = arith.addf %502, %506 : vector<16x16xf32>
    %c67 = arith.constant 67 : index
    %508 = memref.load %arg1[%c67] : memref<98xf32, #tpu.memory_space<smem>>
    %509 = vector.extract_strided_slice %487 {offsets = [0, 4], sizes = [16, 16], strides = [1, 1]} : vector<16x22xf32> to vector<16x16xf32>
    %510 = vector.broadcast %508 : f32 to vector<16x16xf32>
    %511 = arith.mulf %510, %509 : vector<16x16xf32>
    %512 = arith.addf %507, %511 : vector<16x16xf32>
    %c68 = arith.constant 68 : index
    %513 = memref.load %arg1[%c68] : memref<98xf32, #tpu.memory_space<smem>>
    %514 = vector.extract_strided_slice %487 {offsets = [0, 5], sizes = [16, 16], strides = [1, 1]} : vector<16x22xf32> to vector<16x16xf32>
    %515 = vector.broadcast %513 : f32 to vector<16x16xf32>
    %516 = arith.mulf %515, %514 : vector<16x16xf32>
    %517 = arith.addf %512, %516 : vector<16x16xf32>
    %c69 = arith.constant 69 : index
    %518 = memref.load %arg1[%c69] : memref<98xf32, #tpu.memory_space<smem>>
    %519 = vector.extract_strided_slice %487 {offsets = [0, 6], sizes = [16, 16], strides = [1, 1]} : vector<16x22xf32> to vector<16x16xf32>
    %520 = vector.broadcast %518 : f32 to vector<16x16xf32>
    %521 = arith.mulf %520, %519 : vector<16x16xf32>
    %522 = arith.addf %517, %521 : vector<16x16xf32>
    %c1_211 = arith.constant 1 : index
    %c3_212 = arith.constant 3 : index
    %c0_213 = arith.constant 0 : index
    %523 = vector.load %arg7[%c1_211, %c3_212, %c0_213] : memref<2x22x22xf32, #tpu.memory_space<vmem>>, vector<1x16x22xf32>
    %524 = vector.shape_cast %523 : vector<1x16x22xf32> to vector<16x22xf32>
    %c70 = arith.constant 70 : index
    %525 = memref.load %arg1[%c70] : memref<98xf32, #tpu.memory_space<smem>>
    %526 = vector.extract_strided_slice %524 {offsets = [0, 0], sizes = [16, 16], strides = [1, 1]} : vector<16x22xf32> to vector<16x16xf32>
    %527 = vector.broadcast %525 : f32 to vector<16x16xf32>
    %528 = arith.mulf %527, %526 : vector<16x16xf32>
    %529 = arith.addf %522, %528 : vector<16x16xf32>
    %c71 = arith.constant 71 : index
    %530 = memref.load %arg1[%c71] : memref<98xf32, #tpu.memory_space<smem>>
    %531 = vector.extract_strided_slice %524 {offsets = [0, 1], sizes = [16, 16], strides = [1, 1]} : vector<16x22xf32> to vector<16x16xf32>
    %532 = vector.broadcast %530 : f32 to vector<16x16xf32>
    %533 = arith.mulf %532, %531 : vector<16x16xf32>
    %534 = arith.addf %529, %533 : vector<16x16xf32>
    %c72 = arith.constant 72 : index
    %535 = memref.load %arg1[%c72] : memref<98xf32, #tpu.memory_space<smem>>
    %536 = vector.extract_strided_slice %524 {offsets = [0, 2], sizes = [16, 16], strides = [1, 1]} : vector<16x22xf32> to vector<16x16xf32>
    %537 = vector.broadcast %535 : f32 to vector<16x16xf32>
    %538 = arith.mulf %537, %536 : vector<16x16xf32>
    %539 = arith.addf %534, %538 : vector<16x16xf32>
    %c73 = arith.constant 73 : index
    %540 = memref.load %arg1[%c73] : memref<98xf32, #tpu.memory_space<smem>>
    %541 = vector.extract_strided_slice %524 {offsets = [0, 3], sizes = [16, 16], strides = [1, 1]} : vector<16x22xf32> to vector<16x16xf32>
    %542 = vector.broadcast %540 : f32 to vector<16x16xf32>
    %543 = arith.mulf %542, %541 : vector<16x16xf32>
    %544 = arith.addf %539, %543 : vector<16x16xf32>
    %c74 = arith.constant 74 : index
    %545 = memref.load %arg1[%c74] : memref<98xf32, #tpu.memory_space<smem>>
    %546 = vector.extract_strided_slice %524 {offsets = [0, 4], sizes = [16, 16], strides = [1, 1]} : vector<16x22xf32> to vector<16x16xf32>
    %547 = vector.broadcast %545 : f32 to vector<16x16xf32>
    %548 = arith.mulf %547, %546 : vector<16x16xf32>
    %549 = arith.addf %544, %548 : vector<16x16xf32>
    %c75 = arith.constant 75 : index
    %550 = memref.load %arg1[%c75] : memref<98xf32, #tpu.memory_space<smem>>
    %551 = vector.extract_strided_slice %524 {offsets = [0, 5], sizes = [16, 16], strides = [1, 1]} : vector<16x22xf32> to vector<16x16xf32>
    %552 = vector.broadcast %550 : f32 to vector<16x16xf32>
    %553 = arith.mulf %552, %551 : vector<16x16xf32>
    %554 = arith.addf %549, %553 : vector<16x16xf32>
    %c76 = arith.constant 76 : index
    %555 = memref.load %arg1[%c76] : memref<98xf32, #tpu.memory_space<smem>>
    %556 = vector.extract_strided_slice %524 {offsets = [0, 6], sizes = [16, 16], strides = [1, 1]} : vector<16x22xf32> to vector<16x16xf32>
    %557 = vector.broadcast %555 : f32 to vector<16x16xf32>
    %558 = arith.mulf %557, %556 : vector<16x16xf32>
    %559 = arith.addf %554, %558 : vector<16x16xf32>
    %c1_214 = arith.constant 1 : index
    %c4_215 = arith.constant 4 : index
    %c0_216 = arith.constant 0 : index
    %560 = vector.load %arg7[%c1_214, %c4_215, %c0_216] : memref<2x22x22xf32, #tpu.memory_space<vmem>>, vector<1x16x22xf32>
    %561 = vector.shape_cast %560 : vector<1x16x22xf32> to vector<16x22xf32>
    %c77 = arith.constant 77 : index
    %562 = memref.load %arg1[%c77] : memref<98xf32, #tpu.memory_space<smem>>
    %563 = vector.extract_strided_slice %561 {offsets = [0, 0], sizes = [16, 16], strides = [1, 1]} : vector<16x22xf32> to vector<16x16xf32>
    %564 = vector.broadcast %562 : f32 to vector<16x16xf32>
    %565 = arith.mulf %564, %563 : vector<16x16xf32>
    %566 = arith.addf %559, %565 : vector<16x16xf32>
    %c78 = arith.constant 78 : index
    %567 = memref.load %arg1[%c78] : memref<98xf32, #tpu.memory_space<smem>>
    %568 = vector.extract_strided_slice %561 {offsets = [0, 1], sizes = [16, 16], strides = [1, 1]} : vector<16x22xf32> to vector<16x16xf32>
    %569 = vector.broadcast %567 : f32 to vector<16x16xf32>
    %570 = arith.mulf %569, %568 : vector<16x16xf32>
    %571 = arith.addf %566, %570 : vector<16x16xf32>
    %c79 = arith.constant 79 : index
    %572 = memref.load %arg1[%c79] : memref<98xf32, #tpu.memory_space<smem>>
    %573 = vector.extract_strided_slice %561 {offsets = [0, 2], sizes = [16, 16], strides = [1, 1]} : vector<16x22xf32> to vector<16x16xf32>
    %574 = vector.broadcast %572 : f32 to vector<16x16xf32>
    %575 = arith.mulf %574, %573 : vector<16x16xf32>
    %576 = arith.addf %571, %575 : vector<16x16xf32>
    %c80_217 = arith.constant 80 : index
    %577 = memref.load %arg1[%c80_217] : memref<98xf32, #tpu.memory_space<smem>>
    %578 = vector.extract_strided_slice %561 {offsets = [0, 3], sizes = [16, 16], strides = [1, 1]} : vector<16x22xf32> to vector<16x16xf32>
    %579 = vector.broadcast %577 : f32 to vector<16x16xf32>
    %580 = arith.mulf %579, %578 : vector<16x16xf32>
    %581 = arith.addf %576, %580 : vector<16x16xf32>
    %c81 = arith.constant 81 : index
    %582 = memref.load %arg1[%c81] : memref<98xf32, #tpu.memory_space<smem>>
    %583 = vector.extract_strided_slice %561 {offsets = [0, 4], sizes = [16, 16], strides = [1, 1]} : vector<16x22xf32> to vector<16x16xf32>
    %584 = vector.broadcast %582 : f32 to vector<16x16xf32>
    %585 = arith.mulf %584, %583 : vector<16x16xf32>
    %586 = arith.addf %581, %585 : vector<16x16xf32>
    %c82 = arith.constant 82 : index
    %587 = memref.load %arg1[%c82] : memref<98xf32, #tpu.memory_space<smem>>
    %588 = vector.extract_strided_slice %561 {offsets = [0, 5], sizes = [16, 16], strides = [1, 1]} : vector<16x22xf32> to vector<16x16xf32>
    %589 = vector.broadcast %587 : f32 to vector<16x16xf32>
    %590 = arith.mulf %589, %588 : vector<16x16xf32>
    %591 = arith.addf %586, %590 : vector<16x16xf32>
    %c83 = arith.constant 83 : index
    %592 = memref.load %arg1[%c83] : memref<98xf32, #tpu.memory_space<smem>>
    %593 = vector.extract_strided_slice %561 {offsets = [0, 6], sizes = [16, 16], strides = [1, 1]} : vector<16x22xf32> to vector<16x16xf32>
    %594 = vector.broadcast %592 : f32 to vector<16x16xf32>
    %595 = arith.mulf %594, %593 : vector<16x16xf32>
    %596 = arith.addf %591, %595 : vector<16x16xf32>
    %c1_218 = arith.constant 1 : index
    %c5_219 = arith.constant 5 : index
    %c0_220 = arith.constant 0 : index
    %597 = vector.load %arg7[%c1_218, %c5_219, %c0_220] : memref<2x22x22xf32, #tpu.memory_space<vmem>>, vector<1x16x22xf32>
    %598 = vector.shape_cast %597 : vector<1x16x22xf32> to vector<16x22xf32>
    %c84 = arith.constant 84 : index
    %599 = memref.load %arg1[%c84] : memref<98xf32, #tpu.memory_space<smem>>
    %600 = vector.extract_strided_slice %598 {offsets = [0, 0], sizes = [16, 16], strides = [1, 1]} : vector<16x22xf32> to vector<16x16xf32>
    %601 = vector.broadcast %599 : f32 to vector<16x16xf32>
    %602 = arith.mulf %601, %600 : vector<16x16xf32>
    %603 = arith.addf %596, %602 : vector<16x16xf32>
    %c85 = arith.constant 85 : index
    %604 = memref.load %arg1[%c85] : memref<98xf32, #tpu.memory_space<smem>>
    %605 = vector.extract_strided_slice %598 {offsets = [0, 1], sizes = [16, 16], strides = [1, 1]} : vector<16x22xf32> to vector<16x16xf32>
    %606 = vector.broadcast %604 : f32 to vector<16x16xf32>
    %607 = arith.mulf %606, %605 : vector<16x16xf32>
    %608 = arith.addf %603, %607 : vector<16x16xf32>
    %c86 = arith.constant 86 : index
    %609 = memref.load %arg1[%c86] : memref<98xf32, #tpu.memory_space<smem>>
    %610 = vector.extract_strided_slice %598 {offsets = [0, 2], sizes = [16, 16], strides = [1, 1]} : vector<16x22xf32> to vector<16x16xf32>
    %611 = vector.broadcast %609 : f32 to vector<16x16xf32>
    %612 = arith.mulf %611, %610 : vector<16x16xf32>
    %613 = arith.addf %608, %612 : vector<16x16xf32>
    %c87 = arith.constant 87 : index
    %614 = memref.load %arg1[%c87] : memref<98xf32, #tpu.memory_space<smem>>
    %615 = vector.extract_strided_slice %598 {offsets = [0, 3], sizes = [16, 16], strides = [1, 1]} : vector<16x22xf32> to vector<16x16xf32>
    %616 = vector.broadcast %614 : f32 to vector<16x16xf32>
    %617 = arith.mulf %616, %615 : vector<16x16xf32>
    %618 = arith.addf %613, %617 : vector<16x16xf32>
    %c88 = arith.constant 88 : index
    %619 = memref.load %arg1[%c88] : memref<98xf32, #tpu.memory_space<smem>>
    %620 = vector.extract_strided_slice %598 {offsets = [0, 4], sizes = [16, 16], strides = [1, 1]} : vector<16x22xf32> to vector<16x16xf32>
    %621 = vector.broadcast %619 : f32 to vector<16x16xf32>
    %622 = arith.mulf %621, %620 : vector<16x16xf32>
    %623 = arith.addf %618, %622 : vector<16x16xf32>
    %c89 = arith.constant 89 : index
    %624 = memref.load %arg1[%c89] : memref<98xf32, #tpu.memory_space<smem>>
    %625 = vector.extract_strided_slice %598 {offsets = [0, 5], sizes = [16, 16], strides = [1, 1]} : vector<16x22xf32> to vector<16x16xf32>
    %626 = vector.broadcast %624 : f32 to vector<16x16xf32>
    %627 = arith.mulf %626, %625 : vector<16x16xf32>
    %628 = arith.addf %623, %627 : vector<16x16xf32>
    %c90 = arith.constant 90 : index
    %629 = memref.load %arg1[%c90] : memref<98xf32, #tpu.memory_space<smem>>
    %630 = vector.extract_strided_slice %598 {offsets = [0, 6], sizes = [16, 16], strides = [1, 1]} : vector<16x22xf32> to vector<16x16xf32>
    %631 = vector.broadcast %629 : f32 to vector<16x16xf32>
    %632 = arith.mulf %631, %630 : vector<16x16xf32>
    %633 = arith.addf %628, %632 : vector<16x16xf32>
    %c1_221 = arith.constant 1 : index
    %c6_222 = arith.constant 6 : index
    %c0_223 = arith.constant 0 : index
    %634 = vector.load %arg7[%c1_221, %c6_222, %c0_223] : memref<2x22x22xf32, #tpu.memory_space<vmem>>, vector<1x16x22xf32>
    %635 = vector.shape_cast %634 : vector<1x16x22xf32> to vector<16x22xf32>
    %c91 = arith.constant 91 : index
    %636 = memref.load %arg1[%c91] : memref<98xf32, #tpu.memory_space<smem>>
    %637 = vector.extract_strided_slice %635 {offsets = [0, 0], sizes = [16, 16], strides = [1, 1]} : vector<16x22xf32> to vector<16x16xf32>
    %638 = vector.broadcast %636 : f32 to vector<16x16xf32>
    %639 = arith.mulf %638, %637 : vector<16x16xf32>
    %640 = arith.addf %633, %639 : vector<16x16xf32>
    %c92 = arith.constant 92 : index
    %641 = memref.load %arg1[%c92] : memref<98xf32, #tpu.memory_space<smem>>
    %642 = vector.extract_strided_slice %635 {offsets = [0, 1], sizes = [16, 16], strides = [1, 1]} : vector<16x22xf32> to vector<16x16xf32>
    %643 = vector.broadcast %641 : f32 to vector<16x16xf32>
    %644 = arith.mulf %643, %642 : vector<16x16xf32>
    %645 = arith.addf %640, %644 : vector<16x16xf32>
    %c93 = arith.constant 93 : index
    %646 = memref.load %arg1[%c93] : memref<98xf32, #tpu.memory_space<smem>>
    %647 = vector.extract_strided_slice %635 {offsets = [0, 2], sizes = [16, 16], strides = [1, 1]} : vector<16x22xf32> to vector<16x16xf32>
    %648 = vector.broadcast %646 : f32 to vector<16x16xf32>
    %649 = arith.mulf %648, %647 : vector<16x16xf32>
    %650 = arith.addf %645, %649 : vector<16x16xf32>
    %c94 = arith.constant 94 : index
    %651 = memref.load %arg1[%c94] : memref<98xf32, #tpu.memory_space<smem>>
    %652 = vector.extract_strided_slice %635 {offsets = [0, 3], sizes = [16, 16], strides = [1, 1]} : vector<16x22xf32> to vector<16x16xf32>
    %653 = vector.broadcast %651 : f32 to vector<16x16xf32>
    %654 = arith.mulf %653, %652 : vector<16x16xf32>
    %655 = arith.addf %650, %654 : vector<16x16xf32>
    %c95 = arith.constant 95 : index
    %656 = memref.load %arg1[%c95] : memref<98xf32, #tpu.memory_space<smem>>
    %657 = vector.extract_strided_slice %635 {offsets = [0, 4], sizes = [16, 16], strides = [1, 1]} : vector<16x22xf32> to vector<16x16xf32>
    %658 = vector.broadcast %656 : f32 to vector<16x16xf32>
    %659 = arith.mulf %658, %657 : vector<16x16xf32>
    %660 = arith.addf %655, %659 : vector<16x16xf32>
    %c96_224 = arith.constant 96 : index
    %661 = memref.load %arg1[%c96_224] : memref<98xf32, #tpu.memory_space<smem>>
    %662 = vector.extract_strided_slice %635 {offsets = [0, 5], sizes = [16, 16], strides = [1, 1]} : vector<16x22xf32> to vector<16x16xf32>
    %663 = vector.broadcast %661 : f32 to vector<16x16xf32>
    %664 = arith.mulf %663, %662 : vector<16x16xf32>
    %665 = arith.addf %660, %664 : vector<16x16xf32>
    %c97 = arith.constant 97 : index
    %666 = memref.load %arg1[%c97] : memref<98xf32, #tpu.memory_space<smem>>
    %667 = vector.extract_strided_slice %635 {offsets = [0, 6], sizes = [16, 16], strides = [1, 1]} : vector<16x22xf32> to vector<16x16xf32>
    %668 = vector.broadcast %666 : f32 to vector<16x16xf32>
    %669 = arith.mulf %668, %667 : vector<16x16xf32>
    %670 = arith.addf %665, %669 : vector<16x16xf32>
    %c0_225 = arith.constant 0 : index
    %671 = memref.load %arg2[%c0_225] : memref<1xf32, #tpu.memory_space<smem>>
    %672 = vector.broadcast %671 : f32 to vector<16x16xf32>
    %673 = arith.addf %670, %672 : vector<16x16xf32>
    %cst_226 = arith.constant -3.000000e+01 : f32
    %cst_227 = arith.constant 3.000000e+01 : f32
    %674 = vector.broadcast %cst_226 : f32 to vector<16x16xf32>
    %675 = arith.maximumf %674, %673 : vector<16x16xf32>
    %676 = vector.broadcast %cst_227 : f32 to vector<16x16xf32>
    %677 = arith.minimumf %676, %675 : vector<16x16xf32>
    %cst_228 = arith.constant 0.000000e+00 : f32
    %678 = vector.broadcast %cst_228 : f32 to vector<16x16xf32>
    %679 = arith.subf %678, %677 : vector<16x16xf32>
    %680 = math.exp %679 : vector<16x16xf32>
    %cst_229 = arith.constant 1.000000e+00 : f32
    %681 = vector.broadcast %cst_229 : f32 to vector<16x16xf32>
    %682 = arith.addf %681, %680 : vector<16x16xf32>
    %683 = tpu.reciprocal %682 : vector<16x16xf32> -> vector<16x16xf32>
    %684 = vector.extract_strided_slice %683 {offsets = [0, 0], sizes = [1, 16], strides = [1, 1]} : vector<16x16xf32> to vector<1x16xf32>
    %c0_230 = arith.constant 0 : index
    %c0_231 = arith.constant 0 : index
    %685 = vector.load %arg5[%c0_230, %c0_231] : memref<8x256xf32, #tpu.memory_space<vmem>>, vector<1x16xf32>
    tpu.vector_store %arg5[%c0_230, %c0_231], %684 {strides = array<i32>} : memref<8x256xf32, #tpu.memory_space<vmem>>, vector<1x16xf32>,
    %686 = vector.extract_strided_slice %683 {offsets = [1, 0], sizes = [1, 16], strides = [1, 1]} : vector<16x16xf32> to vector<1x16xf32>
    %c0_232 = arith.constant 0 : index
    %c16_233 = arith.constant 16 : index
    %687 = vector.load %arg5[%c0_232, %c16_233] : memref<8x256xf32, #tpu.memory_space<vmem>>, vector<1x16xf32>
    tpu.vector_store %arg5[%c0_232, %c16_233], %686 {strides = array<i32>} : memref<8x256xf32, #tpu.memory_space<vmem>>, vector<1x16xf32>,
    %688 = vector.extract_strided_slice %683 {offsets = [2, 0], sizes = [1, 16], strides = [1, 1]} : vector<16x16xf32> to vector<1x16xf32>
    %c0_234 = arith.constant 0 : index
    %c32_235 = arith.constant 32 : index
    %689 = vector.load %arg5[%c0_234, %c32_235] : memref<8x256xf32, #tpu.memory_space<vmem>>, vector<1x16xf32>
    tpu.vector_store %arg5[%c0_234, %c32_235], %688 {strides = array<i32>} : memref<8x256xf32, #tpu.memory_space<vmem>>, vector<1x16xf32>,
    %690 = vector.extract_strided_slice %683 {offsets = [3, 0], sizes = [1, 16], strides = [1, 1]} : vector<16x16xf32> to vector<1x16xf32>
    %c0_236 = arith.constant 0 : index
    %c48_237 = arith.constant 48 : index
    %691 = vector.load %arg5[%c0_236, %c48_237] : memref<8x256xf32, #tpu.memory_space<vmem>>, vector<1x16xf32>
    tpu.vector_store %arg5[%c0_236, %c48_237], %690 {strides = array<i32>} : memref<8x256xf32, #tpu.memory_space<vmem>>, vector<1x16xf32>,
    %692 = vector.extract_strided_slice %683 {offsets = [4, 0], sizes = [1, 16], strides = [1, 1]} : vector<16x16xf32> to vector<1x16xf32>
    %c0_238 = arith.constant 0 : index
    %c64_239 = arith.constant 64 : index
    %693 = vector.load %arg5[%c0_238, %c64_239] : memref<8x256xf32, #tpu.memory_space<vmem>>, vector<1x16xf32>
    tpu.vector_store %arg5[%c0_238, %c64_239], %692 {strides = array<i32>} : memref<8x256xf32, #tpu.memory_space<vmem>>, vector<1x16xf32>,
    %694 = vector.extract_strided_slice %683 {offsets = [5, 0], sizes = [1, 16], strides = [1, 1]} : vector<16x16xf32> to vector<1x16xf32>
    %c0_240 = arith.constant 0 : index
    %c80_241 = arith.constant 80 : index
    %695 = vector.load %arg5[%c0_240, %c80_241] : memref<8x256xf32, #tpu.memory_space<vmem>>, vector<1x16xf32>
    tpu.vector_store %arg5[%c0_240, %c80_241], %694 {strides = array<i32>} : memref<8x256xf32, #tpu.memory_space<vmem>>, vector<1x16xf32>,
    %696 = vector.extract_strided_slice %683 {offsets = [6, 0], sizes = [1, 16], strides = [1, 1]} : vector<16x16xf32> to vector<1x16xf32>
    %c0_242 = arith.constant 0 : index
    %c96_243 = arith.constant 96 : index
    %697 = vector.load %arg5[%c0_242, %c96_243] : memref<8x256xf32, #tpu.memory_space<vmem>>, vector<1x16xf32>
    tpu.vector_store %arg5[%c0_242, %c96_243], %696 {strides = array<i32>} : memref<8x256xf32, #tpu.memory_space<vmem>>, vector<1x16xf32>,
    %698 = vector.extract_strided_slice %683 {offsets = [7, 0], sizes = [1, 16], strides = [1, 1]} : vector<16x16xf32> to vector<1x16xf32>
    %c0_244 = arith.constant 0 : index
    %c112_245 = arith.constant 112 : index
    %699 = vector.load %arg5[%c0_244, %c112_245] : memref<8x256xf32, #tpu.memory_space<vmem>>, vector<1x16xf32>
    tpu.vector_store %arg5[%c0_244, %c112_245], %698 {strides = array<i32>} : memref<8x256xf32, #tpu.memory_space<vmem>>, vector<1x16xf32>,
    %700 = vector.extract_strided_slice %683 {offsets = [8, 0], sizes = [1, 16], strides = [1, 1]} : vector<16x16xf32> to vector<1x16xf32>
    %c0_246 = arith.constant 0 : index
    %c128_247 = arith.constant 128 : index
    %701 = vector.load %arg5[%c0_246, %c128_247] : memref<8x256xf32, #tpu.memory_space<vmem>>, vector<1x16xf32>
    tpu.vector_store %arg5[%c0_246, %c128_247], %700 {strides = array<i32>} : memref<8x256xf32, #tpu.memory_space<vmem>>, vector<1x16xf32>,
    %702 = vector.extract_strided_slice %683 {offsets = [9, 0], sizes = [1, 16], strides = [1, 1]} : vector<16x16xf32> to vector<1x16xf32>
    %c0_248 = arith.constant 0 : index
    %c144_249 = arith.constant 144 : index
    %703 = vector.load %arg5[%c0_248, %c144_249] : memref<8x256xf32, #tpu.memory_space<vmem>>, vector<1x16xf32>
    tpu.vector_store %arg5[%c0_248, %c144_249], %702 {strides = array<i32>} : memref<8x256xf32, #tpu.memory_space<vmem>>, vector<1x16xf32>,
    %704 = vector.extract_strided_slice %683 {offsets = [10, 0], sizes = [1, 16], strides = [1, 1]} : vector<16x16xf32> to vector<1x16xf32>
    %c0_250 = arith.constant 0 : index
    %c160_251 = arith.constant 160 : index
    %705 = vector.load %arg5[%c0_250, %c160_251] : memref<8x256xf32, #tpu.memory_space<vmem>>, vector<1x16xf32>
    tpu.vector_store %arg5[%c0_250, %c160_251], %704 {strides = array<i32>} : memref<8x256xf32, #tpu.memory_space<vmem>>, vector<1x16xf32>,
    %706 = vector.extract_strided_slice %683 {offsets = [11, 0], sizes = [1, 16], strides = [1, 1]} : vector<16x16xf32> to vector<1x16xf32>
    %c0_252 = arith.constant 0 : index
    %c176_253 = arith.constant 176 : index
    %707 = vector.load %arg5[%c0_252, %c176_253] : memref<8x256xf32, #tpu.memory_space<vmem>>, vector<1x16xf32>
    tpu.vector_store %arg5[%c0_252, %c176_253], %706 {strides = array<i32>} : memref<8x256xf32, #tpu.memory_space<vmem>>, vector<1x16xf32>,
    %708 = vector.extract_strided_slice %683 {offsets = [12, 0], sizes = [1, 16], strides = [1, 1]} : vector<16x16xf32> to vector<1x16xf32>
    %c0_254 = arith.constant 0 : index
    %c192_255 = arith.constant 192 : index
    %709 = vector.load %arg5[%c0_254, %c192_255] : memref<8x256xf32, #tpu.memory_space<vmem>>, vector<1x16xf32>
    tpu.vector_store %arg5[%c0_254, %c192_255], %708 {strides = array<i32>} : memref<8x256xf32, #tpu.memory_space<vmem>>, vector<1x16xf32>,
    %710 = vector.extract_strided_slice %683 {offsets = [13, 0], sizes = [1, 16], strides = [1, 1]} : vector<16x16xf32> to vector<1x16xf32>
    %c0_256 = arith.constant 0 : index
    %c208_257 = arith.constant 208 : index
    %711 = vector.load %arg5[%c0_256, %c208_257] : memref<8x256xf32, #tpu.memory_space<vmem>>, vector<1x16xf32>
    tpu.vector_store %arg5[%c0_256, %c208_257], %710 {strides = array<i32>} : memref<8x256xf32, #tpu.memory_space<vmem>>, vector<1x16xf32>,
    %712 = vector.extract_strided_slice %683 {offsets = [14, 0], sizes = [1, 16], strides = [1, 1]} : vector<16x16xf32> to vector<1x16xf32>
    %c0_258 = arith.constant 0 : index
    %c224_259 = arith.constant 224 : index
    %713 = vector.load %arg5[%c0_258, %c224_259] : memref<8x256xf32, #tpu.memory_space<vmem>>, vector<1x16xf32>
    tpu.vector_store %arg5[%c0_258, %c224_259], %712 {strides = array<i32>} : memref<8x256xf32, #tpu.memory_space<vmem>>, vector<1x16xf32>,
    %714 = vector.extract_strided_slice %683 {offsets = [15, 0], sizes = [1, 16], strides = [1, 1]} : vector<16x16xf32> to vector<1x16xf32>
    %c0_260 = arith.constant 0 : index
    %c240_261 = arith.constant 240 : index
    %715 = vector.load %arg5[%c0_260, %c240_261] : memref<8x256xf32, #tpu.memory_space<vmem>>, vector<1x16xf32>
    tpu.vector_store %arg5[%c0_260, %c240_261], %714 {strides = array<i32>} : memref<8x256xf32, #tpu.memory_space<vmem>>, vector<1x16xf32>,
    %c0_262 = arith.constant 0 : index
    %c0_263 = arith.constant 0 : index
    %716 = vector.load %arg5[%c0_262, %c0_263] : memref<8x256xf32, #tpu.memory_space<vmem>>, vector<1x256xf32>
    %717 = vector.shape_cast %716 : vector<1x256xf32> to vector<1x256xf32>
    %718 = vector.broadcast %717 : vector<1x256xf32> to vector<8x256xf32>
    %c0_264 = arith.constant 0 : index
    %c0_265 = arith.constant 0 : index
    %c0_266 = arith.constant 0 : index
    %719 = vector.load %arg3[%c0_264, %c0_265, %c0_266] : memref<1x4x256xf32, #tpu.memory_space<vmem>>, vector<1x4x256xf32>
    %720 = vector.shape_cast %719 : vector<1x4x256xf32> to vector<4x256xf32>
    %721 = vector.extract_strided_slice %718 {offsets = [0, 0], sizes = [4, 256], strides = [1, 1]} : vector<8x256xf32> to vector<4x256xf32>
    %722 = arith.mulf %720, %721 : vector<4x256xf32>
    %c0_267 = arith.constant 0 : index
    %c0_268 = arith.constant 0 : index
    %c0_269 = arith.constant 0 : index
    %723 = vector.load %arg4[%c0_267, %c0_268, %c0_269] : memref<1x4x256xf32, #tpu.memory_space<vmem>>, vector<1x4x256xf32>
    %724 = vector.shape_cast %723 : vector<1x4x256xf32> to vector<4x256xf32>
    %725 = vector.shape_cast %722 : vector<4x256xf32> to vector<1x4x256xf32>
    tpu.vector_store %arg4[%c0_267, %c0_268, %c0_269], %725 {strides = array<i32>} : memref<1x4x256xf32, #tpu.memory_space<vmem>>, vector<1x4x256xf32>,
    return
  }
  func.func @transform_0(%arg0: i32) -> i32 {
    %c0_i32 = arith.constant 0 : i32
    %c0_i32_0 = arith.constant 0 : i32
    return %c0_i32 : i32
  }
  func.func @transform_1(%arg0: i32) -> i32 {
    %c0_i32 = arith.constant 0 : i32
    %c0_i32_0 = arith.constant 0 : i32
    return %c0_i32 : i32
  }
  func.func @transform_2(%arg0: i32) -> (i32, i32, i32) {
    %c0_i32 = arith.constant 0 : i32
    %c0_i32_0 = arith.constant 0 : i32
    %c0_i32_1 = arith.constant 0 : i32
    return %arg0, %c0_i32, %c0_i32_0 : i32, i32, i32
  }
  func.func @transform_3(%arg0: i32) -> (i32, i32, i32) {
    %c0_i32 = arith.constant 0 : i32
    %c0_i32_0 = arith.constant 0 : i32
    %c0_i32_1 = arith.constant 0 : i32
    return %arg0, %c0_i32, %c0_i32_0 : i32, i32, i32
  }
}

</mosaic_0001>

<bundles_post_ra>
// kernel: tpu_custom_call.1
= control target key start
LH: loop header
LB: loop body
LE: loop exit
PB: predicated region body
PF: predicated region fallthrough
CT: control target
= control target key end

     0   :  { %s3339_s0 = inlined_call_operand.vmem [shape: f32[98], index: 0, kind: input, shape index: {}]   ;;  %s3340_s1 = inlined_call_operand.<no memory space> [shape: f32[1], index: 1, kind: input, shape index: {}]   ;;  %s3341_s2 = inlined_call_operand.hbm [shape: f32[2,4,256], index: 2, kind: input, shape index: {}]   ;;  %s3342_s3 = inlined_call_operand.hbm [shape: f32[2,4,256], index: 3, kind: output, shape index: {}]  }
   0x1   :  { %8 = sst [smem:[#allocation5]] %s3340_s1 }
   0x2   :  { %9 = vsyncpa [#allocation9], 0 }
   0x3   :  { %10 = vsyncpa [#allocation7], 0 }
   0x4   :  { %12 = vsyncpa [#allocation7 + $0x1], 0 }
   0x5   :  { %13 = vsyncpa [#allocation8], 0 }
   0x6   :  { %15 = vsyncpa [#allocation8 + $0x1], 0  ;;  %s2368_s14 = smov 0   ;;  %s2370_s15 = smov 0  }
   0x7   :  { %s2372_s16 = smov 0   ;;  %s2374_s17 = smov 0  }
   0x8 LB: > { %s2389_s1 = sadd.s32 4294967295, %s2316_s17   ;;  %s1998_s18 = sadd.s32 4294967294, %s2316_s17   ;;  %s2316_s17 = sphi %s2374_s17, %s3365_s17   ;;  %s2312_s16 = sphi %s2372_s16, %s3364_s16   ;;  %s2308_s15 = sphi %s2370_s15, %s3363_s15   ;;  %s2304_s14 = sphi %s2368_s14, %s3362_s14  }
   0x9   : > { %p83_p0 = scmp.ne.s32.totalorder %s2308_s15, %s2304_s14  ;;  %p3343_p1 = scmp.eq.s32.totalorder %s2389_s1, 0 }
   0xa   : > { %p113_p3 = scmp.eq.s32.totalorder %s1998_s18, 1  ;;  %p1999_p5 = scmp.ge.s32.totalorder %s2316_s17, 1 }
   0xb   : > { %p2398_p4 = por %p3343_p1, %p83_p0  ;;  %p120_p7 = scmp.lt.s32.totalorder %s2316_s17, 3 }
   0xc   : > { %p2403_p6 = por %p113_p3, %p83_p0  ;;  %s133_s23 = sshll.u32 %s3339_s0, 4  ;;  %s134_s23 = int_to_ptr.vmem [resolvable:$true] %s133_s23 }
   0xd   : > { %s3347_s19 = scalar_select %p2398_p4, 1, 0 }
   0xe   : > { %s3348_s20 = scalar_select %p2403_p6, 1, 0 }
   0xf   : > { %p2411_p8 = pnand %p1999_p5, %p120_p7  ;;  %s2419_s25 = sadd.s32 1, %s2316_s17  }
  0x10   : > { %s67_s27 = ssub.s32 %s2316_s17, %s2419_s25  ;;  %s70_s29 = sadd.s32 1, %s2312_s16 }
  0x11   : > { %s3349_s24 = scalar_select %p2411_p8, 1, 0 }
  0x12   : > { %p2123_p10 = pneg %p2411_p8  ;;  %p2429_p12 = scmp.eq.s32.totalorder %s67_s27, 0 }
  0x13   : > { %p77_p13 = scmp.ne.s32.totalorder %s2312_s16, %s2308_s15  ;;  %s2205_s30 = scalar_lea.vmem %s134_s23, 16 }
  0x14   : > { %p2423_p11 = pnand %p2123_p10, %p3343_p1  ;;  %p2206_p0 = scmp.ne.s32.totalorder %s134_s23, %s2205_s30 }
  0x15   : > { %p2213_p9 = scmp.lt.s32.totalorder %s134_s23, %s134_s23  ;;  %p2214_p2 = scmp.lt.s32.totalorder %s2205_s30, %s2205_s30 }
  0x16   : > { %p2207_p3 = pneg %p2423_p11 }
  0x17   : > { %p2215_p10 = por %p2214_p2, %p2213_p9 }
  0x18   : > { %p2208_p5 = pnand %p2207_p3, %p2206_p0 }
  0x1a   : > { %p2209_p7 = pneg %p2208_p5 }
  0x1c   : > { %p2216_p1 = pnand %p2215_p10, %p2209_p7 }
  0x1e   : > { %2219 = shalt.err (!%p2216_p1)
}
  0x1f   : > { %s2318_s4 = smov [#allocation6]   ;;  %p78_p2 = scmp.eq.s32.totalorder %s2316_s17, 0 }
  0x20   : > { %2126 = dma.vmem_to_smem (!%p2423_p11), %s134_s23, 16, %s2318_s4, [#allocation9]  }
  0x21   : > { %s2443_s5 = scalar_select %p2429_p12, %s2312_s16, %s70_s29  }
  0x22   : > { %p3352_p1 = scmp.eq.s32.totalorder %s2389_s1, 1  ;;  %p2136_p0 = scmp.lt.s32.totalorder %s2316_s17, 2 }
  0x23   : > { %s147_s7 = sand.u32 1, %s2312_s16   ;;  %p79_p3 = por %p78_p2, %p77_p13 }
  0x24   : > { %p2451_p9 = por %p3352_p1, %p77_p13  ;;  %s2002_s8 = sshll.u32 %s147_s7, 3 }
  0x25   : > { %s2113_s9 = sshll.u32 %s2316_s17, 7  ;;  %s151_s13 = scalar_lea.vmem [#allocation10], %s2002_s8 }
  0x26   : > { %s3353_s6 = scalar_select %p2451_p9, 1, 0 }
  0x27   : > { %s2464_s12 = scalar_lea.hbm %s3341_s2, %s2113_s9  ;;  %s159_s18 = sshll.u32 %s151_s13, 4  ;;  %s160_s18 = int_to_ptr.vmem [resolvable:$true] %s159_s18 }
  0x28   : > { %p2466_p11 = pnand %p2136_p0, %p79_p3  ;;  %s148_s22 = scalar_lea.sflag [#allocation7], %s147_s7 }
  0x29   : > { %s2220_s23 = scalar_lea.hbm %s2464_s12, 128  ;;  %s2225_s28 = scalar_lea.hbm %s3341_s2, 256 }
  0x2a   : > { %p2221_p12 = scmp.ne.s32.totalorder %s2464_s12, %s2220_s23  ;;  %p2222_p13 = pneg %p2466_p11 }
  0x2b   : > { %p2226_p10 = scmp.lt.s32.totalorder %s2464_s12, %s3341_s2  ;;  %p2227_p2 = scmp.lt.s32.totalorder %s2225_s28, %s2220_s23 }
  0x2c   : > { %p2223_p5 = pnand %p2222_p13, %p2221_p12 }
  0x2d   : > { %p2228_p1 = por %p2227_p2, %p2226_p10 }
  0x2e   : > { %p2224_p7 = pneg %p2223_p5 }
  0x30   : > { %p2229_p0 = pnand %p2228_p1, %p2224_p7 }
  0x32   : > { %2232 = shalt.err (!%p2229_p0)
}
  0x33   : > { %s2233_s4 = scalar_lea.vmem %s160_s18, 128  ;;  %s2319_s7 = smov [#allocation10]  }
  0x34   : > { %p2234_p3 = scmp.ne.s32.totalorder %s160_s18, %s2233_s4  ;;  %s2238_s8 = sshll.u32 %s2319_s7, 4  ;;  %s2239_s8 = int_to_ptr.vmem [resolvable:$false] %s2238_s8 }
  0x35   : > { %s2240_s9 = scalar_lea.vmem %s2239_s8, 256  ;;  %p2241_p12 = scmp.lt.s32.totalorder %s160_s18, %s2239_s8 }
  0x36   : > { %p2236_p6 = pnand %p2234_p3, %p2222_p13  ;;  %p2242_p5 = scmp.lt.s32.totalorder %s2240_s9, %s2233_s4 }
  0x38   : > { %p2237_p9 = pneg %p2236_p6  ;;  %p2243_p4 = por %p2242_p5, %p2241_p12 }
  0x3a   : > { %p2244_p8 = pnand %p2243_p4, %p2237_p9 }
  0x3c   : > { %2247 = shalt.err (!%p2244_p8)
}
  0x3d   : > { %2130 = dma.hbm_to_vmem [thread:$0]  (!%p2466_p11), %s2464_s12, 128, %s160_s18, %s148_s22  }
  0x3e   : > { %p3355_p7 = scmp.ne.s32.totalorder %s3349_s24, 0 }
  0x3f   : > { %p3356_p10 = scmp.eq.s32.totalorder (!%p3355_p7), %s2389_s1, 0 }
  0x40   : > { %168 = sbr.rel (%p3355_p7) target bundleno = 925 (0x39d), region = 32 }
  0x45   : > { %2291 = dma.done.wait (%p3356_p10), [#allocation9], 16   ;;  %p3357_p6 = pmov %p3356_p10 }
  0x46   : > { %s2491_s10 = sand.u32 1, %s2308_s15   ;;  %p3358_p4 = scmp.ne.s32.totalorder %s3347_s19, 0 }
  0x47   : > { %2293 = vsyncadd (%p3357_p6), [#allocation9], 4294967280  ;;  %s2007_s11 = sshll.u32 %s2491_s10, 3  ;;  %s175_s13 = scalar_lea.sflag [#allocation7], %s2491_s10 }
  0x48   : > { %s2497_s12 = scalar_lea.vmem [#allocation10], %s2007_s11 }
  0x49   : > { %2295 = dma.done.wait (%p3358_p4), %s175_s13, 128  }
  0x4a   : > { %2297 = vsyncadd (%p3358_p4), %s175_s13, 4294967168 }
  0x4b   : > { %183 = sfence }
  0x4c   : > { %v2320_v0 = vmov -inf   ;;  %vm296_vm0 = vcmask 179200   ;;  %v206_v1 = vld [vmem:[%s2497_s12] sm:$0xff]  ;;  %v2321_v2 = vmov 0.0   ;;  %v2322_v22 = vmov 1966171168  }
  0x4d   : > { %202 = vst [vmem:[#allocation2] sm:$0xff] %v2320_v0  ;;  %203 = vst [vmem:[#allocation2 + $0x8] sm:$0xff] %v2320_v0  ;;  %v210_v3 = vcombine.high %v206_v1, %v206_v1  ;;  %v240_v23 = vunpack.c.l.s4 %v2322_v22  ;;  %v242_v24 = vlaneseq  ;;  %s2323_s19 = smov 99   ;;  %s2324_s24 = smov 3   ;;  %vm299_vm2 = vcmask 177152  }
  0x4e   : > { %204 = vst [vmem:[#allocation3] sm:$0xff] %v2321_v2  ;;  %205 = vst [vmem:[#allocation3 + $0x8] sm:$0xff] %v2321_v2  ;;  %s2325_s18 = smov 83   ;;  %s2326_s21 = smov 115   ;;  %vm309_vm3 = vcmask 147480   ;;  %vm1804_vm4 = vcmask 122880  }
  0x4f   : > { %297 = vst.msk [vmem:[#allocation4] sm:$0xff] %vm296_vm0, %v2321_v2  ;;  %298 = vst.msk [vmem:[#allocation4 + $0x8] sm:$0xff] %vm296_vm0, %v2321_v2  ;;  %v241_v33 = vunpack.c.0.s8 %v240_v23  ;;  %v2510_v34 = vshrl.u32 %v242_v24, 7  ;;  %vm256_vm1 = vcmp.lt.s32.totalorder %v242_v24, 256  ;;  %s2327_s22 = smov 51   ;;  %s2328_s23 = smov 67  }
  0x50   : > { %301 = vst.msk [vmem:[#allocation4 + $0x18] sm:$0xff] %vm296_vm0, %v2321_v2  ;;  %302 = vst.msk [vmem:[#allocation4 + $0x20] sm:$0xff] %vm296_vm0, %v2321_v2  ;;  %s2329_s26 = smov 19   ;;  %s2330_s27 = smov 35   ;;  %vm1811_vm5 = vcmask 254080   ;;  %vm1817_vm6 = vcmask 385280  }
  0x51   : > { %v244_v43 = vsub.s32 %v241_v33, %v2510_v34  ;;  %300 = vst.msk [vmem:[#allocation4 + $0x10] sm:$0x3f] %vm299_vm2, %v2321_v2  ;;  %303 = vst.msk [vmem:[#allocation4 + $0x28] sm:$0x3f] %vm299_vm2, %v2321_v2  ;;  %s2555_s28 = sld [smem:[#allocation6 + $0x1]]  ;;  %s2331_s7 = smov 127  }
  0x52   : > { %s2559_s29 = sld [smem:[#allocation6 + $0x2]]  ;;  %s2332_s9 = smov 126   ;;  %vm1823_vm7 = vcmask 516480   ;;  %vm1829_vm8 = vcmask 647680   ;;  %vm1835_vm9 = vcmask 778880   ;;  %vm1841_vm10 = vcmask 910080  }
  0x53   : > { %s2564_s30 = sld [smem:[#allocation6 + $0x3]]  ;;  %vm1847_vm11 = vcmask 1041280   ;;  %p3359_p9 = scmp.ne.s32.totalorder %s3353_s6, 0 }
  0x54   : > { %v207_v4 = vld [vmem:[#allocation2] sm:$0xf]  ;;  %v208_v5 = vld [vmem:[#allocation2 + $0x8] sm:$0xf]  ;;  %s2572_s4 = sld [smem:[#allocation6 + $0x4]] }
  0x55   : > { %v212_v6 = vmax.f32 %v207_v4, %v206_v1  ;;  %v213_v7 = vmax.f32 %v208_v5, %v210_v3  ;;  %v216_v8 = vld [vmem:[#allocation3] sm:$0xf]  ;;  %v217_v9 = vld [vmem:[#allocation3 + $0x8] sm:$0xf]  ;;  %s2579_s8 = sld [smem:[#allocation6 + $0x5]] }
  0x56   : > { %v218_v10 = vadd.f32 %v216_v8, %v206_v1  ;;  %v219_v11 = vadd.f32 %v217_v9, %v210_v3  ;;  %s2586_s13 = sld [smem:[#allocation6 + $0x6]] }
  0x57   : > { %214 = vst [vmem:[#allocation2] sm:$0xf] %v212_v6  ;;  %215 = vst [vmem:[#allocation2 + $0x8] sm:$0xf] %v213_v7  ;;  %v507_v2 = vstv %s2555_s28  ;;  %s2623_s28 = sld [smem:[#allocation6 + $0xb]] }
  0x58   : > { %220 = vst [vmem:[#allocation3] sm:$0xf] %v218_v10  ;;  %221 = vst [vmem:[#allocation3 + $0x8] sm:$0xf] %v219_v11  ;;  %v521_v7 = vstv %s2559_s29  ;;  %s2632_s29 = sld [smem:[#allocation6 + $0xc]] }
  0x59   : > { %v535_v11 = vstv %s2564_s30  ;;  %s2641_s30 = sld [smem:[#allocation6 + $0xd]] }
  0x5e   : > { %v222_v12 = vld [vmem:[#allocation2] sm:$0xff]  ;;  %v223_v13 = vld [vmem:[#allocation2 + $0x8] sm:$0xff] }
  0x5f   : > { %v224_v14 = vrot.slane %v222_v12, 4  ;;  %v230_v15 = vrot.slane %v223_v13, 4  ;;  %v260_v16 = vld [vmem:[#allocation3] sm:$0xff]  ;;  %v261_v17 = vld [vmem:[#allocation3 + $0x8] sm:$0xff] }
  0x60   : > { %v262_v18 = vrot.slane %v260_v16, 4  ;;  %v268_v19 = vrot.slane %v261_v17, 4 }
  0x61   : > { %v225_v20 = vmax.f32 %v222_v12, %v224_v14  ;;  %v231_v21 = vmax.f32 %v223_v13, %v230_v15  ;;  %v549_v15 = vstv %s2572_s4  ;;  %s2652_s4 = sld [smem:[#allocation6 + $0xf]] }
  0x62   : > { %v263_v25 = vadd.f32 %v262_v18, %v260_v16  ;;  %v269_v26 = vadd.f32 %v268_v19, %v261_v17  ;;  %v563_v19 = vstv %s2579_s8  ;;  %s2661_s8 = sld [smem:[#allocation6 + $0x10]] }
  0x63   : > { %v226_v27 = vrot.slane %v225_v20, 2  ;;  %v232_v28 = vrot.slane %v231_v21, 2 }
  0x64   : > { %v264_v29 = vrot.slane %v263_v25, 2  ;;  %v270_v30 = vrot.slane %v269_v26, 2 }
  0x65   : > { %v227_v31 = vmax.f32 %v225_v20, %v226_v27  ;;  %v233_v32 = vmax.f32 %v231_v21, %v232_v28 }
  0x66   : > { %v265_v35 = vadd.f32 %v264_v29, %v263_v25  ;;  %v271_v36 = vadd.f32 %v270_v30, %v269_v26  ;;  %v577_v25 = vstv %s2586_s13  ;;  %s2671_s13 = sld [smem:[#allocation6 + $0x11]] }
  0x67   : > { %v228_v37 = vrot.slane %v227_v31, 1  ;;  %v234_v38 = vrot.slane %v233_v32, 1 }
  0x68   : > { %v266_v39 = vrot.slane %v265_v35, 1  ;;  %v272_v40 = vrot.slane %v271_v36, 1 }
  0x69   : > { %v229_v41 = vmax.f32 %v227_v31, %v228_v37  ;;  %v235_v42 = vmax.f32 %v233_v32, %v234_v38 }
  0x6a   : > { %v267_v44 = vadd.f32 %v266_v39, %v265_v35  ;;  %v273_v45 = vadd.f32 %v272_v40, %v271_v36 }
  0x6b   : > { %v238_v46 = vcombine.low %v229_v41, %v235_v42 }
  0x6c   : > { %v274_v47 = vmul.f32 0.25, %v267_v44  ;;  %v275_v48 = vmul.f32 0.25, %v273_v45 }
  0x6d   : > { %v245_v49 = vrot.slane %v238_v46, %v244_v43 }
  0x6e   : > { %v278_v50 = vcombine.low %v274_v47, %v275_v48  ;;  %v641_v47 = vstv %s2623_s28  ;;  %s2701_s28 = sld [smem:[#allocation6 + $0x16]] }
  0x6f   : > { %v252_v51 = vrot.slane %v245_v49, %v244_v43 }
  0x70   : > { %v285_v52 = vrot.slane %v278_v50, %v244_v43 }
  0x71   : > { %258 = vst.msk [vmem:[#allocation2] ss:$8 sm:$0x3] %vm256_vm1, %v252_v51 }
  0x72   : > { %v292_v53 = vrot.slane %v285_v52, %v244_v43 }
  0x74   : > { %294 = vst.msk [vmem:[#allocation3] ss:$8 sm:$0x3] %vm256_vm1, %v292_v53  ;;  %v655_v53 = vstv %s2632_s29  ;;  %s2710_s29 = sld [smem:[#allocation6 + $0x17]] }
  0x78   : > { %v330_v54 = vld [vmem:[#allocation2] ss:$0 sm:$0xff]  ;;  %v414_v55 = vld [vmem:[#allocation2 + $0x8] ss:$0 sm:$0xff] }
  0x79   : > { %332 = vrot.lane.b32.xlu1 %v330_v54, %s2323_s19  ;;  %306 = vrot.lane.b32.xlu0 %v330_v54, %s2324_s24 }
  0x7b   : > { %v311_v56 = vld [vmem:[#allocation3] ss:$0 sm:$0xff]  ;;  %v2536_v57 = vld [vmem:[#allocation3 + $0x8] ss:$0 sm:$0xff] }
  0x7d   : > { %344 = vrot.lane.b32.xlu1 %v330_v54, %s2325_s18  ;;  %320 = vrot.lane.b32.xlu0 %v330_v54, %s2326_s21 }
  0x81   : > { %368 = vrot.lane.b32.xlu1 %v330_v54, %s2327_s22  ;;  %356 = vrot.lane.b32.xlu0 %v330_v54, %s2328_s23 }
  0x85   : > { %392 = vrot.lane.b32.xlu1 %v330_v54, %s2329_s26  ;;  %380 = vrot.lane.b32.xlu0 %v330_v54, %s2330_s27 }
  0x89   : > { %416 = vrot.lane.b32.xlu1 %v414_v55, %s2326_s21  ;;  %404 = vrot.lane.b32.xlu0 %v414_v55, %s2324_s24 }
  0x8d   : > { %440 = vrot.lane.b32.xlu1 %v414_v55, %s2325_s18  ;;  %428 = vrot.lane.b32.xlu0 %v414_v55, %s2323_s19 }
  0x91   : > { %464 = vrot.lane.b32.xlu1 %v414_v55, %s2327_s22  ;;  %452 = vrot.lane.b32.xlu0 %v414_v55, %s2328_s23 }
  0x95   : > { %476 = vrot.lane.b32.xlu0 %v414_v55, %s2330_s27  ;;  %313 = vrot.lane.b32.xlu1 %v311_v56, %s2324_s24 }
  0x99   : > { %488 = vrot.lane.b32.xlu0 %v414_v55, %s2329_s26  ;;  %326 = vrot.lane.b32.xlu1 %v311_v56, %s2326_s21 }
  0x9d   : > { %350 = vrot.lane.b32.xlu1 %v311_v56, %s2325_s18  ;;  %338 = vrot.lane.b32.xlu0 %v311_v56, %s2323_s19 }
  0xa1   : > { %374 = vrot.lane.b32.xlu1 %v311_v56, %s2327_s22  ;;  %362 = vrot.lane.b32.xlu0 %v311_v56, %s2328_s23 }
  0xa5   : > { %398 = vrot.lane.b32.xlu1 %v311_v56, %s2329_s26  ;;  %386 = vrot.lane.b32.xlu0 %v311_v56, %s2330_s27 }
  0xa9   : > { %410 = vrot.lane.b32.xlu0 %v2536_v57, %s2324_s24  ;;  %422 = vrot.lane.b32.xlu1 %v2536_v57, %s2326_s21  ;;  %s2593_s24 = sld [smem:[#allocation6 + $0x8]] }
  0xaa   : > { %s2603_s21 = sld [smem:[#allocation6 + $0x9]] }
  0xad   : > { %434 = vrot.lane.b32.xlu0 %v2536_v57, %s2323_s19  ;;  %446 = vrot.lane.b32.xlu1 %v2536_v57, %s2325_s18  ;;  %s2333_s19 = smov 125   ;;  %s2334_s18 = smov 124  }
  0xaf   : > { %v599_v31 = vstv %s2593_s24  ;;  %s2678_s24 = sld [smem:[#allocation6 + $0x12]] }
  0xb0   : > { %v613_v37 = vstv %s2603_s21  ;;  %s2685_s21 = sld [smem:[#allocation6 + $0x13]] }
  0xb1   : > { %458 = vrot.lane.b32.xlu0 %v2536_v57, %s2328_s23  ;;  %470 = vrot.lane.b32.xlu1 %v2536_v57, %s2327_s22  ;;  %s2335_s22 = smov 123   ;;  %s2614_s23 = sld [smem:[#allocation6 + $0xa]] }
  0xb5   : > { %482 = vrot.lane.b32.xlu0 %v2536_v57, %s2330_s27  ;;  %s2336_s27 = smov 122  }
  0xb7   : > { %v627_v42 = vstv %s2614_s23  ;;  %s2692_s23 = sld [smem:[#allocation6 + $0x14]] }
  0xeb   : > { %v333_v58 = vpop.permute.xlu1 %332  ;;  %v307_v59 = vpop.permute.xlu0 %306 }
  0xec   : > { %335 = vst.msk [vmem:[#allocation4 + $0x5] sm:$0x1] %vm309_vm3, %v333_v58  ;;  %310 = vst.msk [vmem:[#allocation4 + $0x3] sm:$0x1] %vm309_vm3, %v307_v59  ;;  %v669_v59 = vstv %s2641_s30  ;;  %s2719_s30 = sld [smem:[#allocation6 + $0x18]] }
  0xef   : > { %v345_v60 = vpop.permute.xlu1 %344  ;;  %v321_v61 = vpop.permute.xlu0 %320 }
  0xf0   : > { %347 = vst.msk [vmem:[#allocation4 + $0x6] sm:$0x1] %vm309_vm3, %v345_v60  ;;  %323 = vst.msk [vmem:[#allocation4 + $0x4] sm:$0x1] %vm309_vm3, %v321_v61 }
  0xf3   : > { %v369_v62 = vpop.permute.xlu1 %368  ;;  %v357_v63 = vpop.permute.xlu0 %356 }
  0xf4   : > { %371 = vst.msk [vmem:[#allocation4 + $0x8] sm:$0x1] %vm309_vm3, %v369_v62  ;;  %359 = vst.msk [vmem:[#allocation4 + $0x7] sm:$0x1] %vm309_vm3, %v357_v63 }
  0xf7   : > { %v393_v0 = vpop.permute.xlu1 %392  ;;  %v381_v1 = vpop.permute.xlu0 %380 }
  0xf8   : > { %395 = vst.msk [vmem:[#allocation4 + $0xa] sm:$0x1] %vm309_vm3, %v393_v0  ;;  %383 = vst.msk [vmem:[#allocation4 + $0x9] sm:$0x1] %vm309_vm3, %v381_v1  ;;  %v691_v0 = vstv %s2652_s4  ;;  %s2728_s4 = sld [smem:[#allocation6 + $0x19]] }
  0xfb   : > { %v2566_v3 = vld [vmem:[#allocation4] sm:$0xff]  ;;  %v417_v4 = vpop.permute.xlu1 %416  ;;  %v405_v5 = vpop.permute.xlu0 %404 }
  0xfc   : > { %419 = vst.msk [vmem:[#allocation4 + $0xc] sm:$0x1] %vm309_vm3, %v417_v4  ;;  %407 = vst.msk [vmem:[#allocation4 + $0xb] sm:$0x1] %vm309_vm3, %v405_v5  ;;  %v508_v6 = vmul.f32 %v507_v2, %v2566_v3  ;;  %v522_v10 = vmul.f32 %v521_v7, %v2566_v3  ;;  %v536_v14 = vmul.f32 %v535_v11, %v2566_v3  ;;  %v2611_v30 = vld [vmem:[#allocation4 + $0x1] sm:$0xff]  ;;  %v705_v4 = vstv %s2661_s8  ;;  %s2735_s8 = sld [smem:[#allocation6 + $0x1a]] }
  0xfd   : > { %v550_v18 = vmul.f32 %v549_v15, %v2566_v3  ;;  %v564_v23 = vmul.f32 %v563_v19, %v2566_v3  ;;  %v578_v28 = vmul.f32 %v577_v25, %v2566_v3  ;;  %v600_v35 = vmul.f32 %v599_v31, %v2611_v30 }
  0xfe   : > { %512 = vrot.lane.b32.xlu1 %v508_v6, %s2331_s7  ;;  %v614_v40 = vmul.f32 %v613_v37, %v2611_v30  ;;  %v628_v45 = vmul.f32 %v627_v42, %v2611_v30  ;;  %v642_v50 = vmul.f32 %v641_v47, %v2611_v30  ;;  %v656_v56 = vmul.f32 %v655_v53, %v2611_v30 }
  0xff   : > { %v441_v8 = vpop.permute.xlu1 %440  ;;  %v429_v9 = vpop.permute.xlu0 %428  ;;  %v670_v61 = vmul.f32 %v669_v59, %v2611_v30  ;;  %v2668_v63 = vld [vmem:[#allocation4 + $0x2] sm:$0xff] }
 0x100   : > { %443 = vst.msk [vmem:[#allocation4 + $0xe] sm:$0x1] %vm309_vm3, %v441_v8  ;;  %431 = vst.msk [vmem:[#allocation4 + $0xd] sm:$0x1] %vm309_vm3, %v429_v9  ;;  %v692_v1 = vmul.f32 %v691_v0, %v2668_v63  ;;  %v706_v5 = vmul.f32 %v705_v4, %v2668_v63 }
 0x102   : > { %526 = vrot.lane.b32.xlu1 %v522_v10, %s2332_s9  ;;  %v733_v10 = vstv %s2678_s24  ;;  %s2749_s24 = sld [smem:[#allocation6 + $0x1d]] }
 0x103   : > { %v465_v12 = vpop.permute.xlu1 %464  ;;  %v453_v13 = vpop.permute.xlu0 %452 }
 0x104   : > { %467 = vst.msk [vmem:[#allocation4 + $0x10] sm:$0x1] %vm309_vm3, %v465_v12  ;;  %455 = vst.msk [vmem:[#allocation4 + $0xf] sm:$0x1] %vm309_vm3, %v453_v13 }
 0x106   : > { %540 = vrot.lane.b32.xlu1 %v536_v14, %s2333_s19  ;;  %v747_v14 = vstv %s2685_s21  ;;  %s2753_s21 = sld [smem:[#allocation6 + $0x1e]] }
 0x107   : > { %v477_v16 = vpop.permute.xlu0 %476  ;;  %v314_v17 = vpop.permute.xlu1 %313 }
 0x108   : > { %479 = vst.msk [vmem:[#allocation4 + $0x11] sm:$0x1] %vm309_vm3, %v477_v16  ;;  %317 = vst.msk [vmem:[#allocation4 + $0x1b] sm:$0x1] %vm309_vm3, %v314_v17  ;;  %v761_v17 = vstv %s2692_s23  ;;  %s2762_s23 = sld [smem:[#allocation6 + $0x1f]] }
 0x10a   : > { %554 = vrot.lane.b32.xlu1 %v550_v18, %s2334_s18  ;;  %v762_v18 = vmul.f32 %v761_v17, %v2668_v63 }
 0x10b   : > { %v2596_v20 = vld [vmem:[#allocation4 + $0x8] sm:$0xff]  ;;  %v489_v21 = vpop.permute.xlu0 %488  ;;  %v327_v22 = vpop.permute.xlu1 %326 }
 0x10c   : > { %491 = vst.msk [vmem:[#allocation4 + $0x12] sm:$0x1] %vm309_vm3, %v489_v21  ;;  %v509_v24 = vmul.f32 %v507_v2, %v2596_v20  ;;  %329 = vst.msk [vmem:[#allocation4 + $0x1c] sm:$0x1] %vm309_vm3, %v327_v22  ;;  %v523_v29 = vmul.f32 %v521_v7, %v2596_v20  ;;  %v537_v36 = vmul.f32 %v535_v11, %v2596_v20  ;;  %v2649_v52 = vld [vmem:[#allocation4 + $0x9] sm:$0xff]  ;;  %v719_v7 = vstv %s2671_s13  ;;  %s2742_s13 = sld [smem:[#allocation6 + $0x1b]] }
 0x10d   : > { %v551_v41 = vmul.f32 %v549_v15, %v2596_v20  ;;  %v565_v46 = vmul.f32 %v563_v19, %v2596_v20  ;;  %v579_v51 = vmul.f32 %v577_v25, %v2596_v20  ;;  %v601_v58 = vmul.f32 %v599_v31, %v2649_v52  ;;  %v2714_v21 = vld [vmem:[#allocation4 + $0x3] sm:$0xff] }
 0x10e   : > { %568 = vrot.lane.b32.xlu1 %v564_v23, %s2335_s22  ;;  %514 = vrot.lane.b32.xlu0 %v509_v24, %s2331_s7  ;;  %v615_v62 = vmul.f32 %v613_v37, %v2649_v52  ;;  %v629_v2 = vmul.f32 %v627_v42, %v2649_v52  ;;  %v643_v6 = vmul.f32 %v641_v47, %v2649_v52  ;;  %v783_v22 = vstv %s2701_s28  ;;  %v2769_v47 = vld [vmem:[#allocation4 + $0x4] sm:$0xff]  ;;  %s2772_s28 = sld [smem:[#allocation6 + $0x20]] }
 0x10f   : > { %v351_v26 = vpop.permute.xlu1 %350  ;;  %v339_v27 = vpop.permute.xlu0 %338  ;;  %v720_v8 = vmul.f32 %v719_v7, %v2668_v63  ;;  %v657_v9 = vmul.f32 %v655_v53, %v2649_v52  ;;  %v734_v11 = vmul.f32 %v733_v10, %v2668_v63  ;;  %v671_v12 = vmul.f32 %v669_v59, %v2649_v52  ;;  %v2698_v13 = vld [vmem:[#allocation4 + $0xa] sm:$0xff] }
 0x110   : > { %353 = vst.msk [vmem:[#allocation4 + $0x1e] sm:$0x1] %vm309_vm3, %v351_v26  ;;  %341 = vst.msk [vmem:[#allocation4 + $0x1d] sm:$0x1] %vm309_vm3, %v339_v27  ;;  %v748_v15 = vmul.f32 %v747_v14, %v2668_v63  ;;  %v693_v16 = vmul.f32 %v691_v0, %v2698_v13  ;;  %v707_v19 = vmul.f32 %v705_v4, %v2698_v13  ;;  %v797_v26 = vstv %s2710_s29  ;;  %s2779_s29 = sld [smem:[#allocation6 + $0x21]]  ;;  %v2806_v4 = vld [vmem:[#allocation4 + $0x5] sm:$0xff] }
 0x111   : > { %v784_v23 = vmul.f32 %v783_v22, %v2714_v21  ;;  %v721_v24 = vmul.f32 %v719_v7, %v2698_v13  ;;  %v735_v27 = vmul.f32 %v733_v10, %v2698_v13  ;;  %v749_v31 = vmul.f32 %v747_v14, %v2698_v13 }
 0x112   : > { %582 = vrot.lane.b32.xlu1 %v578_v28, %s2336_s27  ;;  %528 = vrot.lane.b32.xlu0 %v523_v29, %s2332_s9  ;;  %v811_v29 = vstv %s2719_s30  ;;  %v839_v37 = vstv %s2735_s8  ;;  %v798_v42 = vmul.f32 %v797_v26, %v2714_v21  ;;  %s2786_s30 = sld [smem:[#allocation6 + $0x22]] }
 0x113   : > { %v375_v32 = vpop.permute.xlu1 %374  ;;  %v363_v33 = vpop.permute.xlu0 %362  ;;  %v2723_v25 = vld [vmem:[#allocation4 + $0xb] sm:$0xff]  ;;  %s2800_s8 = sld [smem:[#allocation6]] }
 0x114   : > { %377 = vst.msk [vmem:[#allocation4 + $0x20] sm:$0x1] %vm309_vm3, %v375_v32  ;;  %365 = vst.msk [vmem:[#allocation4 + $0x1f] sm:$0x1] %vm309_vm3, %v363_v33  ;;  %v799_v28 = vmul.f32 %v797_v26, %v2723_v25  ;;  %v813_v32 = vmul.f32 %v811_v29, %v2723_v25  ;;  %v825_v33 = vstv %s2728_s4  ;;  %s2793_s4 = sld [smem:[#allocation6 + $0x24]]  ;;  %v2822_v14 = vld [vmem:[#allocation4 + $0xd] sm:$0xff] }
 0x116   : > { %604 = vrot.lane.b32.xlu1 %v600_v35, %s2331_s7  ;;  %542 = vrot.lane.b32.xlu0 %v537_v36, %s2333_s19  ;;  %v763_v35 = vmul.f32 %v761_v17, %v2698_v13  ;;  %v827_v36 = vmul.f32 %v825_v33, %v2723_v25  ;;  %v931_v59 = vstv %s2779_s29  ;;  %s2853_s29 = sld [smem:[#allocation6 + $0x2b]] }
 0x117   : > { %v399_v38 = vpop.permute.xlu1 %398  ;;  %v387_v39 = vpop.permute.xlu0 %386 }
 0x118   : > { %401 = vst.msk [vmem:[#allocation4 + $0x22] sm:$0x1] %vm309_vm3, %v399_v38  ;;  %389 = vst.msk [vmem:[#allocation4 + $0x21] sm:$0x1] %vm309_vm3, %v387_v39  ;;  %v841_v38 = vmul.f32 %v839_v37, %v2723_v25  ;;  %v785_v39 = vmul.f32 %v783_v22, %v2723_v25 }
 0x11a   : > { %618 = vrot.lane.b32.xlu1 %v614_v40, %s2332_s9  ;;  %556 = vrot.lane.b32.xlu0 %v551_v41, %s2334_s18  ;;  %v853_v40 = vstv %s2742_s13  ;;  %s2811_s13 = sld [smem:[#allocation6 + $0x25]] }
 0x11b   : > { %v411_v43 = vpop.permute.xlu0 %410  ;;  %v423_v44 = vpop.permute.xlu1 %422  ;;  %v855_v41 = vmul.f32 %v853_v40, %v2723_v25 }
 0x11c   : > { %413 = vst.msk [vmem:[#allocation4 + $0x23] sm:$0x1] %vm309_vm3, %v411_v43  ;;  %425 = vst.msk [vmem:[#allocation4 + $0x24] sm:$0x1] %vm309_vm3, %v423_v44  ;;  %v2760_v43 = vld [vmem:[#allocation4 + $0xc] sm:$0xff]  ;;  %v875_v44 = vstv %s2749_s24  ;;  %s2818_s24 = sld [smem:[#allocation6 + $0x26]] }
 0x11e   : > { %632 = vrot.lane.b32.xlu1 %v628_v45, %s2333_s19  ;;  %570 = vrot.lane.b32.xlu0 %v565_v46, %s2335_s22  ;;  %v877_v45 = vmul.f32 %v875_v44, %v2760_v43  ;;  %v812_v46 = vmul.f32 %v811_v29, %v2714_v21 }
 0x11f   : > { %v435_v48 = vpop.permute.xlu0 %434  ;;  %v447_v49 = vpop.permute.xlu1 %446 }
 0x120   : > { %437 = vst.msk [vmem:[#allocation4 + $0x25] sm:$0x1] %vm309_vm3, %v435_v48  ;;  %449 = vst.msk [vmem:[#allocation4 + $0x26] sm:$0x1] %vm309_vm3, %v447_v49  ;;  %v889_v48 = vstv %s2753_s21  ;;  %s2824_s21 = sld [smem:[#allocation6 + $0x7]] }
 0x121   : > { %v890_v49 = vmul.f32 %v889_v48, %v2769_v47 }
 0x122   : > { %646 = vrot.lane.b32.xlu1 %v642_v50, %s2334_s18  ;;  %584 = vrot.lane.b32.xlu0 %v579_v51, %s2336_s27  ;;  %v826_v50 = vmul.f32 %v825_v33, %v2714_v21  ;;  %v903_v51 = vstv %s2762_s23  ;;  %s2830_s23 = sld [smem:[#allocation6 + $0x27]] }
 0x123   : > { %v459_v54 = vpop.permute.xlu0 %458  ;;  %v471_v55 = vpop.permute.xlu1 %470  ;;  %v904_v53 = vmul.f32 %v903_v51, %v2769_v47 }
 0x124   : > { %461 = vst.msk [vmem:[#allocation4 + $0x27] sm:$0x1] %vm309_vm3, %v459_v54  ;;  %473 = vst.msk [vmem:[#allocation4 + $0x28] sm:$0x1] %vm309_vm3, %v471_v55  ;;  %v840_v54 = vmul.f32 %v839_v37, %v2714_v21  ;;  %v917_v55 = vstv %s2772_s28  ;;  %s2845_s28 = sld [smem:[#allocation6 + $0x29]] }
 0x126   : > { %660 = vrot.lane.b32.xlu1 %v656_v56, %s2335_s22  ;;  %606 = vrot.lane.b32.xlu0 %v601_v58, %s2331_s7  ;;  %v918_v56 = vmul.f32 %v917_v55, %v2769_v47  ;;  %v854_v58 = vmul.f32 %v853_v40, %v2714_v21  ;;  %v593_v29 = vstv %s2824_s21  ;;  %s2897_s21 = sld [smem:[#allocation6 + $0x30]] }
 0x127   : > { %v483_v60 = vpop.permute.xlu0 %482 }
 0x128   : > { %485 = vst.msk [vmem:[#allocation4 + $0x29] sm:$0x1] %vm309_vm3, %v483_v60  ;;  %v932_v60 = vmul.f32 %v931_v59, %v2769_v47 }
 0x12a   : > { %674 = vrot.lane.b32.xlu1 %v670_v61, %s2336_s27  ;;  %620 = vrot.lane.b32.xlu0 %v615_v62, %s2332_s9  ;;  %v876_v61 = vmul.f32 %v875_v44, %v2769_v47  ;;  %v945_v62 = vstv %s2786_s30  ;;  %s2861_s30 = sld [smem:[#allocation6 + $0x2c]] }
 0x12e   : > { %696 = vrot.lane.b32.xlu1 %v692_v1, %s2331_s7  ;;  %634 = vrot.lane.b32.xlu0 %v629_v2, %s2333_s19  ;;  %v946_v1 = vmul.f32 %v945_v62, %v2769_v47  ;;  %v891_v2 = vmul.f32 %v889_v48, %v2760_v43 }
 0x132   : > { %710 = vrot.lane.b32.xlu1 %v706_v5, %s2332_s9  ;;  %648 = vrot.lane.b32.xlu0 %v643_v6, %s2334_s18  ;;  %v967_v5 = vstv %s2793_s4  ;;  %s2870_s4 = sld [smem:[#allocation6 + $0x2d]] }
 0x133   : > { %v968_v7 = vmul.f32 %v967_v5, %v2806_v4  ;;  %v969_v37 = vmul.f32 %v967_v5, %v2822_v14  ;;  %v1073_v5 = vstv %s2861_s30  ;;  %s2930_s30 = sld [smem:[#allocation6 + $0x35]] }
 0x136   : > { %724 = vrot.lane.b32.xlu1 %v720_v8, %s2333_s19  ;;  %662 = vrot.lane.b32.xlu0 %v657_v9, %s2335_s22  ;;  %v905_v8 = vmul.f32 %v903_v51, %v2760_v43  ;;  %v501_v9 = vstv %s2800_s8  ;;  %s2874_s8 = sld [smem:[#allocation6 + $0xe]] }
 0x137   : > { %v503_v48 = vmul.f32 %v501_v9, %v2596_v20 }
 0x13a   : > { %738 = vrot.lane.b32.xlu1 %v734_v11, %s2334_s18  ;;  %676 = vrot.lane.b32.xlu0 %v671_v12, %s2336_s27  ;;  %v919_v11 = vmul.f32 %v917_v55, %v2760_v43  ;;  %v502_v12 = vmul.f32 %v501_v9, %v2566_v3  ;;  %v2865_v55 = vld [vmem:[#allocation4 + $0xe] sm:$0xff] }
 0x13e   : > { %752 = vrot.lane.b32.xlu1 %v748_v15, %s2335_s22  ;;  %698 = vrot.lane.b32.xlu0 %v693_v16, %s2331_s7  ;;  %v981_v16 = vstv %s2811_s13  ;;  %s2879_s13 = sld [smem:[#allocation6 + $0x2e]] }
 0x142   : > { %766 = vrot.lane.b32.xlu1 %v762_v18, %s2336_s27  ;;  %712 = vrot.lane.b32.xlu0 %v707_v19, %s2332_s9  ;;  %v983_v18 = vmul.f32 %v981_v16, %v2822_v14  ;;  %v933_v19 = vmul.f32 %v931_v59, %v2760_v43 }
 0x146   : > { %788 = vrot.lane.b32.xlu1 %v784_v23, %s2331_s7  ;;  %726 = vrot.lane.b32.xlu0 %v721_v24, %s2333_s19 }
 0x14a   : > { %740 = vrot.lane.b32.xlu0 %v735_v27, %s2334_s18  ;;  %804 = vrot.lane.b32.xlu1 %v799_v28, %s2332_s9  ;;  %v947_v27 = vmul.f32 %v945_v62, %v2760_v43 }
 0x14e   : > { %754 = vrot.lane.b32.xlu0 %v749_v31, %s2335_s22  ;;  %818 = vrot.lane.b32.xlu1 %v813_v32, %s2333_s19  ;;  %v1009_v32 = vstv %s2830_s23  ;;  %s2905_s23 = sld [smem:[#allocation6 + $0x32]] }
 0x14f   : > { %v1010_v62 = vmul.f32 %v1009_v32, %v2806_v4 }
 0x152   : > { %768 = vrot.lane.b32.xlu0 %v763_v35, %s2336_s27  ;;  %832 = vrot.lane.b32.xlu1 %v827_v36, %s2334_s18  ;;  %v1011_v36 = vmul.f32 %v1009_v32, %v2822_v14 }
 0x156   : > { %846 = vrot.lane.b32.xlu1 %v841_v38, %s2335_s22  ;;  %790 = vrot.lane.b32.xlu0 %v785_v39, %s2331_s7  ;;  %v594_v38 = vmul.f32 %v593_v29, %v2611_v30 }
 0x15a   : > { %860 = vrot.lane.b32.xlu1 %v855_v41, %s2336_s27  ;;  %802 = vrot.lane.b32.xlu0 %v798_v42, %s2332_s9 }
 0x15e   : > { %882 = vrot.lane.b32.xlu1 %v877_v45, %s2331_s7  ;;  %816 = vrot.lane.b32.xlu0 %v812_v46, %s2333_s19  ;;  %v982_v46 = vmul.f32 %v981_v16, %v2806_v4 }
 0x162   : > { %894 = vrot.lane.b32.xlu1 %v890_v49, %s2332_s9  ;;  %830 = vrot.lane.b32.xlu0 %v826_v50, %s2334_s18  ;;  %v1037_v49 = vstv %s2845_s28  ;;  %s2921_s28 = sld [smem:[#allocation6 + $0x34]] }
 0x166   : > { %908 = vrot.lane.b32.xlu1 %v904_v53, %s2333_s19  ;;  %844 = vrot.lane.b32.xlu0 %v840_v54, %s2335_s22  ;;  %v1039_v53 = vmul.f32 %v1037_v49, %v2822_v14 }
 0x16a   : > { %922 = vrot.lane.b32.xlu1 %v918_v56, %s2334_s18  ;;  %858 = vrot.lane.b32.xlu0 %v854_v58, %s2336_s27  ;;  %v1059_v58 = vstv %s2853_s29  ;;  %s2925_s29 = sld [smem:[#allocation6 + $0x15]] }
 0x16e   : > { %936 = vrot.lane.b32.xlu1 %v932_v60, %s2335_s22  ;;  %880 = vrot.lane.b32.xlu0 %v876_v61, %s2331_s7  ;;  %v1061_v61 = vmul.f32 %v1059_v58, %v2865_v55 }
 0x170   : > { %v513_v0 = vpop.permute.xlu1 %512 }
 0x171   : > { %v518_v15 = vadd.f32 %v513_v0, %v502_v12 }
 0x172   : > { %950 = vrot.lane.b32.xlu1 %v946_v1, %s2336_s27  ;;  %896 = vrot.lane.b32.xlu0 %v891_v2, %s2332_s9 }
 0x174   : > { %v527_v6 = vpop.permute.xlu1 %526 }
 0x175   : > { %v532_v3 = vadd.f32 %v527_v6, %v518_v15 }
 0x176   : > { %972 = vrot.lane.b32.xlu1 %v968_v7, %s2331_s7  ;;  %910 = vrot.lane.b32.xlu0 %v905_v8, %s2333_s19  ;;  %v1075_v8 = vmul.f32 %v1073_v5, %v2865_v55 }
 0x178   : > { %v541_v10 = vpop.permute.xlu1 %540 }
 0x179   : > { %v546_v22 = vadd.f32 %v541_v10, %v532_v3  ;;  %v595_v10 = vmul.f32 %v593_v29, %v2649_v52 }
 0x17a   : > { %494 = vrot.lane.b32.xlu1 %v2536_v57, %s2329_s26  ;;  %924 = vrot.lane.b32.xlu0 %v919_v11, %s2334_s18  ;;  %v995_v57 = vstv %s2818_s24  ;;  %s2837_s26 = sld [smem:[#allocation6 + $0x28]] }
 0x17b   : > { %v997_v26 = vmul.f32 %v995_v57, %v2822_v14  ;;  %v996_v54 = vmul.f32 %v995_v57, %v2806_v4  ;;  %s2887_s24 = sld [smem:[#allocation6 + $0x2f]]  ;;  %v2891_v57 = vld [vmem:[#allocation4 + $0x6] sm:$0xff] }
 0x17c   : > { %v555_v17 = vpop.permute.xlu1 %554 }
 0x17d   : > { %v560_v28 = vadd.f32 %v555_v17, %v546_v22  ;;  %v1087_v17 = vstv %s2870_s4  ;;  %v1038_v22 = vmul.f32 %v1037_v49, %v2806_v4  ;;  %s2938_s4 = sld [smem:[#allocation6 + $0x36]] }
 0x17e   : > { %988 = vrot.lane.b32.xlu1 %v983_v18, %s2332_s9  ;;  %938 = vrot.lane.b32.xlu0 %v933_v19, %s2335_s22  ;;  %v1089_v3 = vmul.f32 %v1087_v17, %v2865_v55 }
 0x180   : > { %v569_v23 = vpop.permute.xlu1 %568  ;;  %v515_v24 = vpop.permute.xlu0 %514  ;;  %v1023_v41 = vstv %s2837_s26  ;;  %s2912_s26 = sld [smem:[#allocation6 + $0x33]] }
 0x181   : > { %v574_v31 = vadd.f32 %v569_v23, %v560_v28  ;;  %v1025_v45 = vmul.f32 %v1023_v41, %v2822_v14  ;;  %v519_v30 = vadd.f32 %v515_v24, %v503_v48  ;;  %v1024_v9 = vmul.f32 %v1023_v41, %v2806_v4 }
 0x182   : > { %1002 = vrot.lane.b32.xlu1 %v997_v26, %s2333_s19  ;;  %952 = vrot.lane.b32.xlu0 %v947_v27, %s2336_s27  ;;  %v685_v23 = vstv %s2874_s8  ;;  %v1101_v26 = vstv %s2879_s13  ;;  %s2948_s8 = sld [smem:[#allocation6 + $0x37]] }
 0x183   : > { %v1103_v29 = vmul.f32 %v1101_v26, %v2865_v55  ;;  %v686_v32 = vmul.f32 %v685_v23, %v2668_v63  ;;  %v1129_v41 = vstv %s2897_s21  ;;  %s2958_s13 = sld [smem:[#allocation6 + $0x39]] }
 0x184   : > { %v583_v33 = vpop.permute.xlu1 %582  ;;  %v529_v35 = vpop.permute.xlu0 %528  ;;  %s2976_s21 = sld [smem:[#allocation6 + $0x3b]] }
 0x185   : > { %v588_v39 = vadd.f32 %v583_v33, %v574_v31  ;;  %v533_v56 = vadd.f32 %v529_v35, %v519_v30  ;;  %v1060_v31 = vmul.f32 %v1059_v58, %v2891_v57  ;;  %v2916_v30 = vld [vmem:[#allocation4 + $0x20] sm:$0xff] }
 0x186   : > { %1016 = vrot.lane.b32.xlu1 %v1011_v36, %s2334_s18  ;;  %974 = vrot.lane.b32.xlu0 %v969_v37, %s2331_s7  ;;  %v1115_v36 = vstv %s2887_s24  ;;  %s2967_s24 = sld [smem:[#allocation6 + $0x3a]] }
 0x187   : > { %v596_v40 = vadd.f32 %v594_v38, %v588_v39  ;;  %v1117_v39 = vmul.f32 %v1115_v36, %v2865_v55 }
 0x188   : > { %v605_v42 = vpop.permute.xlu1 %604  ;;  %v543_v44 = vpop.permute.xlu0 %542 }
 0x189   : > { %v547_v20 = vadd.f32 %v543_v44, %v533_v56  ;;  %v610_v1 = vadd.f32 %v605_v42, %v596_v40  ;;  %v1074_v40 = vmul.f32 %v1073_v5, %v2891_v57 }
 0x18a   : > { %1030 = vrot.lane.b32.xlu1 %v1025_v45, %s2335_s22  ;;  %986 = vrot.lane.b32.xlu0 %v982_v46, %s2332_s9  ;;  %v1131_v45 = vmul.f32 %v1129_v41, %v2865_v55  ;;  %v1088_v46 = vmul.f32 %v1087_v17, %v2891_v57  ;;  %v777_v17 = vstv %s2925_s29  ;;  %s3002_s29 = sld [smem:[#allocation6 + $0x3e]] }
 0x18c   : > { %v619_v50 = vpop.permute.xlu1 %618  ;;  %v557_v51 = vpop.permute.xlu0 %556 }
 0x18d   : > { %v561_v0 = vadd.f32 %v557_v51, %v547_v20  ;;  %v624_v11 = vadd.f32 %v619_v50, %v610_v1  ;;  %v1151_v50 = vstv %s2905_s23  ;;  %s2983_s23 = sld [smem:[#allocation6 + $0x3c]] }
 0x18e   : > { %1044 = vrot.lane.b32.xlu1 %v1039_v53, %s2336_s27  ;;  %1000 = vrot.lane.b32.xlu0 %v996_v54, %s2333_s19  ;;  %v1102_v54 = vmul.f32 %v1101_v26, %v2891_v57  ;;  %v1153_v56 = vmul.f32 %v1151_v50, %v2916_v30 }
 0x190   : > { %v633_v59 = vpop.permute.xlu1 %632  ;;  %v571_v60 = vpop.permute.xlu0 %570 }
 0x191   : > { %v575_v2 = vadd.f32 %v571_v60, %v561_v0  ;;  %v638_v15 = vadd.f32 %v633_v59, %v624_v11  ;;  %v1165_v60 = vstv %s2912_s26  ;;  %v1116_v0 = vmul.f32 %v1115_v36, %v2891_v57  ;;  %s2991_s26 = sld [smem:[#allocation6 + $0x3d]] }
 0x192   : > { %1066 = vrot.lane.b32.xlu1 %v1061_v61, %s2331_s7  ;;  %1014 = vrot.lane.b32.xlu0 %v1010_v62, %s2334_s18  ;;  %v1167_v1 = vmul.f32 %v1165_v60, %v2916_v30 }
 0x194   : > { %v647_v6 = vpop.permute.xlu1 %646  ;;  %v585_v7 = vpop.permute.xlu0 %584 }
 0x195   : > { %v589_v12 = vadd.f32 %v585_v7, %v575_v2  ;;  %v652_v52 = vadd.f32 %v647_v6, %v638_v15  ;;  %v687_v2 = vmul.f32 %v685_v23, %v2698_v13  ;;  %v2942_v13 = vld [vmem:[#allocation4 + $0x18] sm:$0xff] }
 0x196   : > { %1080 = vrot.lane.b32.xlu1 %v1075_v8, %s2332_s9  ;;  %1028 = vrot.lane.b32.xlu0 %v1024_v9, %s2335_s22  ;;  %v1179_v9 = vstv %s2921_s28  ;;  %s2997_s28 = sld [smem:[#allocation6 + $0x1c]] }
 0x197   : > { %v597_v16 = vadd.f32 %v595_v10, %v589_v12  ;;  %v1130_v12 = vmul.f32 %v1129_v41, %v2891_v57  ;;  %v1181_v15 = vmul.f32 %v1179_v9, %v2916_v30 }
 0x198   : > { %v661_v18 = vpop.permute.xlu1 %660  ;;  %v607_v19 = vpop.permute.xlu0 %606 }
 0x199   : > { %v666_v24 = vadd.f32 %v661_v18, %v652_v52  ;;  %v611_v63 = vadd.f32 %v607_v19, %v597_v16  ;;  %v1193_v19 = vstv %s2930_s30  ;;  %v1152_v52 = vmul.f32 %v1151_v50, %v2942_v13  ;;  %s3009_s30 = sld [smem:[#allocation6 + $0x40]] }
 0x19a   : > { %1094 = vrot.lane.b32.xlu1 %v1089_v3, %s2333_s19  ;;  %1042 = vrot.lane.b32.xlu0 %v1038_v22, %s2336_s27  ;;  %v1195_v23 = vmul.f32 %v1193_v19, %v2916_v30 }
 0x19c   : > { %v675_v27 = vpop.permute.xlu1 %674  ;;  %v621_v28 = vpop.permute.xlu0 %620 }
 0x19d   : > { %v680_v33 = vadd.f32 %v675_v27, %v666_v24  ;;  %v625_v48 = vadd.f32 %v621_v28, %v611_v63  ;;  %v778_v24 = vmul.f32 %v777_v17, %v2714_v21  ;;  %v1207_v28 = vstv %s2938_s4  ;;  %v2971_v63 = vld [vmem:[#allocation4 + $0x21] sm:$0xff]  ;;  %s3022_s4 = sld [smem:[#allocation6 + $0x41]] }
 0x19e   : > { %1108 = vrot.lane.b32.xlu1 %v1103_v29, %s2334_s18  ;;  %1064 = vrot.lane.b32.xlu0 %v1060_v31, %s2331_s7 }
 0x19f   : > { %v688_v35 = vadd.f32 %v686_v32, %v680_v33  ;;  %v1166_v32 = vmul.f32 %v1165_v60, %v2942_v13  ;;  %v1209_v33 = vmul.f32 %v1207_v28, %v2916_v30 }
 0x1a0   : > { %v697_v37 = vpop.permute.xlu1 %696  ;;  %v635_v38 = vpop.permute.xlu0 %634 }
 0x1a1   : > { %v639_v49 = vadd.f32 %v635_v38, %v625_v48  ;;  %v702_v58 = vadd.f32 %v697_v37, %v688_v35  ;;  %v1221_v35 = vstv %s2948_s8  ;;  %v1180_v38 = vmul.f32 %v1179_v9, %v2942_v13  ;;  %s3031_s8 = sld [smem:[#allocation6 + $0x42]] }
 0x1a2   : > { %1122 = vrot.lane.b32.xlu1 %v1117_v39, %s2335_s22  ;;  %1078 = vrot.lane.b32.xlu0 %v1074_v40, %s2332_s9  ;;  %v1223_v39 = vmul.f32 %v1221_v35, %v2916_v30 }
 0x1a4   : > { %v711_v42 = vpop.permute.xlu1 %710  ;;  %v649_v44 = vpop.permute.xlu0 %648 }
 0x1a5   : > { %v653_v20 = vadd.f32 %v649_v44, %v639_v49  ;;  %v716_v5 = vadd.f32 %v711_v42, %v702_v58  ;;  %v1243_v42 = vstv %s2958_s13  ;;  %v779_v58 = vmul.f32 %v777_v17, %v2723_v25  ;;  %s3038_s13 = sld [smem:[#allocation6 + $0x43]] }
 0x1a6   : > { %1136 = vrot.lane.b32.xlu1 %v1131_v45, %s2336_s27  ;;  %1092 = vrot.lane.b32.xlu0 %v1088_v46, %s2333_s19  ;;  %v1194_v46 = vmul.f32 %v1193_v19, %v2942_v13  ;;  %v1245_v48 = vmul.f32 %v1243_v42, %v2971_v63 }
 0x1a8   : > { %v725_v51 = vpop.permute.xlu1 %724  ;;  %v663_v53 = vpop.permute.xlu0 %662 }
 0x1a9   : > { %v667_v59 = vadd.f32 %v663_v53, %v653_v20  ;;  %v730_v7 = vadd.f32 %v725_v51, %v716_v5  ;;  %v1257_v51 = vstv %s2967_s24  ;;  %s3046_s24 = sld [smem:[#allocation6 + $0x44]] }
 0x1aa   : > { %1106 = vrot.lane.b32.xlu0 %v1102_v54, %s2334_s18  ;;  %1158 = vrot.lane.b32.xlu1 %v1153_v56, %s2331_s7  ;;  %v1208_v56 = vmul.f32 %v1207_v28, %v2942_v13  ;;  %v1259_v20 = vmul.f32 %v1257_v51, %v2971_v63  ;;  %v1313_v28 = vstv %s3002_s29  ;;  %s3089_s29 = sld [smem:[#allocation6 + $0x49]] }
 0x1ac   : > { %v739_v61 = vpop.permute.xlu1 %738  ;;  %v677_v62 = vpop.permute.xlu0 %676 }
 0x1ad   : > { %v681_v6 = vadd.f32 %v677_v62, %v667_v59  ;;  %v744_v16 = vadd.f32 %v739_v61, %v730_v7  ;;  %v1271_v61 = vstv %s2976_s21  ;;  %v1285_v7 = vstv %s2983_s23  ;;  %s3048_s21 = sld [smem:[#allocation6 + $0x23]] }
 0x1ae   : > { %1120 = vrot.lane.b32.xlu0 %v1116_v0, %s2335_s22  ;;  %1172 = vrot.lane.b32.xlu1 %v1167_v1, %s2332_s9  ;;  %v1273_v1 = vmul.f32 %v1271_v61, %v2971_v63  ;;  %s3057_s23 = sld [smem:[#allocation6 + $0x45]] }
 0x1af   : > { %v689_v8 = vadd.f32 %v687_v2, %v681_v6  ;;  %v1222_v2 = vmul.f32 %v1221_v35, %v2942_v13  ;;  %v2995_v6 = vld [vmem:[#allocation4 + $0x19] sm:$0xff] }
 0x1b0   : > { %v753_v10 = vpop.permute.xlu1 %752  ;;  %v699_v11 = vpop.permute.xlu0 %698 }
 0x1b1   : > { %v758_v18 = vadd.f32 %v753_v10, %v744_v16  ;;  %v703_v21 = vadd.f32 %v699_v11, %v689_v8  ;;  %v1287_v10 = vmul.f32 %v1285_v7, %v2971_v63  ;;  %v1244_v11 = vmul.f32 %v1243_v42, %v2995_v6 }
 0x1b2   : > { %1134 = vrot.lane.b32.xlu0 %v1130_v12, %s2336_s27  ;;  %1186 = vrot.lane.b32.xlu1 %v1181_v15, %s2333_s19  ;;  %v1299_v16 = vstv %s2991_s26  ;;  %s3076_s26 = sld [smem:[#allocation6 + $0x47]] }
 0x1b3   : > { %v1301_v19 = vmul.f32 %v1299_v16, %v2971_v63 }
 0x1b4   : > { %v767_v3 = vpop.permute.xlu1 %766  ;;  %v713_v22 = vpop.permute.xlu0 %712 }
 0x1b5   : > { %v772_v26 = vadd.f32 %v767_v3, %v758_v18  ;;  %v717_v40 = vadd.f32 %v713_v22, %v703_v21  ;;  %v1258_v3 = vmul.f32 %v1257_v51, %v2995_v6  ;;  %v1272_v21 = vmul.f32 %v1271_v61, %v2995_v6 }
 0x1b6   : > { %1156 = vrot.lane.b32.xlu0 %v1152_v52, %s2331_s7  ;;  %1200 = vrot.lane.b32.xlu1 %v1195_v23, %s2334_s18  ;;  %v869_v52 = vstv %s2997_s28  ;;  %s3082_s28 = sld [smem:[#allocation6 + $0x48]] }
 0x1b7   : > { %v2955_v27 = vadd.f32 %v778_v24, %v772_v26  ;;  %v871_v23 = vmul.f32 %v869_v52, %v2760_v43 }
 0x1b8   : > { %v2960_v29 = vpop.permute.xlu1 %788  ;;  %v727_v31 = vpop.permute.xlu0 %726 }
 0x1b9   : > { %v731_v41 = vadd.f32 %v727_v31, %v717_v40  ;;  %v794_v24 = vadd.f32 %v2960_v29, %v2955_v27  ;;  %v1335_v27 = vstv %s3009_s30  ;;  %v1286_v40 = vmul.f32 %v1285_v7, %v2995_v6  ;;  %s3097_s30 = sld [smem:[#allocation6 + $0x4a]] }
 0x1ba   : > { %1170 = vrot.lane.b32.xlu0 %v1166_v32, %s2332_s9  ;;  %1214 = vrot.lane.b32.xlu1 %v1209_v33, %s2335_s22  ;;  %v1315_v33 = vmul.f32 %v1313_v28, %v2971_v63 }
 0x1bc   : > { %v805_v36 = vpop.permute.xlu1 %804  ;;  %v741_v37 = vpop.permute.xlu0 %740 }
 0x1bd   : > { %v745_v49 = vadd.f32 %v741_v37, %v731_v41  ;;  %v3026_v37 = vld [vmem:[#allocation4 + $0x22] sm:$0xff] }
 0x1be   : > { %1184 = vrot.lane.b32.xlu0 %v1180_v38, %s2333_s19  ;;  %1228 = vrot.lane.b32.xlu1 %v1223_v39, %s2336_s27  ;;  %v1337_v39 = vmul.f32 %v1335_v27, %v3026_v37 }
 0x1c0   : > { %v819_v44 = vpop.permute.xlu1 %818  ;;  %v755_v45 = vpop.permute.xlu0 %754 }
 0x1c1   : > { %v759_v50 = vadd.f32 %v755_v45, %v745_v49  ;;  %v1300_v49 = vmul.f32 %v1299_v16, %v2995_v6 }
 0x1c2   : > { %1198 = vrot.lane.b32.xlu0 %v1194_v46, %s2334_s18  ;;  %1250 = vrot.lane.b32.xlu1 %v1245_v48, %s2331_s7 }
 0x1c4   : > { %v833_v53 = vpop.permute.xlu1 %832  ;;  %v769_v54 = vpop.permute.xlu0 %768 }
 0x1c5   : > { %v773_v59 = vadd.f32 %v769_v54, %v759_v50  ;;  %v870_v50 = vmul.f32 %v869_v52, %v2769_v47  ;;  %v1363_v54 = vstv %s3031_s8  ;;  %s3108_s8 = sld [smem:[#allocation6 + $0x4b]] }
 0x1c6   : > { %1212 = vrot.lane.b32.xlu0 %v1208_v56, %s2335_s22  ;;  %1264 = vrot.lane.b32.xlu1 %v1259_v20, %s2332_s9 }
 0x1c7   : > { %v781_v60 = vadd.f32 %v779_v58, %v773_v59  ;;  %v1365_v58 = vmul.f32 %v1363_v54, %v3026_v37  ;;  %v1314_v59 = vmul.f32 %v1313_v28, %v2995_v6 }
 0x1c8   : > { %v847_v62 = vpop.permute.xlu1 %846  ;;  %v791_v0 = vpop.permute.xlu0 %790 }
 0x1c9   : > { %v795_v5 = vadd.f32 %v791_v0, %v781_v60  ;;  %v3052_v60 = vld [vmem:[#allocation4 + $0x1a] sm:$0xff] }
 0x1ca   : > { %1278 = vrot.lane.b32.xlu1 %v1273_v1, %s2333_s19  ;;  %1226 = vrot.lane.b32.xlu0 %v1222_v2, %s2336_s27 }
 0x1cb   : > { %v809_v25 = vadd.f32 %v805_v36, %v795_v5  ;;  %v1336_v5 = vmul.f32 %v1335_v27, %v3052_v60 }
 0x1cc   : > { %v861_v8 = vpop.permute.xlu1 %860  ;;  %v803_v9 = vpop.permute.xlu0 %802 }
 0x1cd   : > { %v823_v12 = vadd.f32 %v819_v44, %v809_v25  ;;  %v808_v36 = vadd.f32 %v803_v9, %v794_v24  ;;  %v1349_v44 = vstv %s3022_s4  ;;  %v961_v9 = vstv %s3048_s21  ;;  %s3102_s4 = sld [smem:[#allocation6 + $0x2a]] }
 0x1ce   : > { %1292 = vrot.lane.b32.xlu1 %v1287_v10, %s2334_s18  ;;  %1248 = vrot.lane.b32.xlu0 %v1244_v11, %s2331_s7  ;;  %v1351_v48 = vmul.f32 %v1349_v44, %v3026_v37  ;;  %s3132_s21 = sld [smem:[#allocation6 + $0x4f]] }
 0x1cf   : > { %v837_v15 = vadd.f32 %v833_v53, %v823_v12 }
 0x1d0   : > { %v3011_v17 = vpop.permute.xlu1 %882  ;;  %v817_v18 = vpop.permute.xlu0 %816 }
 0x1d1   : > { %v851_v22 = vadd.f32 %v847_v62, %v837_v15  ;;  %v822_v43 = vadd.f32 %v817_v18, %v808_v36  ;;  %v1377_v62 = vstv %s3038_s13  ;;  %v1350_v15 = vmul.f32 %v1349_v44, %v3052_v60  ;;  %s3115_s13 = sld [smem:[#allocation6 + $0x4c]] }
 0x1d2   : > { %1306 = vrot.lane.b32.xlu1 %v1301_v19, %s2335_s22  ;;  %1262 = vrot.lane.b32.xlu0 %v1258_v3, %s2332_s9  ;;  %v1379_v2 = vmul.f32 %v1377_v62, %v3026_v37  ;;  %v962_v18 = vmul.f32 %v961_v9, %v2806_v4 }
 0x1d3   : > { %v865_v26 = vadd.f32 %v861_v8, %v851_v22  ;;  %v1391_v8 = vstv %s3046_s24  ;;  %v1405_v22 = vstv %s3057_s23  ;;  %s3125_s24 = sld [smem:[#allocation6 + $0x4e]] }
 0x1d4   : > { %v895_v31 = vpop.permute.xlu1 %894  ;;  %v831_v32 = vpop.permute.xlu0 %830  ;;  %v1393_v12 = vmul.f32 %v1391_v8, %v3026_v37  ;;  %v1407_v24 = vmul.f32 %v1405_v22, %v3026_v37  ;;  %v1392_v27 = vmul.f32 %v1391_v8, %v3052_v60  ;;  %s3141_s23 = sld [smem:[#allocation6 + $0x50]] }
 0x1d5   : > { %v873_v35 = vadd.f32 %v871_v23, %v865_v26  ;;  %v836_v41 = vadd.f32 %v831_v32, %v822_v43  ;;  %v1364_v26 = vmul.f32 %v1363_v54, %v3052_v60 }
 0x1d6   : > { %1320 = vrot.lane.b32.xlu1 %v1315_v33, %s2336_s27  ;;  %1276 = vrot.lane.b32.xlu0 %v1272_v21, %s2333_s19  ;;  %v1378_v33 = vmul.f32 %v1377_v62, %v3052_v60 }
 0x1d7   : > { %v887_v19 = vadd.f32 %v3011_v17, %v873_v35 }
 0x1d8   : > { %v909_v29 = vpop.permute.xlu1 %908  ;;  %v845_v38 = vpop.permute.xlu0 %844 }
 0x1d9   : > { %v850_v42 = vadd.f32 %v845_v38, %v836_v41  ;;  %v1427_v38 = vstv %s3076_s26  ;;  %s3147_s26 = sld [smem:[#allocation6 + $0x31]] }
 0x1da   : > { %1342 = vrot.lane.b32.xlu1 %v1337_v39, %s2331_s7  ;;  %1290 = vrot.lane.b32.xlu0 %v1286_v40, %s2334_s18  ;;  %v963_v39 = vmul.f32 %v961_v9, %v2822_v14  ;;  %v3100_v14 = vld [vmem:[#allocation4 + $0x1b] sm:$0xff] }
 0x1dc   : > { %v923_v45 = vpop.permute.xlu1 %922  ;;  %v859_v46 = vpop.permute.xlu0 %858 }
 0x1dd   : > { %v864_v51 = vadd.f32 %v859_v46, %v850_v42  ;;  %v1406_v46 = vmul.f32 %v1405_v22, %v3052_v60 }
 0x1de   : > { %1356 = vrot.lane.b32.xlu1 %v1351_v48, %s2332_s9  ;;  %1304 = vrot.lane.b32.xlu0 %v1300_v49, %s2335_s22  ;;  %v1441_v48 = vstv %s3082_s28  ;;  %s3151_s28 = sld [smem:[#allocation6 + $0x51]] }
 0x1df   : > { %v872_v53 = vadd.f32 %v870_v50, %v864_v51 }
 0x1e0   : > { %v937_v56 = vpop.permute.xlu1 %936  ;;  %v881_v20 = vpop.permute.xlu0 %880 }
 0x1e1   : > { %v886_v47 = vadd.f32 %v881_v20, %v872_v53  ;;  %v1455_v20 = vstv %s3089_s29  ;;  %s3160_s29 = sld [smem:[#allocation6 + $0x52]] }
 0x1e2   : > { %1370 = vrot.lane.b32.xlu1 %v1365_v58, %s2333_s19  ;;  %1318 = vrot.lane.b32.xlu0 %v1314_v59, %s2336_s27 }
 0x1e3   : > { %v900_v61 = vadd.f32 %v895_v31, %v886_v47 }
 0x1e4   : > { %v951_v0 = vpop.permute.xlu1 %950  ;;  %v897_v1 = vpop.permute.xlu0 %896 }
 0x1e5   : > { %v914_v25 = vadd.f32 %v909_v29, %v900_v61  ;;  %v901_v31 = vadd.f32 %v897_v1, %v887_v19  ;;  %v1469_v1 = vstv %s3097_s30  ;;  %s3168_s30 = sld [smem:[#allocation6 + $0x53]] }
 0x1e6   : > { %1384 = vrot.lane.b32.xlu1 %v1379_v2, %s2334_s18  ;;  %1340 = vrot.lane.b32.xlu0 %v1336_v5, %s2331_s7 }
 0x1e7   : > { %v928_v7 = vadd.f32 %v923_v45, %v914_v25  ;;  %v1053_v25 = vstv %s3102_s4  ;;  %s3176_s4 = sld [smem:[#allocation6 + $0x55]] }
 0x1e8   : > { %v3065_v10 = vpop.permute.xlu1 %972  ;;  %v911_v11 = vpop.permute.xlu0 %910 }
 0x1e9   : > { %v942_v16 = vadd.f32 %v937_v56, %v928_v7  ;;  %v915_v4 = vadd.f32 %v911_v11, %v901_v31  ;;  %v1428_v56 = vmul.f32 %v1427_v38, %v3100_v14  ;;  %v1055_v7 = vmul.f32 %v1053_v25, %v2865_v55 }
 0x1ea   : > { %1398 = vrot.lane.b32.xlu1 %v1393_v12, %s2335_s22  ;;  %1354 = vrot.lane.b32.xlu0 %v1350_v15, %s2332_s9  ;;  %v1456_v15 = vmul.f32 %v1455_v20, %v3100_v14 }
 0x1eb   : > { %v956_v3 = vadd.f32 %v951_v0, %v942_v16  ;;  %v1442_v0 = vmul.f32 %v1441_v48, %v3100_v14  ;;  %v1483_v16 = vstv %s3108_s8  ;;  %s3183_s8 = sld [smem:[#allocation6 + $0x56]] }
 0x1ec   : > { %v495_v52 = vpop.permute.xlu1 %494  ;;  %v925_v23 = vpop.permute.xlu0 %924 }
 0x1ed   : > { %v964_v28 = vadd.f32 %v962_v18, %v956_v3  ;;  %497 = vst.msk [vmem:[#allocation4 + $0x2a] sm:$0x1] %vm309_vm3, %v495_v52  ;;  %v929_v21 = vadd.f32 %v925_v23, %v915_v4  ;;  %v1470_v52 = vmul.f32 %v1469_v1, %v3100_v14  ;;  %v1497_v23 = vstv %s3115_s13  ;;  %s3192_s13 = sld [smem:[#allocation6 + $0x57]] }
 0x1ee   : > { %1412 = vrot.lane.b32.xlu1 %v1407_v24, %s2336_s27  ;;  %1368 = vrot.lane.b32.xlu0 %v1364_v26, %s2333_s19 }
 0x1ef   : > { %v978_v8 = vadd.f32 %v3065_v10, %v964_v28 }
 0x1f0   : > { %v989_v17 = vpop.permute.xlu1 %988  ;;  %v939_v32 = vpop.permute.xlu0 %938 }
 0x1f1   : > { %v943_v35 = vadd.f32 %v939_v32, %v929_v21  ;;  %v1484_v32 = vmul.f32 %v1483_v16, %v3100_v14  ;;  %v1054_v21 = vmul.f32 %v1053_v25, %v2891_v57 }
 0x1f2   : > { %1382 = vrot.lane.b32.xlu0 %v1378_v33, %s2334_s18  ;;  %v1519_v33 = vstv %s3125_s24  ;;  %s3198_s24 = sld [smem:[#allocation6 + $0x38]] }
 0x1f4   : > { %v1003_v36 = vpop.permute.xlu1 %1002  ;;  %v953_v43 = vpop.permute.xlu0 %952  ;;  %v3086_v29 = vld [vmem:[#allocation4 + $0x23] sm:$0xff] }
 0x1f5   : > { %v957_v40 = vadd.f32 %v953_v43, %v943_v35  ;;  %v1429_v41 = vmul.f32 %v1427_v38, %v3086_v29  ;;  %v1443_v50 = vmul.f32 %v1441_v48, %v3086_v29  ;;  %v1457_v59 = vmul.f32 %v1455_v20, %v3086_v29  ;;  %v3136_v28 = vld [vmem:[#allocation4 + $0x24] sm:$0xff] }
 0x1f6   : > { %1396 = vrot.lane.b32.xlu0 %v1392_v27, %s2335_s22  ;;  %v1471_v5 = vmul.f32 %v1469_v1, %v3086_v29  ;;  %v1485_v3 = vmul.f32 %v1483_v16, %v3086_v29  ;;  %v1499_v26 = vmul.f32 %v1497_v23, %v3086_v29  ;;  %v1521_v43 = vmul.f32 %v1519_v33, %v3136_v28 }
 0x1f7   : > { %v965_v42 = vadd.f32 %v963_v39, %v957_v40  ;;  %1434 = vrot.lane.b32.xlu1 %v1429_v41, %s2331_s7  ;;  %v1498_v40 = vmul.f32 %v1497_v23, %v3100_v14  ;;  %v1533_v41 = vstv %s3132_s21  ;;  %s3202_s21 = sld [smem:[#allocation6 + $0x58]] }
 0x1f8   : > { %v1017_v44 = vpop.permute.xlu1 %1016  ;;  %v975_v45 = vpop.permute.xlu0 %974 }
 0x1f9   : > { %v979_v49 = vadd.f32 %v975_v45, %v965_v42  ;;  %v1535_v42 = vmul.f32 %v1533_v41, %v3136_v28 }
 0x1fa   : > { %1410 = vrot.lane.b32.xlu0 %v1406_v46, %s2336_s27 }
 0x1fb   : > { %v993_v51 = vadd.f32 %v989_v17, %v979_v49  ;;  %1448 = vrot.lane.b32.xlu1 %v1443_v50, %s2332_s9  ;;  %v1547_v50 = vstv %s3141_s23  ;;  %s3211_s23 = sld [smem:[#allocation6 + $0x59]] }
 0x1fc   : > { %v1031_v53 = vpop.permute.xlu1 %1030  ;;  %v987_v54 = vpop.permute.xlu0 %986 }
 0x1fd   : > { %v1007_v58 = vadd.f32 %v1003_v36, %v993_v51  ;;  %v992_v18 = vadd.f32 %v987_v54, %v978_v8  ;;  %v1575_v8 = vstv %s3160_s29  ;;  %s3234_s29 = sld [smem:[#allocation6 + $0x5d]] }
 0x1fe   : > { %1432 = vrot.lane.b32.xlu0 %v1428_v56, %s2331_s7  ;;  %v1145_v56 = vstv %s3147_s26  ;;  %s3219_s26 = sld [smem:[#allocation6 + $0x5a]] }
 0x1ff   : > { %v1021_v47 = vadd.f32 %v1017_v44, %v1007_v58  ;;  %1462 = vrot.lane.b32.xlu1 %v1457_v59, %s2333_s19  ;;  %v3154_v44 = vld [vmem:[#allocation4 + $0x1c] sm:$0xff] }
 0x200   : > { %v1045_v61 = vpop.permute.xlu1 %1044  ;;  %v1001_v62 = vpop.permute.xlu0 %1000  ;;  %v1520_v49 = vmul.f32 %v1519_v33, %v3154_v44  ;;  %v1534_v59 = vmul.f32 %v1533_v41, %v3154_v44 }
 0x201   : > { %v1035_v2 = vadd.f32 %v1031_v53, %v1021_v47  ;;  %v1006_v55 = vadd.f32 %v1001_v62, %v992_v18  ;;  %v1549_v53 = vmul.f32 %v1547_v50, %v3136_v28  ;;  %v1561_v47 = vstv %s3151_s28  ;;  %s3227_s28 = sld [smem:[#allocation6 + $0x5c]] }
 0x202   : > { %1446 = vrot.lane.b32.xlu0 %v1442_v0, %s2332_s9  ;;  %v1147_v62 = vmul.f32 %v1145_v56, %v2916_v30  ;;  %v1563_v0 = vmul.f32 %v1561_v47, %v3136_v28  ;;  %v1577_v30 = vmul.f32 %v1575_v8, %v3136_v28  ;;  %v1562_v18 = vmul.f32 %v1561_v47, %v3154_v44 }
 0x203   : > { %v1049_v9 = vadd.f32 %v1045_v61, %v1035_v2  ;;  %1476 = vrot.lane.b32.xlu1 %v1471_v5, %s2334_s18 }
 0x204   : > { %v1067_v11 = vpop.permute.xlu1 %1066  ;;  %v1015_v12 = vpop.permute.xlu0 %1014 }
 0x205   : > { %v1057_v19 = vadd.f32 %v1055_v7, %v1049_v9  ;;  %v1020_v24 = vadd.f32 %v1015_v12, %v1006_v55  ;;  %v1548_v7 = vmul.f32 %v1547_v50, %v3154_v44  ;;  %v1237_v50 = vstv %s3198_s24  ;;  %s3270_s24 = sld [smem:[#allocation6 + $0x61]] }
 0x206   : > { %1460 = vrot.lane.b32.xlu0 %v1456_v15, %s2333_s19 }
 0x207   : > { %1490 = vrot.lane.b32.xlu1 %v1485_v3, %s2335_s22  ;;  %v1071_v35 = vadd.f32 %v1067_v11, %v1057_v19  ;;  %v1589_v19 = vstv %s3168_s30  ;;  %s3243_s30 = sld [smem:[#allocation6 + $0x5e]] }
 0x208   : > { %v1081_v10 = vpop.permute.xlu1 %1080  ;;  %v1029_v22 = vpop.permute.xlu0 %1028 }
 0x209   : > { %v1034_v31 = vadd.f32 %v1029_v22, %v1020_v24  ;;  %v1085_v57 = vadd.f32 %v1081_v10, %v1071_v35  ;;  %v1591_v10 = vmul.f32 %v1589_v19, %v3136_v28  ;;  %v3187_v22 = vld [vmem:[#allocation4 + $0x25] sm:$0xff] }
 0x20a   : > { %1474 = vrot.lane.b32.xlu0 %v1470_v52, %s2334_s18 }
 0x20b   : > { %1504 = vrot.lane.b32.xlu1 %v1499_v26, %s2336_s27  ;;  %v1576_v26 = vmul.f32 %v1575_v8, %v3154_v44 }
 0x20c   : > { %v1095_v4 = vpop.permute.xlu1 %1094  ;;  %v1043_v17 = vpop.permute.xlu0 %1042 }
 0x20d   : > { %v1048_v36 = vadd.f32 %v1043_v17, %v1034_v31  ;;  %v1099_v45 = vadd.f32 %v1095_v4, %v1085_v57  ;;  %v1611_v31 = vstv %s3176_s4  ;;  %v1146_v17 = vmul.f32 %v1145_v56, %v2942_v13  ;;  %s3249_s4 = sld [smem:[#allocation6 + $0x3f]] }
 0x20e   : > { %1488 = vrot.lane.b32.xlu0 %v1484_v32, %s2335_s22  ;;  %v1613_v33 = vmul.f32 %v1611_v31, %v3187_v22  ;;  %v1653_v56 = vstv %s3202_s21  ;;  %s2338_s21 = smov 32  }
 0x20f   : > { %v1056_v27 = vadd.f32 %v1054_v21, %v1048_v36  ;;  %1526 = vrot.lane.b32.xlu1 %v1521_v43, %s2331_s7  ;;  %v1590_v43 = vmul.f32 %v1589_v19, %v3154_v44  ;;  %v1655_v47 = vmul.f32 %v1653_v56, %v3187_v22  ;;  %v1703_v19 = vstv %s3227_s28  ;;  %s2341_s28 = smov 80  }
 0x210   : > { %v1109_v38 = vpop.permute.xlu1 %1108  ;;  %v1065_v39 = vpop.permute.xlu0 %1064 }
 0x211   : > { %v1113_v51 = vadd.f32 %v1109_v38, %v1099_v45  ;;  %v1070_v1 = vadd.f32 %v1065_v39, %v1056_v27  ;;  %v1625_v27 = vstv %s3183_s8  ;;  %v1639_v45 = vstv %s3192_s13  ;;  %s3253_s8 = sld [smem:[#allocation6 + $0x5f]] }
 0x212   : > { %1502 = vrot.lane.b32.xlu0 %v1498_v40, %s2336_s27  ;;  %v1627_v39 = vmul.f32 %v1625_v27, %v3187_v22  ;;  %v3205_v40 = vld [vmem:[#allocation4 + $0x1d] sm:$0xff]  ;;  %s3262_s13 = sld [smem:[#allocation6 + $0x60]] }
 0x213   : > { %1540 = vrot.lane.b32.xlu1 %v1535_v42, %s2332_s9  ;;  %v1612_v42 = vmul.f32 %v1611_v31, %v3205_v40  ;;  %v1654_v8 = vmul.f32 %v1653_v56, %v3205_v40 }
 0x214   : > { %v1123_v46 = vpop.permute.xlu1 %1122  ;;  %v1079_v48 = vpop.permute.xlu0 %1078 }
 0x215   : > { %v1127_v54 = vadd.f32 %v1123_v46, %v1113_v51  ;;  %v1084_v9 = vadd.f32 %v1079_v48, %v1070_v1  ;;  %v1641_v48 = vmul.f32 %v1639_v45, %v3187_v22  ;;  %v1640_v1 = vmul.f32 %v1639_v45, %v3205_v40 }
 0x216   : > { %1524 = vrot.lane.b32.xlu0 %v1520_v49, %s2331_s7 }
 0x217   : > { %1554 = vrot.lane.b32.xlu1 %v1549_v53, %s2333_s19  ;;  %v1745_v45 = vstv %s3253_s8  ;;  %s201_s8 = scalar_lea.vmem [#allocation11], %s2007_s11 }
 0x218   : > { %v1137_v20 = vpop.permute.xlu1 %1136  ;;  %v1093_v58 = vpop.permute.xlu0 %1092 }
 0x219   : > { %v1141_v61 = vadd.f32 %v1137_v20, %v1127_v54  ;;  %v1098_v12 = vadd.f32 %v1093_v58, %v1084_v9  ;;  %v1626_v54 = vmul.f32 %v1625_v27, %v3205_v40  ;;  %v1239_v20 = vmul.f32 %v1237_v50, %v2971_v63 }
 0x21a   : > { %1538 = vrot.lane.b32.xlu0 %v1534_v59, %s2332_s9  ;;  %v1681_v9 = vstv %s3219_s26  ;;  %s2340_s26 = smov 64  }
 0x21b   : > { %v1149_v2 = vadd.f32 %v1147_v62, %v1141_v61  ;;  %1568 = vrot.lane.b32.xlu1 %v1563_v0, %s2334_s18  ;;  %v1682_v31 = vmul.f32 %v1681_v9, %v3205_v40 }
 0x21c   : > { %v1159_v5 = vpop.permute.xlu1 %1158  ;;  %v1107_v25 = vpop.permute.xlu0 %1106 }
 0x21d   : > { %v1163_v11 = vadd.f32 %v1159_v5, %v1149_v2  ;;  %v1112_v3 = vadd.f32 %v1107_v25, %v1098_v12  ;;  %v1667_v2 = vstv %s3211_s23  ;;  %s2339_s23 = smov 48  }
 0x21e   : > { %1552 = vrot.lane.b32.xlu0 %v1548_v7, %s2333_s19  ;;  %v1669_v63 = vmul.f32 %v1667_v2, %v3187_v22 }
 0x21f   : > { %1582 = vrot.lane.b32.xlu1 %v1577_v30, %s2335_s22  ;;  %v3238_v30 = vld [vmem:[#allocation4 + $0x26] sm:$0xff] }
 0x220   : > { %v1173_v15 = vpop.permute.xlu1 %1172  ;;  %v1121_v16 = vpop.permute.xlu0 %1120 }
 0x221   : > { %v1177_v55 = vadd.f32 %v1173_v15, %v1163_v11  ;;  %v1126_v52 = vadd.f32 %v1121_v16, %v1112_v3  ;;  %v1683_v11 = vmul.f32 %v1681_v9, %v3187_v22  ;;  %v1238_v3 = vmul.f32 %v1237_v50, %v2995_v6 }
 0x222   : > { %1566 = vrot.lane.b32.xlu0 %v1562_v18, %s2334_s18  ;;  %v1668_v18 = vmul.f32 %v1667_v2, %v3205_v40 }
 0x223   : > { %1596 = vrot.lane.b32.xlu1 %v1591_v10, %s2336_s27  ;;  %v1705_v10 = vmul.f32 %v1703_v19, %v3238_v30 }
 0x224   : > { %v1187_v23 = vpop.permute.xlu1 %1186  ;;  %v1135_v24 = vpop.permute.xlu0 %1134 }
 0x225   : > { %v1191_v4 = vadd.f32 %v1187_v23, %v1177_v55  ;;  %v1140_v32 = vadd.f32 %v1135_v24, %v1126_v52 }
 0x226   : > { %1580 = vrot.lane.b32.xlu0 %v1576_v26, %s2335_s22 }
 0x227   : > { %v1148_v21 = vadd.f32 %v1146_v17, %v1140_v32  ;;  %1618 = vrot.lane.b32.xlu1 %v1613_v33, %s2331_s7  ;;  %v3256_v32 = vld [vmem:[#allocation4 + $0x1e] sm:$0xff] }
 0x228   : > { %v1201_v35 = vpop.permute.xlu1 %1200  ;;  %v1157_v36 = vpop.permute.xlu0 %1156 }
 0x229   : > { %v1205_v38 = vadd.f32 %v1201_v35, %v1191_v4  ;;  %v1162_v13 = vadd.f32 %v1157_v36, %v1148_v21  ;;  %v1717_v4 = vstv %s3234_s29  ;;  %v1704_v36 = vmul.f32 %v1703_v19, %v3256_v32  ;;  %s2342_s29 = smov 96  }
 0x22a   : > { %1594 = vrot.lane.b32.xlu0 %v1590_v43, %s2336_s27  ;;  %v1719_v17 = vmul.f32 %v1717_v4, %v3238_v30  ;;  %v1731_v43 = vstv %s3243_s30  ;;  %s2343_s30 = smov 112  }
 0x22b   : > { %1632 = vrot.lane.b32.xlu1 %v1627_v39, %s2332_s9  ;;  %v1329_v39 = vstv %s3249_s4  ;;  %v1732_v56 = vmul.f32 %v1731_v43, %v3256_v32  ;;  %s2114_s4 = sshll.u32 %s2389_s1, 7 }
 0x22c   : > { %v1215_v41 = vpop.permute.xlu1 %1214  ;;  %v1171_v57 = vpop.permute.xlu0 %1170 }
 0x22d   : > { %v1176_v46 = vadd.f32 %v1171_v57, %v1162_v13  ;;  %v1219_v49 = vadd.f32 %v1215_v41, %v1205_v38  ;;  %v1733_v38 = vmul.f32 %v1731_v43, %v3238_v30 }
 0x22e   : > { %1616 = vrot.lane.b32.xlu0 %v1612_v42, %s2331_s7  ;;  %v1718_v42 = vmul.f32 %v1717_v4, %v3256_v32 }
 0x22f   : > { %1646 = vrot.lane.b32.xlu1 %v1641_v48, %s2333_s19  ;;  %v1331_v48 = vmul.f32 %v1329_v39, %v3026_v37 }
 0x230   : > { %v1229_v51 = vpop.permute.xlu1 %1228  ;;  %v1185_v53 = vpop.permute.xlu0 %1184 }
 0x231   : > { %v1233_v58 = vadd.f32 %v1229_v51, %v1219_v49  ;;  %v1190_v59 = vadd.f32 %v1185_v53, %v1176_v46  ;;  %v1747_v49 = vmul.f32 %v1745_v45, %v3238_v30 }
 0x232   : > { %1630 = vrot.lane.b32.xlu0 %v1626_v54, %s2332_s9 }
 0x233   : > { %v1241_v61 = vadd.f32 %v1239_v20, %v1233_v58  ;;  %1660 = vrot.lane.b32.xlu1 %v1655_v47, %s2334_s18  ;;  %v1759_v20 = vstv %s3262_s13  ;;  %s1916_s13 = sshll.u32 %s201_s8, 4  ;;  %s1917_s13 = int_to_ptr.vmem [resolvable:$true] %s1916_s13 }
 0x234   : > { %v1251_v62 = vpop.permute.xlu1 %1250  ;;  %v1199_v0 = vpop.permute.xlu0 %1198 }
 0x235   : > { %v1204_v5 = vadd.f32 %v1199_v0, %v1190_v59  ;;  %v1255_v52 = vadd.f32 %v1251_v62, %v1241_v61  ;;  %v1761_v59 = vmul.f32 %v1759_v20, %v3238_v30  ;;  %v1746_v62 = vmul.f32 %v1745_v45, %v3256_v32 }
 0x236   : > { %1644 = vrot.lane.b32.xlu0 %v1640_v1, %s2333_s19  ;;  %v1773_v0 = vstv %s3270_s24 }
 0x237   : > { %1674 = vrot.lane.b32.xlu1 %v1669_v63, %s2335_s22  ;;  %v1775_v2 = vmul.f32 %v1773_v0, %v3238_v30 }
 0x238   : > { %v1265_v25 = vpop.permute.xlu1 %1264  ;;  %v1213_v7 = vpop.permute.xlu0 %1212 }
 0x239   : > { %v1218_v12 = vadd.f32 %v1213_v7, %v1204_v5  ;;  %v1269_v6 = vadd.f32 %v1265_v25, %v1255_v52  ;;  %v1760_v7 = vmul.f32 %v1759_v20, %v3256_v32 }
 0x23a   : > { %1658 = vrot.lane.b32.xlu0 %v1654_v8, %s2334_s18  ;;  %v1330_v8 = vmul.f32 %v1329_v39, %v3052_v60 }
 0x23b   : > { %1688 = vrot.lane.b32.xlu1 %v1683_v11, %s2336_s27 }
 0x23c   : > { %v1279_v15 = vpop.permute.xlu1 %1278  ;;  %v1227_v16 = vpop.permute.xlu0 %1226 }
 0x23d   : > { %v1232_v55 = vadd.f32 %v1227_v16, %v1218_v12  ;;  %v1283_v33 = vadd.f32 %v1279_v15, %v1269_v6 }
 0x23e   : > { %1672 = vrot.lane.b32.xlu0 %v1668_v18, %s2335_s22  ;;  %v1774_v18 = vmul.f32 %v1773_v0, %v3256_v32 }
 0x23f   : > { %v1240_v23 = vadd.f32 %v1238_v3, %v1232_v55  ;;  %1710 = vrot.lane.b32.xlu1 %v1705_v10, %s2331_s7 }
 0x240   : > { %v1293_v24 = vpop.permute.xlu1 %1292  ;;  %v1249_v26 = vpop.permute.xlu0 %1248 }
 0x241   : > { %v1297_v27 = vadd.f32 %v1293_v24, %v1283_v33  ;;  %v1254_v50 = vadd.f32 %v1249_v26, %v1240_v23 }
 0x242   : > { %1686 = vrot.lane.b32.xlu0 %v1682_v31, %s2336_s27 }
 0x243   : > { %1724 = vrot.lane.b32.xlu1 %v1719_v17, %s2332_s9 }
 0x244   : > { %v1307_v21 = vpop.permute.xlu1 %1306  ;;  %v1263_v35 = vpop.permute.xlu0 %1262 }
 0x245   : > { %v1311_v13 = vadd.f32 %v1307_v21, %v1297_v27  ;;  %v1268_v58 = vadd.f32 %v1263_v35, %v1254_v50 }
 0x246   : > { %1708 = vrot.lane.b32.xlu0 %v1704_v36, %s2331_s7  ;;  %s2078_s7 = sld [smem:[#allocation6 + $0x46]] }
 0x247   : > { %1738 = vrot.lane.b32.xlu1 %v1733_v38, %s2333_s19 }
 0x248   : > { %v1321_v41 = vpop.permute.xlu1 %1320  ;;  %v1277_v57 = vpop.permute.xlu0 %1276 }
 0x249   : > { %v1325_v46 = vadd.f32 %v1321_v41, %v1311_v13  ;;  %v1282_v37 = vadd.f32 %v1277_v57, %v1268_v58 }
 0x24a   : > { %1722 = vrot.lane.b32.xlu0 %v1718_v42, %s2332_s9  ;;  %s2085_s9 = sld [smem:[#allocation6 + $0x4d]] }
 0x24b   : > { %v1333_v51 = vadd.f32 %v1331_v48, %v1325_v46  ;;  %1752 = vrot.lane.b32.xlu1 %v1747_v49, %s2334_s18 }
 0x24c   : > { %v1343_v53 = vpop.permute.xlu1 %1342  ;;  %v1291_v54 = vpop.permute.xlu0 %1290  ;;  %v1421_v26 = vstv %s2078_s7 }
 0x24d   : > { %v1296_v1 = vadd.f32 %v1291_v54, %v1282_v37  ;;  %v1347_v11 = vadd.f32 %v1343_v53, %v1333_v51  ;;  %v1423_v4 = vmul.f32 %v1421_v26, %v3086_v29  ;;  %v1422_v57 = vmul.f32 %v1421_v26, %v3100_v14 }
 0x24e   : > { %1736 = vrot.lane.b32.xlu0 %v1732_v56, %s2333_s19  ;;  %s2092_s19 = sld [smem:[#allocation6 + $0x54]] }
 0x24f   : > { %1766 = vrot.lane.b32.xlu1 %v1761_v59, %s2335_s22 }
 0x250   : > { %v1357_v47 = vpop.permute.xlu1 %1356  ;;  %v1305_v61 = vpop.permute.xlu0 %1304 }
 0x251   : > { %v1310_v5 = vadd.f32 %v1305_v61, %v1296_v1  ;;  %v1361_v19 = vadd.f32 %v1357_v47, %v1347_v11  ;;  %v1513_v61 = vstv %s2085_s9  ;;  %s1914_s9 = scalar_lea.hbm %s3342_s3, %s2114_s4 }
 0x252   : > { %1750 = vrot.lane.b32.xlu0 %v1746_v62, %s2334_s18  ;;  %v1515_v14 = vmul.f32 %v1513_v61, %v3136_v28  ;;  %v1514_v11 = vmul.f32 %v1513_v61, %v3154_v44  ;;  %s2099_s18 = sld [smem:[#allocation6 + $0x5b]] }
 0x253   : > { %1780 = vrot.lane.b32.xlu1 %v1775_v2, %s2336_s27 }
 0x254   : > { %v1371_v63 = vpop.permute.xlu1 %1370  ;;  %v1319_v25 = vpop.permute.xlu0 %1318 }
 0x255   : > { %v1324_v9 = vadd.f32 %v1319_v25, %v1310_v5  ;;  %v1375_v3 = vadd.f32 %v1371_v63, %v1361_v19 }
 0x256   : > { %1764 = vrot.lane.b32.xlu0 %v1760_v7, %s2335_s22  ;;  %s1786_s22 = sld [smem:[#allocation5]] }
 0x257   : > { %v1332_v12 = vadd.f32 %v1330_v8, %v1324_v9 }
 0x258   : > { %v1385_v15 = vpop.permute.xlu1 %1384  ;;  %v1341_v16 = vpop.permute.xlu0 %1340 }
 0x259   : > { %v1389_v52 = vadd.f32 %v1385_v15, %v1375_v3  ;;  %v1346_v6 = vadd.f32 %v1341_v16, %v1332_v12 }
 0x25a   : > { %1778 = vrot.lane.b32.xlu0 %v1774_v18, %s2336_s27  ;;  %s2337_s27 = smov 16  }
 0x25c   : > { %v1399_v55 = vpop.permute.xlu1 %1398  ;;  %v1355_v10 = vpop.permute.xlu0 %1354 }
 0x25d   : > { %v1403_v23 = vadd.f32 %v1399_v55, %v1389_v52  ;;  %v1360_v21 = vadd.f32 %v1355_v10, %v1346_v6  ;;  %v1605_v6 = vstv %s2092_s19  ;;  %s1902_s19 = scalar_lea.sflag [#allocation8], %s2491_s10 }
 0x25e   : > { %v1607_v44 = vmul.f32 %v1605_v6, %v3187_v22 }
 0x260   : > { %v1413_v24 = vpop.permute.xlu1 %1412  ;;  %v1369_v60 = vpop.permute.xlu0 %1368 }
 0x261   : > { %v1417_v31 = vadd.f32 %v1413_v24, %v1403_v23  ;;  %v1374_v35 = vadd.f32 %v1369_v60, %v1360_v21 }
 0x263   : > { %v1425_v17 = vadd.f32 %v1423_v4, %v1417_v31 }
 0x264   : > { %v1383_v33 = vpop.permute.xlu0 %1382 }
 0x265   : > { %v1388_v43 = vadd.f32 %v1383_v33, %v1374_v35 }
 0x268   : > { %v1397_v36 = vpop.permute.xlu0 %1396 }
 0x269   : > { %v1435_v27 = vpop.permute.xlu1 %1434  ;;  %v1402_v38 = vadd.f32 %v1397_v36, %v1388_v43 }
 0x26a   : > { %v1439_v48 = vadd.f32 %v1435_v27, %v1425_v17 }
 0x26c   : > { %v1411_v13 = vpop.permute.xlu0 %1410 }
 0x26d   : > { %v1416_v39 = vadd.f32 %v1411_v13, %v1402_v38  ;;  %v1449_v41 = vpop.permute.xlu1 %1448 }
 0x26e   : > { %v1453_v50 = vadd.f32 %v1449_v41, %v1439_v48  ;;  %v1606_v41 = vmul.f32 %v1605_v6, %v3205_v40 }
 0x26f   : > { %v1424_v42 = vadd.f32 %v1422_v57, %v1416_v39 }
 0x270   : > { %v1433_v45 = vpop.permute.xlu0 %1432 }
 0x271   : > { %v1463_v46 = vpop.permute.xlu1 %1462  ;;  %v1438_v20 = vadd.f32 %v1433_v45, %v1424_v42 }
 0x272   : > { %v1467_v51 = vadd.f32 %v1463_v46, %v1453_v50 }
 0x274   : > { %v1447_v49 = vpop.permute.xlu0 %1446 }
 0x275   : > { %v1477_v29 = vpop.permute.xlu1 %1476  ;;  %v1452_v37 = vadd.f32 %v1447_v49, %v1438_v20 }
 0x276   : > { %v1481_v56 = vadd.f32 %v1477_v29, %v1467_v51 }
 0x278   : > { %v1461_v53 = vpop.permute.xlu0 %1460 }
 0x279   : > { %v1491_v54 = vpop.permute.xlu1 %1490  ;;  %v1466_v0 = vadd.f32 %v1461_v53, %v1452_v37  ;;  %v1697_v37 = vstv %s2099_s18  ;;  %s2248_s18 = scalar_lea.vmem %s1917_s13, 128 }
 0x27a   : > { %v1495_v58 = vadd.f32 %v1491_v54, %v1481_v56  ;;  %v1699_v40 = vmul.f32 %v1697_v37, %v3238_v30  ;;  %p2249_p8 = scmp.ne.s32.totalorder %s1917_s13, %s2248_s18 }
 0x27c   : > { %v1475_v59 = vpop.permute.xlu0 %1474  ;;  %p2250_p11 = pnand %p2249_p8, %p3359_p9 }
 0x27d   : > { %v1505_v47 = vpop.permute.xlu1 %1504  ;;  %v1480_v5 = vadd.f32 %v1475_v59, %v1466_v0 }
 0x27e   : > { %v1509_v62 = vadd.f32 %v1505_v47, %v1495_v58  ;;  %p2251_p13 = pneg %p2250_p11 }
 0x280   : > { %v1489_v1 = vpop.permute.xlu0 %1488  ;;  %v1517_v2 = vadd.f32 %v1515_v14, %v1509_v62 }
 0x281   : > { %v1527_v63 = vpop.permute.xlu1 %1526  ;;  %v1494_v25 = vadd.f32 %v1489_v1, %v1480_v5 }
 0x282   : > { %v1531_v18 = vadd.f32 %v1527_v63, %v1517_v2 }
 0x284   : > { %v1503_v7 = vpop.permute.xlu0 %1502 }
 0x285   : > { %v1508_v8 = vadd.f32 %v1503_v7, %v1494_v25  ;;  %v1541_v9 = vpop.permute.xlu1 %1540  ;;  %v1698_v7 = vmul.f32 %v1697_v37, %v3256_v32 }
 0x286   : > { %v1545_v55 = vadd.f32 %v1541_v9, %v1531_v18 }
 0x287   : > { %v1516_v12 = vadd.f32 %v1514_v11, %v1508_v8 }
 0x288   : > { %v1525_v15 = vpop.permute.xlu0 %1524 }
 0x289   : > { %v1555_v16 = vpop.permute.xlu1 %1554  ;;  %v1530_v24 = vadd.f32 %v1525_v15, %v1516_v12 }
 0x28a   : > { %v1559_v28 = vadd.f32 %v1555_v16, %v1545_v55 }
 0x28c   : > { %v1539_v19 = vpop.permute.xlu0 %1538 }
 0x28d   : > { %v1569_v3 = vpop.permute.xlu1 %1568  ;;  %v1544_v31 = vadd.f32 %v1539_v19, %v1530_v24  ;;  %v1787_v24 = vstv %s1786_s22  ;;  %s2344_s22 = smov [#allocation11]  }
 0x28e   : > { %v1573_v23 = vadd.f32 %v1569_v3, %v1559_v28 }
 0x290   : > { %v1553_v10 = vpop.permute.xlu0 %1552 }
 0x291   : > { %v1583_v52 = vpop.permute.xlu1 %1582  ;;  %v1558_v33 = vadd.f32 %v1553_v10, %v1544_v31 }
 0x292   : > { %v1587_v60 = vadd.f32 %v1583_v52, %v1573_v23 }
 0x294   : > { %v1567_v26 = vpop.permute.xlu0 %1566 }
 0x295   : > { %v1597_v4 = vpop.permute.xlu1 %1596  ;;  %v1572_v36 = vadd.f32 %v1567_v26, %v1558_v33 }
 0x296   : > { %v1601_v17 = vadd.f32 %v1597_v4, %v1587_v60 }
 0x298   : > { %v1581_v21 = vpop.permute.xlu0 %1580  ;;  %v1609_v35 = vadd.f32 %v1607_v44, %v1601_v17 }
 0x299   : > { %v1619_v43 = vpop.permute.xlu1 %1618  ;;  %v1586_v27 = vadd.f32 %v1581_v21, %v1572_v36 }
 0x29a   : > { %v1623_v46 = vadd.f32 %v1619_v43, %v1609_v35 }
 0x29c   : > { %v1595_v38 = vpop.permute.xlu0 %1594 }
 0x29d   : > { %v1600_v13 = vadd.f32 %v1595_v38, %v1586_v27  ;;  %v1633_v39 = vpop.permute.xlu1 %1632 }
 0x29e   : > { %v1637_v29 = vadd.f32 %v1633_v39, %v1623_v46 }
 0x29f   : > { %v1608_v57 = vadd.f32 %v1606_v41, %v1600_v13 }
 0x2a0   : > { %v1617_v42 = vpop.permute.xlu0 %1616 }
 0x2a1   : > { %v1647_v45 = vpop.permute.xlu1 %1646  ;;  %v1622_v54 = vadd.f32 %v1617_v42, %v1608_v57 }
 0x2a2   : > { %v1651_v22 = vadd.f32 %v1647_v45, %v1637_v29 }
 0x2a4   : > { %v1631_v48 = vpop.permute.xlu0 %1630 }
 0x2a5   : > { %v1661_v49 = vpop.permute.xlu1 %1660  ;;  %v1636_v58 = vadd.f32 %v1631_v48, %v1622_v54 }
 0x2a6   : > { %v1665_v53 = vadd.f32 %v1661_v49, %v1651_v22 }
 0x2a8   : > { %v1645_v50 = vpop.permute.xlu0 %1644 }
 0x2a9   : > { %v1675_v51 = vpop.permute.xlu1 %1674  ;;  %v1650_v61 = vadd.f32 %v1645_v50, %v1636_v58 }
 0x2aa   : > { %v1679_v56 = vadd.f32 %v1675_v51, %v1665_v53 }
 0x2ac   : > { %v1659_v20 = vpop.permute.xlu0 %1658 }
 0x2ad   : > { %v1689_v59 = vpop.permute.xlu1 %1688  ;;  %v1664_v0 = vadd.f32 %v1659_v20, %v1650_v61 }
 0x2ae   : > { %v1693_v47 = vadd.f32 %v1689_v59, %v1679_v56 }
 0x2b0   : > { %v1673_v62 = vpop.permute.xlu0 %1672  ;;  %v1701_v14 = vadd.f32 %v1699_v40, %v1693_v47 }
 0x2b1   : > { %v1711_v1 = vpop.permute.xlu1 %1710  ;;  %v1678_v2 = vadd.f32 %v1673_v62, %v1664_v0 }
 0x2b2   : > { %v1715_v12 = vadd.f32 %v1711_v1, %v1701_v14 }
 0x2b4   : > { %v1687_v5 = vpop.permute.xlu0 %1686 }
 0x2b5   : > { %v1692_v63 = vadd.f32 %v1687_v5, %v1678_v2  ;;  %v1725_v25 = vpop.permute.xlu1 %1724 }
 0x2b6   : > { %v1729_v18 = vadd.f32 %v1725_v25, %v1715_v12  ;;  %v1891_v12 = vsub.s32 0, %v2510_v34 }
 0x2b7   : > { %v1700_v8 = vadd.f32 %v1698_v7, %v1692_v63 }
 0x2b8   : > { %v1709_v9 = vpop.permute.xlu0 %1708 }
 0x2b9   : > { %v1739_v11 = vpop.permute.xlu1 %1738  ;;  %v1714_v28 = vadd.f32 %v1709_v9, %v1700_v8 }
 0x2ba   : > { %v1743_v30 = vadd.f32 %v1739_v11, %v1729_v18 }
 0x2bc   : > { %v1723_v15 = vpop.permute.xlu0 %1722 }
 0x2bd   : > { %v1753_v16 = vpop.permute.xlu1 %1752  ;;  %v1728_v23 = vadd.f32 %v1723_v15, %v1714_v28  ;;  %v1895_v15 = vsub.s32 1, %v2510_v34 }
 0x2be   : > { %v1757_v55 = vadd.f32 %v1753_v16, %v1743_v30 }
 0x2c0   : > { %v1737_v19 = vpop.permute.xlu0 %1736 }
 0x2c1   : > { %v1767_v3 = vpop.permute.xlu1 %1766  ;;  %v1742_v32 = vadd.f32 %v1737_v19, %v1728_v23  ;;  %v1887_v19 = vld [vmem:[%s2497_s12] sm:$0xff]  ;;  %s2252_s12 = sshll.u32 %s2344_s22, 4  ;;  %s2253_s12 = int_to_ptr.vmem [resolvable:$false] %s2252_s12 }
 0x2c2   : > { %v1771_v10 = vadd.f32 %v1767_v3, %v1757_v55  ;;  %s2254_s1 = scalar_lea.vmem %s2253_s12, 256  ;;  %p2255_p2 = scmp.lt.s32.totalorder %s1917_s13, %s2253_s12 }
 0x2c3   : > { %p2256_p1 = scmp.lt.s32.totalorder %s2254_s1, %s2248_s18 }
 0x2c4   : > { %v1751_v52 = vpop.permute.xlu0 %1750 }
 0x2c5   : > { %v1781_v60 = vpop.permute.xlu1 %1780  ;;  %v1756_v6 = vadd.f32 %v1751_v52, %v1742_v32  ;;  %p2257_p0 = por %p2256_p1, %p2255_p2 }
 0x2c6   : > { %v1785_v26 = vadd.f32 %v1781_v60, %v1771_v10 }
 0x2c7   : > { %p2258_p3 = pnand %p2257_p0, %p2251_p13 }
 0x2c8   : > { %v1789_v31 = vadd.f32 %v1787_v24, %v1785_v26  ;;  %v1765_v4 = vpop.permute.xlu0 %1764 }
 0x2c9   : > { %v1770_v44 = vadd.f32 %v1765_v4, %v1756_v6 }
 0x2ca   : > { %v2107_v17 = vclamps-f32 %v1789_v31, 30.0 }
 0x2cc   : > { %v1795_v33 = vsub.f32 0.0, %v2107_v17  ;;  %v1779_v21 = vpop.permute.xlu0 %1778 }
 0x2cd   : > { %v1784_v35 = vadd.f32 %v1779_v21, %v1770_v44 }
 0x2ce   : > { %v1798_v36 = vmul.f32 1.442695, %v1795_v33 }
 0x2cf   : > { %v1788_v43 = vadd.f32 %v1787_v24, %v1784_v35 }
 0x2d0   : > { %2197 = vpow2.f32 %v1798_v36 }
 0x2d1   : > { %v2106_v27 = vclamps-f32 %v1788_v43, 30.0 }
 0x2d3   : > { %v1794_v38 = vsub.f32 0.0, %v2106_v27 }
 0x2d5   : > { %v1796_v13 = vmul.f32 1.442695, %v1794_v38 }
 0x2d7   : > { %2199 = vpow2.f32 %v1796_v13 }
 0x2dd   : > { %v2198_v39 = vpop.eup %2197 }
 0x2de   : > { %v1801_v41 = vadd.f32 1.0, %v2198_v39 }
 0x2e0   : > { %2201 = vrcp.f32 %v1801_v41 }
 0x2e4   : > { %v2200_v57 = vpop.eup %2199 }
 0x2e5   : > { %v1800_v42 = vadd.f32 1.0, %v2200_v57 }
 0x2e7   : > { %2203 = vrcp.f32 %v1800_v42 }
 0x2ed   : > { %v2202_v45 = vpop.eup %2201 }
 0x2ee   : > { %v1851_v46 = vrot.slane %v2202_v45, 1  ;;  %1849 = vst.msk [vmem:[#allocation2 + $0x8] sm:$0x1] %vm1804_vm4, %v2202_v45  ;;  %v1856_v48 = vrot.slane %v2202_v45, 2  ;;  %v1861_v22 = vrot.slane %v2202_v45, 3  ;;  %v1866_v51 = vrot.slane %v2202_v45, 4 }
 0x2ef   : > { %v1871_v54 = vrot.slane %v2202_v45, 5  ;;  %v1876_v20 = vrot.slane %v2202_v45, 6  ;;  %v1881_v59 = vrot.slane %v2202_v45, 7 }
 0x2f0   : > { %1852 = vrot.lane.b32.xlu1 %v1851_v46, %s2337_s27 }
 0x2f4   : > { %v2204_v49 = vpop.eup %2203  ;;  %1857 = vrot.lane.b32.xlu1 %v1856_v48, %s2338_s21 }
 0x2f5   : > { %v1807_v29 = vrot.slane %v2204_v49, 1  ;;  %1805 = vst.msk [vmem:[#allocation2] sm:$0x1] %vm1804_vm4, %v2204_v49  ;;  %v1813_v50 = vrot.slane %v2204_v49, 2  ;;  %v1819_v53 = vrot.slane %v2204_v49, 3  ;;  %v1825_v56 = vrot.slane %v2204_v49, 4 }
 0x2f6   : > { %v1831_v58 = vrot.slane %v2204_v49, 5  ;;  %v1837_v37 = vrot.slane %v2204_v49, 6  ;;  %v1843_v47 = vrot.slane %v2204_v49, 7 }
 0x2f7   : > { %1808 = vrot.lane.b32.xlu0 %v1807_v29, %s2337_s27 }
 0x2f8   : > { %1862 = vrot.lane.b32.xlu1 %v1861_v22, %s2339_s23 }
 0x2fb   : > { %1814 = vrot.lane.b32.xlu0 %v1813_v50, %s2338_s21 }
 0x2fc   : > { %1867 = vrot.lane.b32.xlu1 %v1866_v51, %s2340_s26 }
 0x2ff   : > { %1820 = vrot.lane.b32.xlu0 %v1819_v53, %s2339_s23 }
 0x300   : > { %1872 = vrot.lane.b32.xlu1 %v1871_v54, %s2341_s28 }
 0x303   : > { %1826 = vrot.lane.b32.xlu0 %v1825_v56, %s2340_s26 }
 0x304   : > { %1877 = vrot.lane.b32.xlu1 %v1876_v20, %s2342_s29 }
 0x307   : > { %1832 = vrot.lane.b32.xlu0 %v1831_v58, %s2341_s28 }
 0x308   : > { %1882 = vrot.lane.b32.xlu1 %v1881_v59, %s2343_s30 }
 0x30b   : > { %1838 = vrot.lane.b32.xlu0 %v1837_v37, %s2342_s29 }
 0x30f   : > { %1844 = vrot.lane.b32.xlu0 %v1843_v47, %s2343_s30 }
 0x362   : > { %v1853_v40 = vpop.permute.xlu1 %1852 }
 0x363   : > { %1855 = vst.msk [vmem:[#allocation2 + $0x8] sm:$0x1] %vm1811_vm5, %v1853_v40 }
 0x366   : > { %v1858_v61 = vpop.permute.xlu1 %1857 }
 0x367   : > { %1860 = vst.msk [vmem:[#allocation2 + $0x8] sm:$0x1] %vm1817_vm6, %v1858_v61 }
 0x369   : > { %v1809_v62 = vpop.permute.xlu0 %1808 }
 0x36a   : > { %1812 = vst.msk [vmem:[#allocation2] sm:$0x1] %vm1811_vm5, %v1809_v62  ;;  %v1863_v14 = vpop.permute.xlu1 %1862 }
 0x36b   : > { %1865 = vst.msk [vmem:[#allocation2 + $0x8] sm:$0x1] %vm1823_vm7, %v1863_v14 }
 0x36d   : > { %v1815_v0 = vpop.permute.xlu0 %1814 }
 0x36e   : > { %1818 = vst.msk [vmem:[#allocation2] sm:$0x1] %vm1817_vm6, %v1815_v0  ;;  %v1868_v1 = vpop.permute.xlu1 %1867 }
 0x36f   : > { %1870 = vst.msk [vmem:[#allocation2 + $0x8] sm:$0x1] %vm1829_vm8, %v1868_v1 }
 0x371   : > { %v1821_v2 = vpop.permute.xlu0 %1820 }
 0x372   : > { %1824 = vst.msk [vmem:[#allocation2] sm:$0x1] %vm1823_vm7, %v1821_v2  ;;  %v1873_v5 = vpop.permute.xlu1 %1872 }
 0x373   : > { %1875 = vst.msk [vmem:[#allocation2 + $0x8] sm:$0x1] %vm1835_vm9, %v1873_v5 }
 0x375   : > { %v1827_v63 = vpop.permute.xlu0 %1826 }
 0x376   : > { %1830 = vst.msk [vmem:[#allocation2] sm:$0x1] %vm1829_vm8, %v1827_v63  ;;  %v1878_v25 = vpop.permute.xlu1 %1877 }
 0x377   : > { %1880 = vst.msk [vmem:[#allocation2 + $0x8] sm:$0x1] %vm1841_vm10, %v1878_v25 }
 0x379   : > { %v1833_v7 = vpop.permute.xlu0 %1832 }
 0x37a   : > { %1836 = vst.msk [vmem:[#allocation2] sm:$0x1] %vm1835_vm9, %v1833_v7  ;;  %v1883_v8 = vpop.permute.xlu1 %1882 }
 0x37b   : > { %1885 = vst.msk [vmem:[#allocation2 + $0x8] sm:$0x1] %vm1847_vm11, %v1883_v8 }
 0x37d   : > { %v1839_v9 = vpop.permute.xlu0 %1838 }
 0x37e   : > { %1842 = vst.msk [vmem:[#allocation2] sm:$0x1] %vm1841_vm10, %v1839_v9 }
 0x381   : > { %v1845_v11 = vpop.permute.xlu0 %1844 }
 0x382   : > { %1848 = vst.msk [vmem:[#allocation2] sm:$0x1] %vm1847_vm11, %v1845_v11 }
 0x389   : > { %v1886_v16 = vld [vmem:[#allocation2] ss:$8 sm:$0x3] }
 0x38a   : > { %v1892_v18 = vrot.slane %v1886_v16, %v1891_v12  ;;  %v1896_v30 = vrot.slane %v1886_v16, %v1895_v15 }
 0x38c   : > { %v1897_v3 = vcombine.low %v1892_v18, %v1896_v30 }
 0x38e   : > { %v1899_v55 = vmul.f32 %v1897_v3, %v1887_v19 }
 0x390   : > { %1900 = vst [vmem:[%s201_s8] sm:$0xff] %v1899_v55 }
 0x391   : > { %2261 = shalt.err (!%p2258_p3)
}
 0x392   : > { %s2262_s11 = scalar_lea.hbm %s1914_s9, 128  ;;  %s2266_s21 = scalar_lea.hbm %s3342_s3, 256 }
 0x393   : > { %p2263_p12 = scmp.ne.s32.totalorder %s1914_s9, %s2262_s11  ;;  %p2267_p10 = scmp.lt.s32.totalorder %s1914_s9, %s3342_s3 }
 0x394   : > { %p2268_p6 = scmp.lt.s32.totalorder %s2266_s21, %s2262_s11 }
 0x395   : > { %p2264_p5 = pnand %p2263_p12, %p3359_p9 }
 0x396   : > { %p2269_p4 = por %p2268_p6, %p2267_p10 }
 0x397   : > { %p2265_p7 = pneg %p2264_p5 }
 0x399   : > { %p2270_p8 = pnand %p2269_p4, %p2265_p7 }
 0x39b   : > { %2273 = shalt.err (!%p2270_p8)
}
 0x39c   : > { %2121 = dma.vmem_to_hbm [thread:$0]  (%p3359_p9), %s1917_s13, 128, %s1914_s9, %s1902_s19  }
 0x39d PF: > { %s1928_s28 = sand.u32 1, %s2304_s14   ;;  %p3360_p11 = scmp.ne.s32.totalorder %s3348_s20, 0 }
 0x39e   : > { %p3361_p13 = scmp.ge.s32.totalorder %s2316_s17, 2  ;;  %s1929_s29 = scalar_lea.sflag [#allocation8], %s1928_s28 }
 0x3a0   : > { %p2132_p2 = pnand %p3361_p13, %p3360_p11 }
 0x3a2   : > { %p2133_p1 = pneg %p2132_p2 }
 0x3a4   : > { %2299 = dma.done.wait (%p2133_p1), %s1929_s29, 128  }
 0x3a5   : > { %2301 = vsyncadd (%p2133_p1), %s1929_s29, 4294967168  ;;  %p18_p0 = scmp.ge.s32.totalorder %s2419_s25, 4   ;;  %s3362_s14 = smov %s2308_s15 }
 0x3a6   : > { %s3363_s15 = smov %s2312_s16  ;;  %s3364_s16 = smov %s2443_s5 }
 0x3a7   : > { %s3365_s17 = smov %s2419_s25  ;;  %20 = sbr.rel (!%p18_p0) target bundleno = 8 (0x8), region = 83 }
 0x3ac   :  { %1934 = vsyncpa [#allocation7], 1 }
 0x3ad   :  { %1936 = vsyncpa [#allocation7 + $0x1], 1 }
 0x3ae   :  { %1937 = vsyncpa [#allocation8], 1 }
 0x3af   :  { %1939 = vsyncpa [#allocation8 + $0x1], 1 }
 0x3b0   :  { %1940 = vsyncpa [#allocation9], 1 }
 0x3b1   :  { %1942 = vsyncpa [#allocation9 + $0x1], 1 }

</bundles_post_ra>
